<compile_context>
chip_gen: v7x
topology: tpu7x:2x2x1
jax: 0.10.0
libtpu: 0.0.40
codegen_flags: <defaults>
</compile_context>

<pallas_src>
import functools

import jax
import jax.numpy as jnp
from jax import lax
from jax.experimental import pallas as pl
from jax.experimental.pallas import tpu as pltpu


def _round_up(x, m):
    return ((x + m - 1) // m) * m


# ----------------------------------------------------------------------------
# Fused decoder kernel: shared MLP + 4x (matricized ConvTranspose2d [+ ELU]),
# BOTH heads at once (heads are packed along the lane axis).
# ----------------------------------------------------------------------------
def _decoder_kernel(feat_ref, w0_ref, b0_ref, *rest):
    out_ref = rest[-1]
    layer_refs = rest[:-1]
    n_layers = len(layer_refs) // 3

    # Shared MLP (Linear(in_dim, 32*cnn_depth)), fused weight = [W0 | W0 | pad].
    x = jnp.dot(feat_ref[...], w0_ref[...],
                preferred_element_type=jnp.float32) + b0_ref[...]

    for l in range(n_layers):
        m_ref, p_ref, b_ref = layer_refs[3 * l:3 * l + 3]
        K = p_ref.shape[0]                       # number of height taps
        T = m_ref.shape[1] // K                  # padded (both-head) column width

        # Width stage: ALL taps + BOTH heads in ONE lane-dense MXU matmul.
        u = jnp.dot(x, m_ref[...], preferred_element_type=jnp.float32)   # (NB*H, K*T)

        if l == n_layers - 1:
            # Final layer: accumulate taps directly into the output VMEM buffer
            # (bounds the live vreg set, no ELU on the last layer).
            out_ref[...] = (jnp.dot(p_ref[0], u[:, :T],
                                    preferred_element_type=jnp.float32) + b_ref[...])
            for kh in range(1, K):
                out_ref[...] = out_ref[...] + jnp.dot(
                    u[:, kh * T:(kh + 1) * T].T.T if False else p_ref[kh],
                    u[:, kh * T:(kh + 1) * T],
                    preferred_element_type=jnp.float32)
        else:
            acc = (jnp.dot(p_ref[0], u[:, :T],
                           preferred_element_type=jnp.float32) + b_ref[...])
            for kh in range(1, K):
                acc = acc + jnp.dot(p_ref[kh], u[:, kh * T:(kh + 1) * T],
                                    preferred_element_type=jnp.float32)
            # ELU(alpha=1); clamp the exp argument so the untaken branch never overflows.
            x = jnp.where(acc > 0.0, acc, jnp.exp(jnp.minimum(acc, 0.0)) - 1.0)


# ----------------------------------------------------------------------------
# Host-side (XLA) weight preparation.
#   Per-head width remap:  M[kh, iw*Cin+ci, ow*Cout+co] = W_pt[ci,co,kh,ow-iw*s]
#   Height scatter:        P[kh, n*Ho+oh, n'*H+ih] = (n==n') & (oh == ih*s + kh)
#   Heads are packed side-by-side into lane-padded blocks (block-diagonal M).
# ----------------------------------------------------------------------------
def _head_width_mats(w_pt, H, W, stride):
    Cin, Cout, K, _ = w_pt.shape
    s = stride
    Ho, Wo = (H - 1) * s + K, (W - 1) * s + K

    iw = jnp.arange(W)[:, None]
    ow = jnp.arange(Wo)[None, :]
    kw = ow - iw * s                               # (W, Wo)
    valid = ((kw >= 0) & (kw < K)).astype(w_pt.dtype)
    kw_c = jnp.clip(kw, 0, K - 1)

    t = w_pt[:, :, :, kw_c] * valid[None, None, None, :, :]   # (Cin,Cout,K,W,Wo)
    t = jnp.transpose(t, (2, 3, 0, 4, 1))                      # (K,W,Cin,Wo,Cout)
    return t.reshape(K, W * Cin, Wo * Cout), Ho, Wo


def build_fused_layer(conv_s, conv_g, n_batch, H, W, stride, in_head_w, in_total_w):
    (w_s, b_s), (w_g, b_g) = conv_s, conv_g
    Cin, Cout, K, _ = w_s.shape
    s = stride
    assert in_head_w == W * Cin

    M_s, Ho, Wo = _head_width_mats(w_s, H, W, stride)
    M_g, _, _ = _head_width_mats(w_g, H, W, stride)
    v_out = Wo * Cout
    T_out = _round_up(2 * v_out, 128)              # both heads packed, lane-padded

    M_f = jnp.zeros((in_total_w, K * T_out), jnp.float32)
    bias = jnp.zeros((1, T_out), jnp.float32)
    for hd, (Mh, bh) in enumerate(((M_s, b_s), (M_g, b_g))):
        for kh in range(K):
            M_f = M_f.at[hd * in_head_w: hd * in_head_w + W * Cin,
                         kh * T_out + hd * v_out: kh * T_out + hd * v_out + v_out
                         ].set(Mh[kh])
        bias = bias.at[0, hd * v_out:(hd + 1) * v_out].set(jnp.tile(bh, Wo))

    # 0/1 height-scatter matrix, shared by both heads.
    r = jnp.arange(n_batch * Ho)
    c = jnp.arange(n_batch * H)
    n_r, oh = r // Ho, r % Ho
    n_c, ih = c // H, c % H
    kh = jnp.arange(K)
    P = ((n_r[None, :, None] == n_c[None, None, :]) &
         (oh[None, :, None] == ih[None, None, :] * s + kh[:, None, None]))
    P = P.astype(jnp.float32)

    return M_f, P, bias, Ho, Wo, v_out, T_out


# ----------------------------------------------------------------------------
# Full forward
# ----------------------------------------------------------------------------
def cnn_decoder_forward(features, params, stride):
    bd = features.shape[:-1]
    feat2 = features.reshape(-1, features.shape[-1]).astype(jnp.float32)   # flatten_batch
    NB, in_dim = feat2.shape

    w0, b0 = params["mlp"]
    hidden = w0.shape[1]
    out_dim = params["conv_static"][-1][0].shape[1]

    # Fused MLP weights: columns = [head0 hidden | head1 hidden | pad->128k].
    T0 = _round_up(2 * hidden, 128)
    w0f = jnp.zeros((in_dim, T0), jnp.float32)
    w0f = w0f.at[:, :hidden].set(w0).at[:, hidden:2 * hidden].set(w0)
    b0f = jnp.zeros((1, T0), jnp.float32)
    b0f = b0f.at[0, :hidden].set(b0).at[0, hidden:2 * hidden].set(b0)

    kernel_inputs = [feat2, w0f, b0f]
    in_specs = [
        pl.BlockSpec((NB, in_dim), lambda i: (0, 0)),
        pl.BlockSpec((in_dim, T0), lambda i: (0, 0)),
        pl.BlockSpec((1, T0), lambda i: (0, 0)),
    ]

    H = W = 1
    head_w, total_w = hidden, T0
    for conv_s, conv_g in zip(params["conv_static"], params["conv_gripper"]):
        M_f, P, bias, Ho, Wo, v_out, T_out = build_fused_layer(
            conv_s, conv_g, NB, H, W, stride, head_w, total_w)
        K = P.shape[0]
        kernel_inputs += [M_f, P, bias]
        in_specs += [
            pl.BlockSpec((total_w, K * T_out), lambda i: (0, 0)),
            pl.BlockSpec((K, NB * Ho, NB * H), lambda i: (0, 0, 0)),
            pl.BlockSpec((1, T_out), lambda i: (0, 0)),
        ]
        H, W, head_w, total_w = Ho, Wo, v_out, T_out

    out_rows = NB * H
    out = pl.pallas_call(
        _decoder_kernel,
        grid=(1,),
        in_specs=in_specs,
        out_specs=pl.BlockSpec((out_rows, total_w), lambda i: (0, 0)),
        out_shape=jax.ShapeDtypeStruct((out_rows, total_w), jnp.float32),
        compiler_params=pltpu.CompilerParams(dimension_semantics=("arbitrary",)),
    )(*kernel_inputs)

    # Final layout glue on the small decoded images only (outside the kernel):
    # rows = (n, oh), cols = [head0 (ow,co) | head1 (ow,co) | pad]  ->  NCHW per head.
    y = out.reshape(NB, H, total_w)
    v = W * out_dim

    def take(hd):
        yh = y[:, :, hd * v:(hd + 1) * v].reshape(NB, H, W, out_dim)
        yh = jnp.transpose(yh, (0, 3, 1, 2))
        return yh.reshape(bd + (out_dim, H, W))

    return take(0), take(1)


# ----------------------------------------------------------------------------
# Deterministic parameter init (synthetic; shapes match the PyTorch __init__)
# ----------------------------------------------------------------------------
def _uniform(key, shape, fan_in):
    bound = 1.0 / (float(fan_in) ** 0.5)
    return jax.random.uniform(key, shape, jnp.float32, -bound, bound)


def init_params(key, in_dim, cnn_depth, kernels, out_dim=3):
    hidden = cnn_depth * 32
    keys = iter(jax.random.split(key, 20))

    def lin(din, dout):
        return (_uniform(next(keys), (din, dout), din),
                _uniform(next(keys), (dout,), din))

    def convt(cin, cout, k):
        return (_uniform(next(keys), (cin, cout, k, k), cin * k * k),
                _uniform(next(keys), (cout,), cin * k * k))

    chans = [hidden, cnn_depth * 4, cnn_depth * 2, cnn_depth, out_dim]
    return {
        # MLP head is shared between static & gripper (as in the PyTorch code).
        "mlp": lin(in_dim, hidden),
        "conv_static": [convt(chans[i], chans[i + 1], kernels[i]) for i in range(4)],
        "conv_gripper": [convt(chans[i], chans[i + 1], kernels[i]) for i in range(4)],
    }


# ----------------------------------------------------------------------------
# Pure-JAX (XLA conv) reference for correctness checking
# ----------------------------------------------------------------------------
def _ref_convt_nchw(x, w_pt, b, s, apply_act):
    K = w_pt.shape[2]
    rhs = jnp.transpose(jnp.flip(w_pt, (2, 3)), (1, 0, 2, 3))  # (Cout,Cin,K,K)
    y = lax.conv_general_dilated(
        x, rhs, window_strides=(1, 1),
        padding=[(K - 1, K - 1), (K - 1, K - 1)],
        lhs_dilation=(s, s),
        dimension_numbers=("NCHW", "OIHW", "NCHW"))
    y = y + b.reshape(1, -1, 1, 1)
    if apply_act:
        y = jnp.where(y > 0.0, y, jnp.exp(jnp.minimum(y, 0.0)) - 1.0)
    return y


def reference_forward(features, params, stride):
    bd = features.shape[:-1]
    x2 = features.reshape(-1, features.shape[-1])

    def head(convs):
        w0, b0 = params["mlp"]
        h = x2 @ w0 + b0
        h = h.reshape(h.shape[0], -1, 1, 1)
        for idx, (w, b) in enumerate(convs):
            h = _ref_convt_nchw(h, w, b, stride, idx < len(convs) - 1)
        return h.reshape(bd + h.shape[1:])

    return head(params["conv_static"]), head(params["conv_gripper"])


# ----------------------------------------------------------------------------
if __name__ == "__main__":
    in_dim = 32
    cnn_depth = 4
    kernels = [3, 3, 3, 3]
    stride = 2

    key = jax.random.PRNGKey(0)
    pkey, fkey = jax.random.split(key)
    params = init_params(pkey, in_dim, cnn_depth, kernels)
    features = jax.random.normal(fkey, (2, 3, in_dim), jnp.float32)

    fwd = jax.jit(functools.partial(cnn_decoder_forward, stride=stride))
    y_s, y_g = fwd(features, params)
    jax.block_until_ready((y_s, y_g))

    # spatial sizes: 1 -> 3 -> 7 -> 15 -> 31 for kernels [3,3,3,3], stride 2
    assert y_s.shape == (2, 3, 3, 31, 31), y_s.shape
    assert y_g.shape == (2, 3, 3, 31, 31), y_g.shape

    r_s, r_g = reference_forward(features, params, stride)
    err = max(float(jnp.max(jnp.abs(y_s - r_s))), float(jnp.max(jnp.abs(y_g - r_g))))
    assert err < 1e-3, f"mismatch vs reference: {err}"

    print("KERNEL_OK")
</pallas_src>

<mosaic_0001>
module attributes {stable_mosaic.version = 11 : i64} {
  func.func @_decoder_kernel(%arg0: i32, %arg1: memref<6x32xf32, #tpu.memory_space<vmem>>, %arg2: memref<32x256xf32, #tpu.memory_space<vmem>>, %arg3: memref<1x256xf32, #tpu.memory_space<vmem>>, %arg4: memref<256x384xf32, #tpu.memory_space<vmem>>, %arg5: memref<3x18x6xf32, #tpu.memory_space<vmem>>, %arg6: memref<1x128xf32, #tpu.memory_space<vmem>>, %arg7: memref<128x384xf32, #tpu.memory_space<vmem>>, %arg8: memref<3x42x18xf32, #tpu.memory_space<vmem>>, %arg9: memref<1x128xf32, #tpu.memory_space<vmem>>, %arg10: memref<128x384xf32, #tpu.memory_space<vmem>>, %arg11: memref<3x90x42xf32, #tpu.memory_space<vmem>>, %arg12: memref<1x128xf32, #tpu.memory_space<vmem>>, %arg13: memref<128x768xf32, #tpu.memory_space<vmem>>, %arg14: memref<3x186x90xf32, #tpu.memory_space<vmem>>, %arg15: memref<1x256xf32, #tpu.memory_space<vmem>>, %arg16: memref<186x256xf32, #tpu.memory_space<vmem>>) attributes {dimension_semantics = [#tpu.dimension_semantics<arbitrary>], iteration_bounds = array<i64: 1>, scalar_prefetch = 0 : i64, scratch_operands = 0 : i64, tpu.core_type = #tpu.core_type<tc>, window_params = [{pipeline_mode = #tpu.pipeline_mode<synchronous>, transform_indices = @transform_0, window_bounds = array<i64: 6, 32>}, {pipeline_mode = #tpu.pipeline_mode<synchronous>, transform_indices = @transform_1, window_bounds = array<i64: 32, 256>}, {pipeline_mode = #tpu.pipeline_mode<synchronous>, transform_indices = @transform_2, window_bounds = array<i64: 1, 256>}, {pipeline_mode = #tpu.pipeline_mode<synchronous>, transform_indices = @transform_3, window_bounds = array<i64: 256, 384>}, {pipeline_mode = #tpu.pipeline_mode<synchronous>, transform_indices = @transform_4, window_bounds = array<i64: 3, 18, 6>}, {pipeline_mode = #tpu.pipeline_mode<synchronous>, transform_indices = @transform_5, window_bounds = array<i64: 1, 128>}, {pipeline_mode = #tpu.pipeline_mode<synchronous>, transform_indices = @transform_6, window_bounds = array<i64: 128, 384>}, {pipeline_mode = #tpu.pipeline_mode<synchronous>, transform_indices = @transform_7, window_bounds = array<i64: 3, 42, 18>}, {pipeline_mode = #tpu.pipeline_mode<synchronous>, transform_indices = @transform_8, window_bounds = array<i64: 1, 128>}, {pipeline_mode = #tpu.pipeline_mode<synchronous>, transform_indices = @transform_9, window_bounds = array<i64: 128, 384>}, {pipeline_mode = #tpu.pipeline_mode<synchronous>, transform_indices = @transform_10, window_bounds = array<i64: 3, 90, 42>}, {pipeline_mode = #tpu.pipeline_mode<synchronous>, transform_indices = @transform_11, window_bounds = array<i64: 1, 128>}, {pipeline_mode = #tpu.pipeline_mode<synchronous>, transform_indices = @transform_12, window_bounds = array<i64: 128, 768>}, {pipeline_mode = #tpu.pipeline_mode<synchronous>, transform_indices = @transform_13, window_bounds = array<i64: 3, 186, 90>}, {pipeline_mode = #tpu.pipeline_mode<synchronous>, transform_indices = @transform_14, window_bounds = array<i64: 1, 256>}, {pipeline_mode = #tpu.pipeline_mode<synchronous>, transform_indices = @transform_15, window_bounds = array<i64: 186, 256>}]} {
    %c0 = arith.constant 0 : index
    %c0_0 = arith.constant 0 : index
    %0 = vector.load %arg1[%c0, %c0_0] : memref<6x32xf32, #tpu.memory_space<vmem>>, vector<6x32xf32>
    %c0_1 = arith.constant 0 : index
    %c0_2 = arith.constant 0 : index
    %1 = vector.load %arg2[%c0_1, %c0_2] : memref<32x256xf32, #tpu.memory_space<vmem>>, vector<32x256xf32>
    %cst = arith.constant dense<0.000000e+00> : vector<6x256xf32>
    %2 = tpu.matmul %0, %1, %cst {dimension_numbers = #tpu.dot_dimension_numbers<[1], [0], [0], [1], [0, 0, 1, 1], [], []>} : vector<6x32xf32>, vector<32x256xf32>, vector<6x256xf32> -> vector<6x256xf32>
    %c0_3 = arith.constant 0 : index
    %c0_4 = arith.constant 0 : index
    %3 = vector.load %arg3[%c0_3, %c0_4] : memref<1x256xf32, #tpu.memory_space<vmem>>, vector<1x256xf32>
    %4 = vector.broadcast %3 : vector<1x256xf32> to vector<6x256xf32>
    %5 = arith.addf %2, %4 : vector<6x256xf32>
    %c0_5 = arith.constant 0 : index
    %c0_6 = arith.constant 0 : index
    %6 = vector.load %arg4[%c0_5, %c0_6] : memref<256x384xf32, #tpu.memory_space<vmem>>, vector<256x384xf32>
    %cst_7 = arith.constant dense<0.000000e+00> : vector<6x384xf32>
    %7 = tpu.matmul %5, %6, %cst_7 {dimension_numbers = #tpu.dot_dimension_numbers<[1], [0], [0], [1], [0, 0, 1, 1], [], []>} : vector<6x256xf32>, vector<256x384xf32>, vector<6x384xf32> -> vector<6x384xf32>
    %c0_8 = arith.constant 0 : index
    %c0_9 = arith.constant 0 : index
    %c0_10 = arith.constant 0 : index
    %8 = vector.load %arg5[%c0_8, %c0_9, %c0_10] : memref<3x18x6xf32, #tpu.memory_space<vmem>>, vector<1x18x6xf32>
    %9 = vector.shape_cast %8 : vector<1x18x6xf32> to vector<18x6xf32>
    %10 = vector.extract_strided_slice %7 {offsets = [0, 0], sizes = [6, 128], strides = [1, 1]} : vector<6x384xf32> to vector<6x128xf32>
    %cst_11 = arith.constant dense<0.000000e+00> : vector<18x128xf32>
    %11 = tpu.matmul %9, %10, %cst_11 {dimension_numbers = #tpu.dot_dimension_numbers<[1], [0], [0], [1], [0, 0, 1, 1], [], []>} : vector<18x6xf32>, vector<6x128xf32>, vector<18x128xf32> -> vector<18x128xf32>
    %c0_12 = arith.constant 0 : index
    %c0_13 = arith.constant 0 : index
    %12 = vector.load %arg6[%c0_12, %c0_13] : memref<1x128xf32, #tpu.memory_space<vmem>>, vector<1x128xf32>
    %13 = vector.broadcast %12 : vector<1x128xf32> to vector<18x128xf32>
    %14 = arith.addf %11, %13 : vector<18x128xf32>
    %c1 = arith.constant 1 : index
    %c0_14 = arith.constant 0 : index
    %c0_15 = arith.constant 0 : index
    %15 = vector.load %arg5[%c1, %c0_14, %c0_15] : memref<3x18x6xf32, #tpu.memory_space<vmem>>, vector<1x18x6xf32>
    %16 = vector.shape_cast %15 : vector<1x18x6xf32> to vector<18x6xf32>
    %17 = vector.extract_strided_slice %7 {offsets = [0, 128], sizes = [6, 128], strides = [1, 1]} : vector<6x384xf32> to vector<6x128xf32>
    %cst_16 = arith.constant dense<0.000000e+00> : vector<18x128xf32>
    %18 = tpu.matmul %16, %17, %cst_16 {dimension_numbers = #tpu.dot_dimension_numbers<[1], [0], [0], [1], [0, 0, 1, 1], [], []>} : vector<18x6xf32>, vector<6x128xf32>, vector<18x128xf32> -> vector<18x128xf32>
    %19 = arith.addf %14, %18 : vector<18x128xf32>
    %c2 = arith.constant 2 : index
    %c0_17 = arith.constant 0 : index
    %c0_18 = arith.constant 0 : index
    %20 = vector.load %arg5[%c2, %c0_17, %c0_18] : memref<3x18x6xf32, #tpu.memory_space<vmem>>, vector<1x18x6xf32>
    %21 = vector.shape_cast %20 : vector<1x18x6xf32> to vector<18x6xf32>
    %22 = vector.extract_strided_slice %7 {offsets = [0, 256], sizes = [6, 128], strides = [1, 1]} : vector<6x384xf32> to vector<6x128xf32>
    %cst_19 = arith.constant dense<0.000000e+00> : vector<18x128xf32>
    %23 = tpu.matmul %21, %22, %cst_19 {dimension_numbers = #tpu.dot_dimension_numbers<[1], [0], [0], [1], [0, 0, 1, 1], [], []>} : vector<18x6xf32>, vector<6x128xf32>, vector<18x128xf32> -> vector<18x128xf32>
    %24 = arith.addf %19, %23 : vector<18x128xf32>
    %cst_20 = arith.constant 0.000000e+00 : f32
    %25 = vector.broadcast %cst_20 : f32 to vector<18x128xf32>
    %26 = arith.cmpf ogt, %24, %25 : vector<18x128xf32>
    %cst_21 = arith.constant 0.000000e+00 : f32
    %27 = vector.broadcast %cst_21 : f32 to vector<18x128xf32>
    %28 = arith.minimumf %24, %27 : vector<18x128xf32>
    %29 = math.exp %28 : vector<18x128xf32>
    %cst_22 = arith.constant 1.000000e+00 : f32
    %30 = vector.broadcast %cst_22 : f32 to vector<18x128xf32>
    %31 = arith.subf %29, %30 : vector<18x128xf32>
    %32 = arith.select %26, %24, %31 : vector<18x128xi1>, vector<18x128xf32>
    %c0_23 = arith.constant 0 : index
    %c0_24 = arith.constant 0 : index
    %33 = vector.load %arg7[%c0_23, %c0_24] : memref<128x384xf32, #tpu.memory_space<vmem>>, vector<128x384xf32>
    %cst_25 = arith.constant dense<0.000000e+00> : vector<18x384xf32>
    %34 = tpu.matmul %32, %33, %cst_25 {dimension_numbers = #tpu.dot_dimension_numbers<[1], [0], [0], [1], [0, 0, 1, 1], [], []>} : vector<18x128xf32>, vector<128x384xf32>, vector<18x384xf32> -> vector<18x384xf32>
    %c0_26 = arith.constant 0 : index
    %c0_27 = arith.constant 0 : index
    %c0_28 = arith.constant 0 : index
    %35 = vector.load %arg8[%c0_26, %c0_27, %c0_28] : memref<3x42x18xf32, #tpu.memory_space<vmem>>, vector<1x42x18xf32>
    %36 = vector.shape_cast %35 : vector<1x42x18xf32> to vector<42x18xf32>
    %37 = vector.extract_strided_slice %34 {offsets = [0, 0], sizes = [18, 128], strides = [1, 1]} : vector<18x384xf32> to vector<18x128xf32>
    %cst_29 = arith.constant dense<0.000000e+00> : vector<42x128xf32>
    %38 = tpu.matmul %36, %37, %cst_29 {dimension_numbers = #tpu.dot_dimension_numbers<[1], [0], [0], [1], [0, 0, 1, 1], [], []>} : vector<42x18xf32>, vector<18x128xf32>, vector<42x128xf32> -> vector<42x128xf32>
    %c0_30 = arith.constant 0 : index
    %c0_31 = arith.constant 0 : index
    %39 = vector.load %arg9[%c0_30, %c0_31] : memref<1x128xf32, #tpu.memory_space<vmem>>, vector<1x128xf32>
    %40 = vector.broadcast %39 : vector<1x128xf32> to vector<42x128xf32>
    %41 = arith.addf %38, %40 : vector<42x128xf32>
    %c1_32 = arith.constant 1 : index
    %c0_33 = arith.constant 0 : index
    %c0_34 = arith.constant 0 : index
    %42 = vector.load %arg8[%c1_32, %c0_33, %c0_34] : memref<3x42x18xf32, #tpu.memory_space<vmem>>, vector<1x42x18xf32>
    %43 = vector.shape_cast %42 : vector<1x42x18xf32> to vector<42x18xf32>
    %44 = vector.extract_strided_slice %34 {offsets = [0, 128], sizes = [18, 128], strides = [1, 1]} : vector<18x384xf32> to vector<18x128xf32>
    %cst_35 = arith.constant dense<0.000000e+00> : vector<42x128xf32>
    %45 = tpu.matmul %43, %44, %cst_35 {dimension_numbers = #tpu.dot_dimension_numbers<[1], [0], [0], [1], [0, 0, 1, 1], [], []>} : vector<42x18xf32>, vector<18x128xf32>, vector<42x128xf32> -> vector<42x128xf32>
    %46 = arith.addf %41, %45 : vector<42x128xf32>
    %c2_36 = arith.constant 2 : index
    %c0_37 = arith.constant 0 : index
    %c0_38 = arith.constant 0 : index
    %47 = vector.load %arg8[%c2_36, %c0_37, %c0_38] : memref<3x42x18xf32, #tpu.memory_space<vmem>>, vector<1x42x18xf32>
    %48 = vector.shape_cast %47 : vector<1x42x18xf32> to vector<42x18xf32>
    %49 = vector.extract_strided_slice %34 {offsets = [0, 256], sizes = [18, 128], strides = [1, 1]} : vector<18x384xf32> to vector<18x128xf32>
    %cst_39 = arith.constant dense<0.000000e+00> : vector<42x128xf32>
    %50 = tpu.matmul %48, %49, %cst_39 {dimension_numbers = #tpu.dot_dimension_numbers<[1], [0], [0], [1], [0, 0, 1, 1], [], []>} : vector<42x18xf32>, vector<18x128xf32>, vector<42x128xf32> -> vector<42x128xf32>
    %51 = arith.addf %46, %50 : vector<42x128xf32>
    %cst_40 = arith.constant 0.000000e+00 : f32
    %52 = vector.broadcast %cst_40 : f32 to vector<42x128xf32>
    %53 = arith.cmpf ogt, %51, %52 : vector<42x128xf32>
    %cst_41 = arith.constant 0.000000e+00 : f32
    %54 = vector.broadcast %cst_41 : f32 to vector<42x128xf32>
    %55 = arith.minimumf %51, %54 : vector<42x128xf32>
    %56 = math.exp %55 : vector<42x128xf32>
    %cst_42 = arith.constant 1.000000e+00 : f32
    %57 = vector.broadcast %cst_42 : f32 to vector<42x128xf32>
    %58 = arith.subf %56, %57 : vector<42x128xf32>
    %59 = arith.select %53, %51, %58 : vector<42x128xi1>, vector<42x128xf32>
    %c0_43 = arith.constant 0 : index
    %c0_44 = arith.constant 0 : index
    %60 = vector.load %arg10[%c0_43, %c0_44] : memref<128x384xf32, #tpu.memory_space<vmem>>, vector<128x384xf32>
    %cst_45 = arith.constant dense<0.000000e+00> : vector<42x384xf32>
    %61 = tpu.matmul %59, %60, %cst_45 {dimension_numbers = #tpu.dot_dimension_numbers<[1], [0], [0], [1], [0, 0, 1, 1], [], []>} : vector<42x128xf32>, vector<128x384xf32>, vector<42x384xf32> -> vector<42x384xf32>
    %c0_46 = arith.constant 0 : index
    %c0_47 = arith.constant 0 : index
    %c0_48 = arith.constant 0 : index
    %62 = vector.load %arg11[%c0_46, %c0_47, %c0_48] : memref<3x90x42xf32, #tpu.memory_space<vmem>>, vector<1x90x42xf32>
    %63 = vector.shape_cast %62 : vector<1x90x42xf32> to vector<90x42xf32>
    %64 = vector.extract_strided_slice %61 {offsets = [0, 0], sizes = [42, 128], strides = [1, 1]} : vector<42x384xf32> to vector<42x128xf32>
    %cst_49 = arith.constant dense<0.000000e+00> : vector<90x128xf32>
    %65 = tpu.matmul %63, %64, %cst_49 {dimension_numbers = #tpu.dot_dimension_numbers<[1], [0], [0], [1], [0, 0, 1, 1], [], []>} : vector<90x42xf32>, vector<42x128xf32>, vector<90x128xf32> -> vector<90x128xf32>
    %c0_50 = arith.constant 0 : index
    %c0_51 = arith.constant 0 : index
    %66 = vector.load %arg12[%c0_50, %c0_51] : memref<1x128xf32, #tpu.memory_space<vmem>>, vector<1x128xf32>
    %67 = vector.broadcast %66 : vector<1x128xf32> to vector<90x128xf32>
    %68 = arith.addf %65, %67 : vector<90x128xf32>
    %c1_52 = arith.constant 1 : index
    %c0_53 = arith.constant 0 : index
    %c0_54 = arith.constant 0 : index
    %69 = vector.load %arg11[%c1_52, %c0_53, %c0_54] : memref<3x90x42xf32, #tpu.memory_space<vmem>>, vector<1x90x42xf32>
    %70 = vector.shape_cast %69 : vector<1x90x42xf32> to vector<90x42xf32>
    %71 = vector.extract_strided_slice %61 {offsets = [0, 128], sizes = [42, 128], strides = [1, 1]} : vector<42x384xf32> to vector<42x128xf32>
    %cst_55 = arith.constant dense<0.000000e+00> : vector<90x128xf32>
    %72 = tpu.matmul %70, %71, %cst_55 {dimension_numbers = #tpu.dot_dimension_numbers<[1], [0], [0], [1], [0, 0, 1, 1], [], []>} : vector<90x42xf32>, vector<42x128xf32>, vector<90x128xf32> -> vector<90x128xf32>
    %73 = arith.addf %68, %72 : vector<90x128xf32>
    %c2_56 = arith.constant 2 : index
    %c0_57 = arith.constant 0 : index
    %c0_58 = arith.constant 0 : index
    %74 = vector.load %arg11[%c2_56, %c0_57, %c0_58] : memref<3x90x42xf32, #tpu.memory_space<vmem>>, vector<1x90x42xf32>
    %75 = vector.shape_cast %74 : vector<1x90x42xf32> to vector<90x42xf32>
    %76 = vector.extract_strided_slice %61 {offsets = [0, 256], sizes = [42, 128], strides = [1, 1]} : vector<42x384xf32> to vector<42x128xf32>
    %cst_59 = arith.constant dense<0.000000e+00> : vector<90x128xf32>
    %77 = tpu.matmul %75, %76, %cst_59 {dimension_numbers = #tpu.dot_dimension_numbers<[1], [0], [0], [1], [0, 0, 1, 1], [], []>} : vector<90x42xf32>, vector<42x128xf32>, vector<90x128xf32> -> vector<90x128xf32>
    %78 = arith.addf %73, %77 : vector<90x128xf32>
    %cst_60 = arith.constant 0.000000e+00 : f32
    %79 = vector.broadcast %cst_60 : f32 to vector<90x128xf32>
    %80 = arith.cmpf ogt, %78, %79 : vector<90x128xf32>
    %cst_61 = arith.constant 0.000000e+00 : f32
    %81 = vector.broadcast %cst_61 : f32 to vector<90x128xf32>
    %82 = arith.minimumf %78, %81 : vector<90x128xf32>
    %83 = math.exp %82 : vector<90x128xf32>
    %cst_62 = arith.constant 1.000000e+00 : f32
    %84 = vector.broadcast %cst_62 : f32 to vector<90x128xf32>
    %85 = arith.subf %83, %84 : vector<90x128xf32>
    %86 = arith.select %80, %78, %85 : vector<90x128xi1>, vector<90x128xf32>
    %c0_63 = arith.constant 0 : index
    %c0_64 = arith.constant 0 : index
    %87 = vector.load %arg13[%c0_63, %c0_64] : memref<128x768xf32, #tpu.memory_space<vmem>>, vector<128x768xf32>
    %cst_65 = arith.constant dense<0.000000e+00> : vector<90x768xf32>
    %88 = tpu.matmul %86, %87, %cst_65 {dimension_numbers = #tpu.dot_dimension_numbers<[1], [0], [0], [1], [0, 0, 1, 1], [], []>} : vector<90x128xf32>, vector<128x768xf32>, vector<90x768xf32> -> vector<90x768xf32>
    %c0_66 = arith.constant 0 : index
    %c0_67 = arith.constant 0 : index
    %c0_68 = arith.constant 0 : index
    %89 = vector.load %arg14[%c0_66, %c0_67, %c0_68] : memref<3x186x90xf32, #tpu.memory_space<vmem>>, vector<1x186x90xf32>
    %90 = vector.shape_cast %89 : vector<1x186x90xf32> to vector<186x90xf32>
    %91 = vector.extract_strided_slice %88 {offsets = [0, 0], sizes = [90, 256], strides = [1, 1]} : vector<90x768xf32> to vector<90x256xf32>
    %cst_69 = arith.constant dense<0.000000e+00> : vector<186x256xf32>
    %92 = tpu.matmul %90, %91, %cst_69 {dimension_numbers = #tpu.dot_dimension_numbers<[1], [0], [0], [1], [0, 0, 1, 1], [], []>} : vector<186x90xf32>, vector<90x256xf32>, vector<186x256xf32> -> vector<186x256xf32>
    %c0_70 = arith.constant 0 : index
    %c0_71 = arith.constant 0 : index
    %93 = vector.load %arg15[%c0_70, %c0_71] : memref<1x256xf32, #tpu.memory_space<vmem>>, vector<1x256xf32>
    %94 = vector.broadcast %93 : vector<1x256xf32> to vector<186x256xf32>
    %95 = arith.addf %92, %94 : vector<186x256xf32>
    %c0_72 = arith.constant 0 : index
    %c0_73 = arith.constant 0 : index
    %96 = vector.load %arg16[%c0_72, %c0_73] : memref<186x256xf32, #tpu.memory_space<vmem>>, vector<186x256xf32>
    tpu.vector_store %arg16[%c0_72, %c0_73], %95 {strides = array<i32>} : memref<186x256xf32, #tpu.memory_space<vmem>>, vector<186x256xf32>,
    %c0_74 = arith.constant 0 : index
    %c0_75 = arith.constant 0 : index
    %97 = vector.load %arg16[%c0_74, %c0_75] : memref<186x256xf32, #tpu.memory_space<vmem>>, vector<186x256xf32>
    %c1_76 = arith.constant 1 : index
    %c0_77 = arith.constant 0 : index
    %c0_78 = arith.constant 0 : index
    %98 = vector.load %arg14[%c1_76, %c0_77, %c0_78] : memref<3x186x90xf32, #tpu.memory_space<vmem>>, vector<1x186x90xf32>
    %99 = vector.shape_cast %98 : vector<1x186x90xf32> to vector<186x90xf32>
    %100 = vector.extract_strided_slice %88 {offsets = [0, 256], sizes = [90, 256], strides = [1, 1]} : vector<90x768xf32> to vector<90x256xf32>
    %cst_79 = arith.constant dense<0.000000e+00> : vector<186x256xf32>
    %101 = tpu.matmul %99, %100, %cst_79 {dimension_numbers = #tpu.dot_dimension_numbers<[1], [0], [0], [1], [0, 0, 1, 1], [], []>} : vector<186x90xf32>, vector<90x256xf32>, vector<186x256xf32> -> vector<186x256xf32>
    %102 = arith.addf %97, %101 : vector<186x256xf32>
    %c0_80 = arith.constant 0 : index
    %c0_81 = arith.constant 0 : index
    %103 = vector.load %arg16[%c0_80, %c0_81] : memref<186x256xf32, #tpu.memory_space<vmem>>, vector<186x256xf32>
    tpu.vector_store %arg16[%c0_80, %c0_81], %102 {strides = array<i32>} : memref<186x256xf32, #tpu.memory_space<vmem>>, vector<186x256xf32>,
    %c0_82 = arith.constant 0 : index
    %c0_83 = arith.constant 0 : index
    %104 = vector.load %arg16[%c0_82, %c0_83] : memref<186x256xf32, #tpu.memory_space<vmem>>, vector<186x256xf32>
    %c2_84 = arith.constant 2 : index
    %c0_85 = arith.constant 0 : index
    %c0_86 = arith.constant 0 : index
    %105 = vector.load %arg14[%c2_84, %c0_85, %c0_86] : memref<3x186x90xf32, #tpu.memory_space<vmem>>, vector<1x186x90xf32>
    %106 = vector.shape_cast %105 : vector<1x186x90xf32> to vector<186x90xf32>
    %107 = vector.extract_strided_slice %88 {offsets = [0, 512], sizes = [90, 256], strides = [1, 1]} : vector<90x768xf32> to vector<90x256xf32>
    %cst_87 = arith.constant dense<0.000000e+00> : vector<186x256xf32>
    %108 = tpu.matmul %106, %107, %cst_87 {dimension_numbers = #tpu.dot_dimension_numbers<[1], [0], [0], [1], [0, 0, 1, 1], [], []>} : vector<186x90xf32>, vector<90x256xf32>, vector<186x256xf32> -> vector<186x256xf32>
    %109 = arith.addf %104, %108 : vector<186x256xf32>
    %c0_88 = arith.constant 0 : index
    %c0_89 = arith.constant 0 : index
    %110 = vector.load %arg16[%c0_88, %c0_89] : memref<186x256xf32, #tpu.memory_space<vmem>>, vector<186x256xf32>
    tpu.vector_store %arg16[%c0_88, %c0_89], %109 {strides = array<i32>} : memref<186x256xf32, #tpu.memory_space<vmem>>, vector<186x256xf32>,
    return
  }
  func.func @transform_0(%arg0: i32) -> (i32, i32) {
    %c0_i32 = arith.constant 0 : i32
    %c0_i32_0 = arith.constant 0 : i32
    %c0_i32_1 = arith.constant 0 : i32
    return %c0_i32, %c0_i32_0 : i32, i32
  }
  func.func @transform_1(%arg0: i32) -> (i32, i32) {
    %c0_i32 = arith.constant 0 : i32
    %c0_i32_0 = arith.constant 0 : i32
    %c0_i32_1 = arith.constant 0 : i32
    return %c0_i32, %c0_i32_0 : i32, i32
  }
  func.func @transform_2(%arg0: i32) -> (i32, i32) {
    %c0_i32 = arith.constant 0 : i32
    %c0_i32_0 = arith.constant 0 : i32
    %c0_i32_1 = arith.constant 0 : i32
    return %c0_i32, %c0_i32_0 : i32, i32
  }
  func.func @transform_3(%arg0: i32) -> (i32, i32) {
    %c0_i32 = arith.constant 0 : i32
    %c0_i32_0 = arith.constant 0 : i32
    %c0_i32_1 = arith.constant 0 : i32
    return %c0_i32, %c0_i32_0 : i32, i32
  }
  func.func @transform_4(%arg0: i32) -> (i32, i32, i32) {
    %c0_i32 = arith.constant 0 : i32
    %c0_i32_0 = arith.constant 0 : i32
    %c0_i32_1 = arith.constant 0 : i32
    %c0_i32_2 = arith.constant 0 : i32
    return %c0_i32, %c0_i32_0, %c0_i32_1 : i32, i32, i32
  }
  func.func @transform_5(%arg0: i32) -> (i32, i32) {
    %c0_i32 = arith.constant 0 : i32
    %c0_i32_0 = arith.constant 0 : i32
    %c0_i32_1 = arith.constant 0 : i32
    return %c0_i32, %c0_i32_0 : i32, i32
  }
  func.func @transform_6(%arg0: i32) -> (i32, i32) {
    %c0_i32 = arith.constant 0 : i32
    %c0_i32_0 = arith.constant 0 : i32
    %c0_i32_1 = arith.constant 0 : i32
    return %c0_i32, %c0_i32_0 : i32, i32
  }
  func.func @transform_7(%arg0: i32) -> (i32, i32, i32) {
    %c0_i32 = arith.constant 0 : i32
    %c0_i32_0 = arith.constant 0 : i32
    %c0_i32_1 = arith.constant 0 : i32
    %c0_i32_2 = arith.constant 0 : i32
    return %c0_i32, %c0_i32_0, %c0_i32_1 : i32, i32, i32
  }
  func.func @transform_8(%arg0: i32) -> (i32, i32) {
    %c0_i32 = arith.constant 0 : i32
    %c0_i32_0 = arith.constant 0 : i32
    %c0_i32_1 = arith.constant 0 : i32
    return %c0_i32, %c0_i32_0 : i32, i32
  }
  func.func @transform_9(%arg0: i32) -> (i32, i32) {
    %c0_i32 = arith.constant 0 : i32
    %c0_i32_0 = arith.constant 0 : i32
    %c0_i32_1 = arith.constant 0 : i32
    return %c0_i32, %c0_i32_0 : i32, i32
  }
  func.func @transform_10(%arg0: i32) -> (i32, i32, i32) {
    %c0_i32 = arith.constant 0 : i32
    %c0_i32_0 = arith.constant 0 : i32
    %c0_i32_1 = arith.constant 0 : i32
    %c0_i32_2 = arith.constant 0 : i32
    return %c0_i32, %c0_i32_0, %c0_i32_1 : i32, i32, i32
  }
  func.func @transform_11(%arg0: i32) -> (i32, i32) {
    %c0_i32 = arith.constant 0 : i32
    %c0_i32_0 = arith.constant 0 : i32
    %c0_i32_1 = arith.constant 0 : i32
    return %c0_i32, %c0_i32_0 : i32, i32
  }
  func.func @transform_12(%arg0: i32) -> (i32, i32) {
    %c0_i32 = arith.constant 0 : i32
    %c0_i32_0 = arith.constant 0 : i32
    %c0_i32_1 = arith.constant 0 : i32
    return %c0_i32, %c0_i32_0 : i32, i32
  }
  func.func @transform_13(%arg0: i32) -> (i32, i32, i32) {
    %c0_i32 = arith.constant 0 : i32
    %c0_i32_0 = arith.constant 0 : i32
    %c0_i32_1 = arith.constant 0 : i32
    %c0_i32_2 = arith.constant 0 : i32
    return %c0_i32, %c0_i32_0, %c0_i32_1 : i32, i32, i32
  }
  func.func @transform_14(%arg0: i32) -> (i32, i32) {
    %c0_i32 = arith.constant 0 : i32
    %c0_i32_0 = arith.constant 0 : i32
    %c0_i32_1 = arith.constant 0 : i32
    return %c0_i32, %c0_i32_0 : i32, i32
  }
  func.func @transform_15(%arg0: i32) -> (i32, i32) {
    %c0_i32 = arith.constant 0 : i32
    %c0_i32_0 = arith.constant 0 : i32
    %c0_i32_1 = arith.constant 0 : i32
    return %c0_i32, %c0_i32_0 : i32, i32
  }
}

</mosaic_0001>

<bundles_post_ra>
// kernel: cnn_decoder_forward.1
= control target key start
LH: loop header
LB: loop body
LE: loop exit
PB: predicated region body
PF: predicated region fallthrough
CT: control target
= control target key end

     0   :  { %v5493_v3 = vmov 0.0   ;;  %vm71_vm0 = vcmask 261120   ;;  %vm5494_vm1 = vmmov 0   ;;  %vm403_vm2 = vcmask 1045504   ;;  %s7700_s1 = inlined_call_operand.vmem [shape: f32[32,256], index: 1, kind: input, shape index: {}]   ;;  %s7701_s3 = inlined_call_operand.vmem [shape: f32[256,384], index: 3, kind: input, shape index: {}]   ;;  %s7702_s0 = inlined_call_operand.vmem [shape: f32[6,32], index: 0, kind: input, shape index: {}]   ;;  %s7703_s2 = inlined_call_operand.vmem [shape: f32[1,256], index: 2, kind: input, shape index: {}]   ;;  %s7704_s4 = inlined_call_operand.vmem [shape: f32[3,18,6], index: 4, kind: input, shape index: {}]   ;;  %s7705_s6 = inlined_call_operand.vmem [shape: f32[128,384], index: 6, kind: input, shape index: {}]   ;;  %s7706_s5 = inlined_call_operand.vmem [shape: f32[1,128], index: 5, kind: input, shape index: {}]   ;;  %s7707_s7 = inlined_call_operand.vmem [shape: f32[3,42,18], index: 7, kind: input, shape index: {}]   ;;  %s7708_s9 = inlined_call_operand.vmem [shape: f32[128,384], index: 9, kind: input, shape index: {}]   ;;  %s7709_s8 = inlined_call_operand.vmem [shape: f32[1,128], index: 8, kind: input, shape index: {}]   ;;  %s7710_s10 = inlined_call_operand.vmem [shape: f32[3,90,42], index: 10, kind: input, shape index: {}]   ;;  %s7711_s12 = inlined_call_operand.vmem [shape: f32[128,768], index: 12, kind: input, shape index: {}]   ;;  %s7712_s11 = inlined_call_operand.vmem [shape: f32[1,128], index: 11, kind: input, shape index: {}]   ;;  %s7713_s13 = inlined_call_operand.vmem [shape: f32[3,186,90], index: 13, kind: input, shape index: {}]   ;;  %s7714_s14 = inlined_call_operand.vmem [shape: f32[1,256], index: 14, kind: input, shape index: {}]   ;;  %s7715_s15 = inlined_call_operand.vmem [shape: f32[186,256], index: 15, kind: output, shape index: {}]  }
   0x1   :  { %v52_v0 = vld [vmem:[%s7700_s1 + $0x8] sm:$0xff]  ;;  %v54_v1 = vld [vmem:[%s7700_s1 + $0x18] sm:$0xff]  ;;  %v51_v2 = vld [vmem:[%s7700_s1] sm:$0xff]  ;;  %139 = vmatprep.mubr.f32.mxu0 %v5493_v3  ;;  %vm393_vm3 = vcmask 48128   ;;  %vm927_vm7 = vcmask 146432   ;;  %vm946_vm8 = vcmask 1041408  }
   0x2   :  { %v4696_v4 = vpack.c.bf16 %v54_v1, %v52_v0  ;;  %v53_v5 = vld [vmem:[%s7700_s1 + $0x10] sm:$0xff]  ;;  %v56_v6 = vld [vmem:[%s7700_s1 + $0x28] sm:$0xff]  ;;  %v58_v7 = vld [vmem:[%s7700_s1 + $0x38] sm:$0xff]  ;;  %vm1602_vm15 = vcmask 343040  }
   0x3   :  { %v4698_v8 = vpack.c.bf16 %v53_v5, %v51_v2  ;;  %v4700_v9 = vpack.c.bf16 %v58_v7, %v56_v6  ;;  %v55_v10 = vld [vmem:[%s7700_s1 + $0x20] sm:$0xff]  ;;  %v57_v11 = vld [vmem:[%s7700_s1 + $0x30] sm:$0xff]  ;;  %v147_v12 = vld [vmem:[%s7701_s3 + $0x8] sm:$0xff] }
   0x4   :  { %4697 = vmatprep.subr.bf16.mxu0 %v4696_v4  ;;  %v150_v13 = vld [vmem:[%s7701_s3 + $0x20] sm:$0xff]  ;;  %v4702_v15 = vpack.c.bf16 %v57_v11, %v55_v10  ;;  %v149_v17 = vld [vmem:[%s7701_s3 + $0x18] sm:$0xff]  ;;  %v156_v19 = vld [vmem:[%s7701_s3 + $0x50] sm:$0xff] }
   0x5   :  { %v146_v14 = vld [vmem:[%s7701_s3] sm:$0xff]  ;;  %4699 = vmatpush1.bf16.msra.mxu0 %v4698_v8  ;;  %v4704_v16 = vpack.c.bf16 %v150_v13, %v147_v12  ;;  %v153_v18 = vld [vmem:[%s7701_s3 + $0x38] sm:$0xff]  ;;  %v152_v22 = vld [vmem:[%s7701_s3 + $0x30] sm:$0xff] }
   0x6   :  { %4701 = vmatprep.subr.bf16.mxu0 %v4700_v9  ;;  %v4706_v20 = vpack.c.bf16 %v149_v17, %v146_v14  ;;  %v4708_v21 = vpack.c.bf16 %v156_v19, %v153_v18  ;;  %v155_v23 = vld [vmem:[%s7701_s3 + $0x48] sm:$0xff]  ;;  %v162_v25 = vld [vmem:[%s7701_s3 + $0x80] sm:$0xff]  ;;  %v161_v30 = vld [vmem:[%s7701_s3 + $0x78] sm:$0xff] }
   0x7   :  { %v159_v24 = vld [vmem:[%s7701_s3 + $0x68] sm:$0xff]  ;;  %4705 = vmatprep.subr.bf16.mxu1 %v4704_v16  ;;  %v4710_v26 = vpack.c.bf16 %v155_v23, %v152_v22  ;;  %v50_v27 = vld [vmem:[%s7702_s0] sm:$0x3f]  ;;  %v165_v31 = vld [vmem:[%s7701_s3 + $0x98] sm:$0xff] }
   0x8   :  { %4707 = vmatpush1.bf16.msra.mxu1 %v4706_v20  ;;  %v4712_v28 = vpack.c.bf16 %v162_v25, %v159_v24  ;;  %v158_v29 = vld [vmem:[%s7701_s3 + $0x60] sm:$0xff]  ;;  %v168_v32 = vld [vmem:[%s7701_s3 + $0xb0] sm:$0xff]  ;;  %v167_v36 = vld [vmem:[%s7701_s3 + $0xa8] sm:$0xff] }
   0x9   :  { %4703 = vmatpush1.bf16.msra.mxu0 %v4702_v15  ;;  %4709 = vmatprep.subr.bf16.mxu1 %v4708_v21  ;;  %v4714_v33 = vpack.c.bf16 %v161_v30, %v158_v29  ;;  %v4716_v34 = vpack.c.bf16 %v168_v32, %v165_v31  ;;  %v164_v35 = vld [vmem:[%s7701_s3 + $0x90] sm:$0xff]  ;;  %v171_v37 = vld [vmem:[%s7701_s3 + $0xc8] sm:$0xff]  ;;  %v174_v38 = vld [vmem:[%s7701_s3 + $0xe0] sm:$0xff] }
   0xa   :  { %v196_v39 = vld [vmem:[%s7701_s3 + $0x190] sm:$0xff]  ;;  %v199_v40 = vld [vmem:[%s7701_s3 + $0x1a8] sm:$0xff]  ;;  %v4718_v41 = vpack.c.bf16 %v167_v36, %v164_v35  ;;  %v170_v42 = vld [vmem:[%s7701_s3 + $0xc0] sm:$0xff]  ;;  %v4720_v45 = vpack.c.bf16 %v174_v38, %v171_v37 }
   0xb   :  { %v4768_v43 = vpack.c.bf16 %v199_v40, %v196_v39  ;;  %v148_v44 = vld [vmem:[%s7701_s3 + $0x10] sm:$0xff]  ;;  %v173_v46 = vld [vmem:[%s7701_s3 + $0xd8] sm:$0xff]  ;;  %v151_v48 = vld [vmem:[%s7701_s3 + $0x28] sm:$0xff] }
   0xc   :  { %4012 = vmatmul.mubr.msk.f32.vlgmr.msra.gmra.mrb[0].mxu0 %vm71_vm0, %v50_v27  ;;  %4711 = vmatpush1.bf16.msra.mxu1 %v4710_v26  ;;  %v177_v47 = vld [vmem:[%s7701_s3 + $0xf8] sm:$0xff]  ;;  %v180_v49 = vld [vmem:[%s7701_s3 + $0x110] sm:$0xff]  ;;  %v4770_v50 = vpack.c.bf16 %v151_v48, %v148_v44  ;;  %v202_v51 = vld [vmem:[%s7701_s3 + $0x1c0] sm:$0xff]  ;;  %v4722_v56 = vpack.c.bf16 %v173_v46, %v170_v42  ;;  %vm5496_vm0 = vmmov 1  }
   0xd   :  { %4713 = vmatprep.subr.bf16.mxu1 %v4712_v28  ;;  %4769 = vmatprep.subr.bf16.mxu0 %v4768_v43  ;;  %v205_v52 = vld [vmem:[%s7701_s3 + $0x1d8] sm:$0xff]  ;;  %v154_v54 = vld [vmem:[%s7701_s3 + $0x40] sm:$0xff]  ;;  %v176_v57 = vld [vmem:[%s7701_s3 + $0xf0] sm:$0xff]  ;;  %v4724_v60 = vpack.c.bf16 %v180_v49, %v177_v47 }
   0xe   :  { %v4772_v53 = vpack.c.bf16 %v205_v52, %v202_v51  ;;  %v157_v55 = vld [vmem:[%s7701_s3 + $0x58] sm:$0xff]  ;;  %4771 = vmatpush3.bf16.msra.mxu0 %v4770_v50  ;;  %v208_v59 = vld [vmem:[%s7701_s3 + $0x1f0] sm:$0xff]  ;;  %v179_v61 = vld [vmem:[%s7701_s3 + $0x108] sm:$0xff] }
   0xf   :  { %v4774_v58 = vpack.c.bf16 %v157_v55, %v154_v54  ;;  %v183_v62 = vld [vmem:[%s7701_s3 + $0x128] sm:$0xff]  ;;  %v186_v0 = vld [vmem:[%s7701_s3 + $0x140] sm:$0xff]  ;;  %v160_v2 = vld [vmem:[%s7701_s3 + $0x70] sm:$0xff]  ;;  %v4726_v7 = vpack.c.bf16 %v179_v61, %v176_v57 }
  0x10   :  { %4715 = vmatpush1.bf16.msra.mxu1 %v4714_v33  ;;  %4773 = vmatprep.subr.bf16.mxu0 %v4772_v53  ;;  %v211_v63 = vld [vmem:[%s7701_s3 + $0x208] sm:$0xff]  ;;  %v214_v5 = vld [vmem:[%s7701_s3 + $0x220] sm:$0xff]  ;;  %v217_v6 = vld [vmem:[%s7701_s3 + $0x238] sm:$0xff]  ;;  %v4728_v11 = vpack.c.bf16 %v186_v0, %v183_v62 }
  0x11   :  { %4717 = vmatprep.subr.bf16.mxu1 %v4716_v34  ;;  %v4776_v1 = vpack.c.bf16 %v211_v63, %v208_v59  ;;  %v163_v4 = vld [vmem:[%s7701_s3 + $0x88] sm:$0xff]  ;;  %v182_v8 = vld [vmem:[%s7701_s3 + $0x120] sm:$0xff]  ;;  %v185_v9 = vld [vmem:[%s7701_s3 + $0x138] sm:$0xff]  ;;  %v4780_v13 = vpack.c.bf16 %v217_v6, %v214_v5 }
  0x12   :  { %4775 = vmatpush3.bf16.msra.mxu0 %v4774_v58  ;;  %v4778_v10 = vpack.c.bf16 %v163_v4, %v160_v2  ;;  %v189_v12 = vld [vmem:[%s7701_s3 + $0x158] sm:$0xff]  ;;  %v166_v14 = vld [vmem:[%s7701_s3 + $0xa0] sm:$0xff]  ;;  %v192_v16 = vld [vmem:[%s7701_s3 + $0x170] sm:$0xff]  ;;  %v4730_v19 = vpack.c.bf16 %v185_v9, %v182_v8 }
  0x13   :  { %4777 = vmatprep.subr.bf16.mxu0 %v4776_v1  ;;  %v169_v15 = vld [vmem:[%s7701_s3 + $0xb8] sm:$0xff]  ;;  %v220_v17 = vld [vmem:[%s7701_s3 + $0x250] sm:$0xff]  ;;  %v223_v18 = vld [vmem:[%s7701_s3 + $0x268] sm:$0xff]  ;;  %v4732_v23 = vpack.c.bf16 %v192_v16, %v189_v12 }
  0x14   :  { %4719 = vmatpush1.bf16.msra.mxu1 %v4718_v41  ;;  %v188_v20 = vld [vmem:[%s7701_s3 + $0x150] sm:$0xff]  ;;  %v191_v21 = vld [vmem:[%s7701_s3 + $0x168] sm:$0xff]  ;;  %v4782_v22 = vpack.c.bf16 %v169_v15, %v166_v14  ;;  %v4784_v25 = vpack.c.bf16 %v223_v18, %v220_v17  ;;  %v198_v28 = vld [vmem:[%s7701_s3 + $0x1a0] sm:$0xff] }
  0x15   :  { %4721 = vmatprep.subr.bf16.mxu1 %v4720_v45  ;;  %v195_v24 = vld [vmem:[%s7701_s3 + $0x188] sm:$0xff]  ;;  %v172_v26 = vld [vmem:[%s7701_s3 + $0xd0] sm:$0xff]  ;;  %v226_v29 = vld [vmem:[%s7701_s3 + $0x280] sm:$0xff]  ;;  %v4734_v31 = vpack.c.bf16 %v191_v21, %v188_v20 }
  0x16   :  { %4779 = vmatpush3.bf16.msra.mxu0 %v4778_v10  ;;  %v175_v27 = vld [vmem:[%s7701_s3 + $0xe8] sm:$0xff]  ;;  %v229_v30 = vld [vmem:[%s7701_s3 + $0x298] sm:$0xff]  ;;  %v194_v32 = vld [vmem:[%s7701_s3 + $0x180] sm:$0xff]  ;;  %v4736_v35 = vpack.c.bf16 %v198_v28, %v195_v24 }
  0x17   :  { %4781 = vmatprep.subr.bf16.mxu0 %v4780_v13  ;;  %v197_v33 = vld [vmem:[%s7701_s3 + $0x198] sm:$0xff]  ;;  %v4786_v34 = vpack.c.bf16 %v175_v27, %v172_v26  ;;  %v4788_v37 = vpack.c.bf16 %v229_v30, %v226_v29  ;;  %v178_v38 = vld [vmem:[%s7701_s3 + $0x100] sm:$0xff]  ;;  %v204_v40 = vld [vmem:[%s7701_s3 + $0x1d0] sm:$0xff] }
  0x18   :  { %4723 = vmatpush1.bf16.msra.mxu1 %v4722_v56  ;;  %v201_v36 = vld [vmem:[%s7701_s3 + $0x1b8] sm:$0xff]  ;;  %v232_v41 = vld [vmem:[%s7701_s3 + $0x2b0] sm:$0xff]  ;;  %v235_v42 = vld [vmem:[%s7701_s3 + $0x2c8] sm:$0xff]  ;;  %v4738_v43 = vpack.c.bf16 %v197_v33, %v194_v32  ;;  %v61_v32 = vlaneseq }
  0x19   :  { %4725 = vmatprep.subr.bf16.mxu1 %v4724_v60  ;;  %v181_v39 = vld [vmem:[%s7701_s3 + $0x118] sm:$0xff]  ;;  %v200_v44 = vld [vmem:[%s7701_s3 + $0x1b0] sm:$0xff]  ;;  %v4740_v46 = vpack.c.bf16 %v204_v40, %v201_v36  ;;  %v203_v47 = vld [vmem:[%s7701_s3 + $0x1c8] sm:$0xff]  ;;  %v4792_v48 = vpack.c.bf16 %v235_v42, %v232_v41 }
  0x1a   :  { %4783 = vmatpush3.bf16.msra.mxu0 %v4782_v22  ;;  %v4790_v45 = vpack.c.bf16 %v181_v39, %v178_v38  ;;  %v184_v49 = vld [vmem:[%s7701_s3 + $0x130] sm:$0xff]  ;;  %v187_v50 = vld [vmem:[%s7701_s3 + $0x148] sm:$0xff]  ;;  %v210_v52 = vld [vmem:[%s7701_s3 + $0x200] sm:$0xff]  ;;  %v4742_v53 = vpack.c.bf16 %v203_v47, %v200_v44  ;;  %v5894_v33 = vshrl.u32 %v61_v32, 7 }
  0x1b   :  { %4785 = vmatprep.subr.bf16.mxu0 %v4784_v25  ;;  %v207_v51 = vld [vmem:[%s7701_s3 + $0x1e8] sm:$0xff]  ;;  %v4794_v54 = vpack.c.bf16 %v187_v50, %v184_v49  ;;  %v206_v56 = vld [vmem:[%s7701_s3 + $0x1e0] sm:$0xff]  ;;  %v209_v57 = vld [vmem:[%s7701_s3 + $0x1f8] sm:$0xff] }
  0x1c   :  { %4727 = vmatpush1.bf16.msra.mxu1 %v4726_v7  ;;  %v4744_v55 = vpack.c.bf16 %v210_v52, %v207_v51  ;;  %v213_v58 = vld [vmem:[%s7701_s3 + $0x218] sm:$0xff]  ;;  %v216_v59 = vld [vmem:[%s7701_s3 + $0x230] sm:$0xff]  ;;  %v4746_v60 = vpack.c.bf16 %v209_v57, %v206_v56  ;;  %v215_v63 = vld [vmem:[%s7701_s3 + $0x228] sm:$0xff]  ;;  %v63_v36 = vsub.s32 0, %v5894_v33 }
  0x1d   :  { %4729 = vmatprep.subr.bf16.mxu1 %v4728_v11  ;;  %v4748_v61 = vpack.c.bf16 %v216_v59, %v213_v58  ;;  %v212_v62 = vld [vmem:[%s7701_s3 + $0x210] sm:$0xff]  ;;  %v219_v0 = vld [vmem:[%s7701_s3 + $0x248] sm:$0xff]  ;;  %v222_v1 = vld [vmem:[%s7701_s3 + $0x260] sm:$0xff] }
  0x1e   :  { %4787 = vmatpush3.bf16.msra.mxu0 %v4786_v34  ;;  %v4750_v2 = vpack.c.bf16 %v215_v63, %v212_v62  ;;  %v4752_v4 = vpack.c.bf16 %v222_v1, %v219_v0  ;;  %v218_v5 = vld [vmem:[%s7701_s3 + $0x240] sm:$0xff]  ;;  %v221_v6 = vld [vmem:[%s7701_s3 + $0x258] sm:$0xff]  ;;  %v228_v8 = vld [vmem:[%s7701_s3 + $0x290] sm:$0xff]  ;;  %v67_v34 = vsub.s32 1, %v5894_v33 }
  0x1f   :  { %4789 = vmatprep.subr.bf16.mxu0 %v4788_v37  ;;  %v225_v7 = vld [vmem:[%s7701_s3 + $0x278] sm:$0xff]  ;;  %v4754_v9 = vpack.c.bf16 %v221_v6, %v218_v5  ;;  %v224_v11 = vld [vmem:[%s7701_s3 + $0x270] sm:$0xff]  ;;  %v227_v12 = vld [vmem:[%s7701_s3 + $0x288] sm:$0xff] }
  0x20   :  { %4731 = vmatpush1.bf16.msra.mxu1 %v4730_v19  ;;  %v4756_v10 = vpack.c.bf16 %v228_v8, %v225_v7  ;;  %v231_v13 = vld [vmem:[%s7701_s3 + $0x2a8] sm:$0xff]  ;;  %v234_v14 = vld [vmem:[%s7701_s3 + $0x2c0] sm:$0xff]  ;;  %v4758_v15 = vpack.c.bf16 %v227_v12, %v224_v11  ;;  %v233_v18 = vld [vmem:[%s7701_s3 + $0x2b8] sm:$0xff] }
  0x21   :  { %4733 = vmatprep.subr.bf16.mxu1 %v4732_v23  ;;  %v4760_v16 = vpack.c.bf16 %v234_v14, %v231_v13  ;;  %v230_v17 = vld [vmem:[%s7701_s3 + $0x2a0] sm:$0xff]  ;;  %v237_v20 = vld [vmem:[%s7701_s3 + $0x2d8] sm:$0xff]  ;;  %v240_v21 = vld [vmem:[%s7701_s3 + $0x2f0] sm:$0xff] }
  0x22   :  { %4791 = vmatpush3.bf16.msra.mxu0 %v4790_v45  ;;  %v4762_v19 = vpack.c.bf16 %v233_v18, %v230_v17  ;;  %v238_v22 = vld [vmem:[%s7701_s3 + $0x2e0] sm:$0xff]  ;;  %v4764_v23 = vpack.c.bf16 %v240_v21, %v237_v20  ;;  %v241_v24 = vld [vmem:[%s7701_s3 + $0x2f8] sm:$0xff]  ;;  %v236_v25 = vld [vmem:[%s7701_s3 + $0x2d0] sm:$0xff] }
  0x23   :  { %4793 = vmatprep.subr.bf16.mxu0 %v4792_v48  ;;  %v239_v26 = vld [vmem:[%s7701_s3 + $0x2e8] sm:$0xff]  ;;  %v4796_v27 = vpack.c.bf16 %v241_v24, %v238_v22  ;;  %v190_v29 = vld [vmem:[%s7701_s3 + $0x160] sm:$0xff]  ;;  %v193_v30 = vld [vmem:[%s7701_s3 + $0x178] sm:$0xff] }
  0x24   :  { %4735 = vmatpush1.bf16.msra.mxu1 %v4734_v31  ;;  %v4766_v28 = vpack.c.bf16 %v239_v26, %v236_v25  ;;  %v4798_v31 = vpack.c.bf16 %v193_v30, %v190_v29  ;;  %v384_v49 = vld [vmem:[%s7704_s4 + $0x8] sm:$0xff]  ;;  %v385_v50 = vld [vmem:[%s7704_s4 + $0x10] sm:$0x3]  ;;  %v707_v52 = vld [vmem:[%s7705_s6 + $0x20] sm:$0xff] }
  0x25   :  { %4737 = vmatprep.subr.bf16.mxu1 %v4736_v35  ;;  %v59_v35 = vld [vmem:[%s7703_s2] sm:$0x3]  ;;  %v704_v51 = vld [vmem:[%s7705_s6 + $0x8] sm:$0xff]  ;;  %v706_v58 = vld [vmem:[%s7705_s6 + $0x18] sm:$0xff] }
  0x26   :  { %4795 = vmatpush3.bf16.msra.mxu0 %v4794_v54  ;;  %v68_v37 = vrot.slane %v59_v35, %v67_v34  ;;  %v64_v38 = vrot.slane %v59_v35, %v63_v36  ;;  %v4800_v54 = vpack.c.bf16 %v707_v52, %v704_v51  ;;  %v4020_v56 = vld [vmem:[%s7704_s4 + $0x28] sm:$0x3]  ;;  %v703_v57 = vld [vmem:[%s7705_s6] sm:$0xff]  ;;  %v710_v59 = vld [vmem:[%s7705_s6 + $0x38] sm:$0xff] }
  0x27   :  { %4797 = vmatprep.subr.bf16.mxu0 %v4796_v27  ;;  %v4802_v62 = vpack.c.bf16 %v706_v58, %v703_v57  ;;  %v709_v0 = vld [vmem:[%s7705_s6 + $0x30] sm:$0xff]  ;;  %v712_v1 = vld [vmem:[%s7705_s6 + $0x48] sm:$0xff]  ;;  %v4026_v5 = vld [vmem:[%s7704_s4 + $0x38] sm:$0xff] }
  0x28   :  { %4739 = vmatpush1.bf16.msra.mxu1 %v4738_v43  ;;  %v383_v43 = vld [vmem:[%s7704_s4] sm:$0xff]  ;;  %v4806_v6 = vpack.c.bf16 %v712_v1, %v709_v0  ;;  %v722_v12 = vld [vmem:[%s7705_s6 + $0x98] sm:$0xff]  ;;  %v725_v13 = vld [vmem:[%s7705_s6 + $0xb0] sm:$0xff] }
  0x29   :  { %4741 = vmatprep.subr.bf16.mxu1 %v4740_v46  ;;  %v715_v8 = vld [vmem:[%s7705_s6 + $0x60] sm:$0xff]  ;;  %v4812_v14 = vpack.c.bf16 %v725_v13, %v722_v12  ;;  %v728_v18 = vld [vmem:[%s7705_s6 + $0xc8] sm:$0xff]  ;;  %v730_v22 = vld [vmem:[%s7705_s6 + $0xd8] sm:$0xff] }
  0x2a   :  { %4799 = vmatpush3.bf16.msra.mxu0 %v4798_v31  ;;  %v727_v21 = vld [vmem:[%s7705_s6 + $0xc0] sm:$0xff]  ;;  %v734_v24 = vld [vmem:[%s7705_s6 + $0xf8] sm:$0xff]  ;;  %v737_v25 = vld [vmem:[%s7705_s6 + $0x110] sm:$0xff] }
  0x2b   :  { %4446 = vmatprep.subr.mxu0 %v5493_v3  ;;  %v4820_v26 = vpack.c.bf16 %v737_v25, %v734_v24  ;;  %v733_v27 = vld [vmem:[%s7705_s6 + $0xf0] sm:$0xff]  ;;  %v740_v30 = vld [vmem:[%s7705_s6 + $0x128] sm:$0xff]  ;;  %v743_v31 = vld [vmem:[%s7705_s6 + $0x140] sm:$0xff] }
  0x2c   :  { %4743 = vmatpush1.bf16.msra.mxu1 %v4742_v53  ;;  %v4018_v53 = vld [vmem:[%s7704_s4 + $0x18] sm:$0xff]  ;;  %v4824_v32 = vpack.c.bf16 %v743_v31, %v740_v30  ;;  %v739_v35 = vld [vmem:[%s7705_s6 + $0x120] sm:$0xff] }
  0x2d   :  { %4745 = vmatprep.subr.bf16.mxu1 %v4744_v55  ;;  %v4019_v55 = vld [vmem:[%s7704_s4 + $0x20] sm:$0xff]  ;;  %v738_v24 = vld [vmem:[%s7705_s6 + $0x118] sm:$0xff] }
  0x2e   :  { %v750_v30 = vld [vmem:[%s7705_s6 + $0x178] sm:$0xff] }
  0x30   :  { %4747 = vmatpush1.bf16.msra.mxu1 %v4746_v60  ;;  %v713_v60 = vld [vmem:[%s7705_s6 + $0x50] sm:$0xff] }
  0x31   :  { %4749 = vmatprep.subr.bf16.mxu1 %v4748_v61  ;;  %v4025_v61 = vld [vmem:[%s7704_s4 + $0x30] sm:$0xff]  ;;  %v4804_v63 = vpack.c.bf16 %v713_v60, %v710_v59 }
  0x34   :  { %4751 = vmatpush1.bf16.msra.mxu1 %v4750_v2  ;;  %v716_v2 = vld [vmem:[%s7705_s6 + $0x68] sm:$0xff] }
  0x35   :  { %4753 = vmatprep.subr.bf16.mxu1 %v4752_v4  ;;  %v719_v4 = vld [vmem:[%s7705_s6 + $0x80] sm:$0xff] }
  0x36   :  { %v4808_v7 = vpack.c.bf16 %v719_v4, %v716_v2  ;;  %v711_v4 = vld [vmem:[%s7705_s6 + $0x40] sm:$0xff] }
  0x38   :  { %4755 = vmatpush1.bf16.msra.mxu1 %v4754_v9  ;;  %v718_v9 = vld [vmem:[%s7705_s6 + $0x78] sm:$0xff] }
  0x39   :  { %4757 = vmatprep.subr.bf16.mxu1 %v4756_v10  ;;  %v4027_v10 = vld [vmem:[%s7704_s4 + $0x40] sm:$0x3]  ;;  %v4810_v11 = vpack.c.bf16 %v718_v9, %v715_v8 }
  0x3c   :  { %4759 = vmatpush1.bf16.msra.mxu1 %v4758_v15  ;;  %v721_v15 = vld [vmem:[%s7705_s6 + $0x90] sm:$0xff] }
  0x3d   :  { %4761 = vmatprep.subr.bf16.mxu1 %v4760_v16  ;;  %v724_v16 = vld [vmem:[%s7705_s6 + $0xa8] sm:$0xff] }
  0x3e   :  { %v4814_v17 = vpack.c.bf16 %v724_v16, %v721_v15  ;;  %v723_v16 = vld [vmem:[%s7705_s6 + $0xa0] sm:$0xff] }
  0x40   :  { %4763 = vmatpush1.bf16.msra.mxu1 %v4762_v19  ;;  %v731_v19 = vld [vmem:[%s7705_s6 + $0xe0] sm:$0xff] }
  0x41   :  { %4765 = vmatprep.subr.bf16.mxu1 %v4764_v23  ;;  %v4816_v20 = vpack.c.bf16 %v731_v19, %v728_v18  ;;  %v4818_v23 = vpack.c.bf16 %v730_v22, %v727_v21  ;;  %v732_v21 = vld [vmem:[%s7705_s6 + $0xe8] sm:$0xff] }
  0x44   :  { %4767 = vmatpush1.bf16.msra.mxu1 %v4766_v28  ;;  %v736_v28 = vld [vmem:[%s7705_s6 + $0x108] sm:$0xff] }
  0x45   :  { %v4822_v29 = vpack.c.bf16 %v736_v28, %v733_v27  ;;  %v744_v27 = vld [vmem:[%s7705_s6 + $0x148] sm:$0xff] }
  0xdf   :  { %v141_v39 = vpop.f32.mrb[0].mxu0 }
  0xe0   :  { %v143_v40 = vpop.f32.mrb[1].mxu0  ;;  %v142_v42 = vadd.f32 %v141_v39, %v64_v38  ;;  %v746_v39 = vld [vmem:[%s7705_s6 + $0x158] sm:$0xff] }
  0xe1   :  { %v144_v41 = vadd.f32 %v143_v40, %v68_v37  ;;  %v742_v37 = vld [vmem:[%s7705_s6 + $0x138] sm:$0xff]  ;;  %v749_v40 = vld [vmem:[%s7705_s6 + $0x170] sm:$0xff] }
  0xe2   :  { %v4826_v38 = vpack.c.bf16 %v742_v37, %v739_v35  ;;  %v1340_v35 = vld [vmem:[%s7708_s9 + $0x8] sm:$0xff]  ;;  %v1343_v37 = vld [vmem:[%s7708_s9 + $0x20] sm:$0xff] }
  0xe3   :  { %306 = vmatprep.mubr.f32.mxu1 %v144_v41  ;;  %377 = vmatprep.mubr.f32.mxu0 %v144_v41  ;;  %v4828_v41 = vpack.c.bf16 %v749_v40, %v746_v39  ;;  %v4868_v39 = vpack.c.bf16 %v1343_v37, %v1340_v35  ;;  %v1342_v40 = vld [vmem:[%s7708_s9 + $0x18] sm:$0xff] }
  0xe4   :  { %307 = vmatmul.mubr.f32.vlgmr.msra.gmra.mrb[0].mxu1 %v142_v42  ;;  %378 = vmatmul.mubr.f32.vlgmr.msra.gmra.mrb[2].mxu0 %v142_v42  ;;  %v745_v42 = vld [vmem:[%s7705_s6 + $0x150] sm:$0xff]  ;;  %v1366_v35 = vld [vmem:[%s7708_s9 + $0xd8] sm:$0xff] }
  0xe5   :  { %4448 = vmatprep.mubr.msk.f32.mxu0 %vm5494_vm1, %v5493_v3 }
 0x1b7   :  { %v308_v44 = vpop.f32.mrb[0].mxu1  ;;  %v4309_v45 = vpop.f32.mrb[2].mxu0 }
 0x1b8   :  { %v310_v46 = vpop.f32.mrb[1].mxu1  ;;  %v4310_v47 = vpop.f32.mrb[3].mxu0  ;;  %4447 = vmatpush3.msk.msra.mxu0 %vm403_vm2, %v308_v44 }
 0x1b9   :  { %v4311_v48 = vadd.f32 %v4310_v47, %v4309_v45  ;;  %4449 = vmatmul.mubr.msk.f32.vlgmr.msra.gmra.mrb[4].mxu0 %vm393_vm3, %v383_v43  ;;  %4457 = vmatprep.subr.mxu0 %v5493_v3  ;;  %v748_v43 = vld [vmem:[%s7705_s6 + $0x168] sm:$0xff]  ;;  %v5495_v45 = vmov 0.0|0.0  }
 0x1ba   :  { %4458 = vmatpush3.msk.msra.mxu0 %vm403_vm2, %v310_v46  ;;  %4451 = vmatprep.mubr.msk.f32.mxu0 %vm5494_vm1, %v5493_v3  ;;  %v4830_v44 = vpack.c.bf16 %v748_v43, %v745_v42  ;;  %v4013_v46 = vld [vmem:[%s7706_s5] ss:$0 sm:$0xff]  ;;  %v1349_v42 = vld [vmem:[%s7708_s9 + $0x50] sm:$0xff] }
 0x1bb   :  { %4468 = vmatprep.subr.mxu0 %v5493_v3 }
 0x1bd   :  { %4452 = vmatmul.mubr.msk.f32.gmra.mrb[6].mxu0 %vm393_vm3, %v384_v49 }
 0x1be   :  { %4454 = vmatprep.mubr.msk.f32.mxu0 %vm5494_vm1, %v5493_v3 }
 0x1c1   :  { %4455 = vmatmul.mubr.msk.f32.gmra.mrb[8].mxu0 %vm393_vm3, %v385_v50 }
 0x1c2   :  { %4459 = vmatprep.mubr.msk.f32.mxu0 %vm5494_vm1, %v5493_v3 }
 0x1c5   :  { %4460 = vmatmul.mubr.msk.f32.vlgmr.msra.gmra.mrb[4].mxu0 %vm393_vm3, %v4018_v53 }
 0x1c6   :  { %4469 = vmatpush3.msk.msra.mxu0 %vm403_vm2, %v4311_v48  ;;  %4462 = vmatprep.mubr.msk.f32.mxu0 %vm5494_vm1, %v5493_v3 }
 0x1c7   :  { %4801 = vmatprep.subr.bf16.mxu0 %v4800_v54 }
 0x1c9   :  { %4463 = vmatmul.mubr.msk.f32.gmra.mrb[6].mxu0 %vm393_vm3, %v4019_v55 }
 0x1ca   :  { %4465 = vmatprep.mubr.msk.f32.mxu0 %vm5494_vm1, %v5493_v3 }
 0x1cd   :  { %4466 = vmatmul.mubr.msk.f32.gmra.mrb[8].mxu0 %vm393_vm3, %v4020_v56 }
 0x1ce   :  { %4470 = vmatprep.mubr.msk.f32.mxu0 %vm5494_vm1, %v5493_v3 }
 0x1d1   :  { %4471 = vmatmul.mubr.msk.f32.vlgmr.msra.gmra.mrb[4].mxu0 %vm393_vm3, %v4025_v61 }
 0x1d2   :  { %4473 = vmatprep.mubr.msk.f32.mxu0 %vm5494_vm1, %v5493_v3  ;;  %4803 = vmatpush1.bf16.msra.mxu0 %v4802_v62  ;;  %v705_v62 = vld [vmem:[%s7705_s6 + $0x10] sm:$0xff] }
 0x1d3   :  { %4805 = vmatprep.subr.bf16.mxu0 %v4804_v63  ;;  %v708_v63 = vld [vmem:[%s7705_s6 + $0x28] sm:$0xff] }
 0x1d4   :  { %v4833_v2 = vpack.c.bf16 %v708_v63, %v705_v62  ;;  %v915_v62 = vld [vmem:[%s7707_s7 + $0x8] sm:$0xff]  ;;  %v916_v63 = vld [vmem:[%s7707_s7 + $0x10] sm:$0xff] }
 0x1d5   :  { %4474 = vmatmul.mubr.msk.f32.gmra.mrb[6].mxu0 %vm393_vm3, %v4026_v5  ;;  %v714_v5 = vld [vmem:[%s7705_s6 + $0x58] sm:$0xff] }
 0x1d6   :  { %4476 = vmatprep.mubr.msk.f32.mxu0 %vm5494_vm1, %v5493_v3  ;;  %4807 = vmatpush1.bf16.msra.mxu0 %v4806_v6  ;;  %v4836_v9 = vpack.c.bf16 %v714_v5, %v711_v4  ;;  %v4043_v4 = vld [vmem:[%s7707_s7 + $0x30] sm:$0xff]  ;;  %v4044_v5 = vld [vmem:[%s7707_s7 + $0x38] sm:$0xff] }
 0x1d7   :  { %4809 = vmatprep.subr.bf16.mxu0 %v4808_v7 }
 0x1d9   :  { %4477 = vmatmul.mubr.msk.f32.gmra.mrb[8].mxu0 %vm393_vm3, %v4027_v10  ;;  %v717_v10 = vld [vmem:[%s7705_s6 + $0x70] sm:$0xff] }
 0x1da   :  { %4811 = vmatpush1.bf16.msra.mxu0 %v4810_v11  ;;  %815 = vmatprep.mubr.f32.mxu0 %v5493_v3  ;;  %v720_v11 = vld [vmem:[%s7705_s6 + $0x88] sm:$0xff] }
 0x1db   :  { %4813 = vmatprep.subr.bf16.mxu0 %v4812_v14  ;;  %v4839_v15 = vpack.c.bf16 %v720_v11, %v717_v10  ;;  %v4056_v10 = vld [vmem:[%s7707_s7 + $0x60] sm:$0xff] }
 0x1de   :  { %4815 = vmatpush1.bf16.msra.mxu0 %v4814_v17  ;;  %v726_v17 = vld [vmem:[%s7705_s6 + $0xb8] sm:$0xff] }
 0x1df   :  { %4817 = vmatprep.subr.bf16.mxu0 %v4816_v20  ;;  %v4842_v19 = vpack.c.bf16 %v726_v17, %v723_v16  ;;  %v729_v20 = vld [vmem:[%s7705_s6 + $0xd0] sm:$0xff] }
 0x1e0   :  { %v4845_v22 = vpack.c.bf16 %v732_v21, %v729_v20  ;;  %v4059_v20 = vld [vmem:[%s7707_s7 + $0x78] sm:$0xff]  ;;  %v4060_v21 = vld [vmem:[%s7707_s7 + $0x80] sm:$0xff] }
 0x1e2   :  { %4819 = vmatpush1.bf16.msra.mxu0 %v4818_v23  ;;  %v735_v23 = vld [vmem:[%s7705_s6 + $0x100] sm:$0xff] }
 0x1e3   :  { %4821 = vmatprep.subr.bf16.mxu0 %v4820_v26  ;;  %v4848_v25 = vpack.c.bf16 %v738_v24, %v735_v23  ;;  %v741_v26 = vld [vmem:[%s7705_s6 + $0x130] sm:$0xff]  ;;  %v1358_v23 = vld [vmem:[%s7708_s9 + $0x98] sm:$0xff] }
 0x1e4   :  { %v4851_v28 = vpack.c.bf16 %v744_v27, %v741_v26  ;;  %v1361_v24 = vld [vmem:[%s7708_s9 + $0xb0] sm:$0xff]  ;;  %v1360_v27 = vld [vmem:[%s7708_s9 + $0xa8] sm:$0xff] }
 0x1e5   :  { %v1357_v26 = vld [vmem:[%s7708_s9 + $0x90] sm:$0xff] }
 0x1e6   :  { %4823 = vmatpush1.bf16.msra.mxu0 %v4822_v29  ;;  %v747_v29 = vld [vmem:[%s7705_s6 + $0x160] sm:$0xff] }
 0x1e7   :  { %4825 = vmatprep.subr.bf16.mxu0 %v4824_v32  ;;  %v4854_v31 = vpack.c.bf16 %v750_v30, %v747_v29  ;;  %v914_v32 = vld [vmem:[%s7707_s7] sm:$0xff]  ;;  %v1364_v29 = vld [vmem:[%s7708_s9 + $0xc8] sm:$0xff] }
 0x1e8   :  { %4526 = vmatprep.mubr.msk.f32.mxu1 %vm927_vm7, %v914_v32  ;;  %v1367_v30 = vld [vmem:[%s7708_s9 + $0xe0] sm:$0xff] }
 0x1e9   :  { %v1363_v32 = vld [vmem:[%s7708_s9 + $0xc0] sm:$0xff] }
 0x1ea   :  { %4827 = vmatpush1.bf16.msra.mxu0 %v4826_v38  ;;  %v1339_v38 = vld [vmem:[%s7708_s9] sm:$0xff]  ;;  %v4886_v37 = vpack.c.bf16 %v1366_v35, %v1363_v32 }
 0x1eb   :  { %4829 = vmatprep.subr.bf16.mxu0 %v4828_v41  ;;  %v1346_v41 = vld [vmem:[%s7708_s9 + $0x38] sm:$0xff]  ;;  %v4870_v43 = vpack.c.bf16 %v1342_v40, %v1339_v38 }
 0x1ec   :  { %v1370_v38 = vld [vmem:[%s7708_s9 + $0xf8] sm:$0xff] }
 0x1ee   :  { %4831 = vmatpush1.bf16.msra.mxu0 %v4830_v44  ;;  %v4872_v44 = vpack.c.bf16 %v1349_v42, %v1346_v41  ;;  %v1369_v41 = vld [vmem:[%s7708_s9 + $0xf0] sm:$0xff]  ;;  %v1372_v42 = vld [vmem:[%s7708_s9 + $0x108] sm:$0xff] }
 0x1ef   :  { %4832 = vmatprep.subr.bf16.mxu0 %v5495_v45 }
 0x2a4   :  { %v668_v47 = vpop.f32.mrb[4].mxu0 }
 0x2a5   :  { %v5148_v48 = vadd.f32 %v4013_v46, %v668_v47  ;;  %v4472_v49 = vpop.f32.mrb[5].mxu0  ;;  %v1352_v47 = vld [vmem:[%s7708_s9 + $0x68] sm:$0xff] }
 0x2a7   :  { %v688_v50 = vmin.f32 %v5148_v48, 0.0  ;;  %vm685_vm4 = vcmp.gt.f32.partialorder %v5148_v48, 0.0 }
 0x2a8   :  { %v673_v51 = vpop.f32.mrb[6].mxu0 }
 0x2a9   :  { %v691_v52 = vmul.f32 1.442695, %v688_v50  ;;  %v5149_v53 = vadd.f32 %v4013_v46, %v673_v51  ;;  %v4475_v54 = vpop.f32.mrb[7].mxu0  ;;  %v1351_v51 = vld [vmem:[%s7708_s9 + $0x60] sm:$0xff] }
 0x2ab   :  { %5451 = vpow2.f32 %v691_v52  ;;  %v689_v55 = vmin.f32 %v5149_v53, 0.0  ;;  %vm686_vm5 = vcmp.gt.f32.partialorder %v5149_v53, 0.0  ;;  %v1354_v52 = vld [vmem:[%s7708_s9 + $0x78] sm:$0xff] }
 0x2ac   :  { %v678_v56 = vpop.f32.mrb[8].mxu0 }
 0x2ad   :  { %v693_v57 = vmul.f32 1.442695, %v689_v55  ;;  %v5150_v58 = vadd.f32 %v4013_v46, %v678_v56  ;;  %v4478_v59 = vpop.f32.mrb[9].mxu0  ;;  %v1348_v46 = vld [vmem:[%s7708_s9 + $0x48] sm:$0xff] }
 0x2af   :  { %5453 = vpow2.f32 %v693_v57  ;;  %v690_v60 = vmin.f32 %v5150_v58, 0.0  ;;  %vm687_vm6 = vcmp.gt.f32.partialorder %v5150_v58, 0.0 }
 0x2b1   :  { %v695_v61 = vmul.f32 1.442695, %v690_v60 }
 0x2b3   :  { %5455 = vpow2.f32 %v695_v61 }
 0x2b5   :  { %v5452_v0 = vpop.eup %5451 }
 0x2b6   :  { %v4032_v1 = vadd.f32 -1.0, %v5452_v0  ;;  %v917_v0 = vld [vmem:[%s7707_s7 + $0x18] sm:$0xff] }
 0x2b8   :  { %v700_v6 = vsel %vm685_vm4, %v5148_v48, %v4032_v1  ;;  %v1355_v48 = vld [vmem:[%s7708_s9 + $0x80] sm:$0xff] }
 0x2b9   :  { %v5454_v7 = vpop.eup %5453  ;;  %816 = vmatmul.mubr.f32.vlgmr.msra.gmra.mrb[10].mxu0 %v700_v6  ;;  %v4876_v50 = vpack.c.bf16 %v1355_v48, %v1352_v47  ;;  %v918_v1 = vld [vmem:[%s7707_s7 + $0x20] sm:$0xff]  ;;  %v1378_v48 = vld [vmem:[%s7708_s9 + $0x138] sm:$0xff] }
 0x2ba   :  { %4834 = vmatpush3.bf16.msra.mxu0 %v4833_v2  ;;  %821 = vmatprep.mubr.f32.mxu0 %v5493_v3  ;;  %v4033_v8 = vadd.f32 -1.0, %v5454_v7  ;;  %v919_v2 = vld [vmem:[%s7707_s7 + $0x28] sm:$0x3]  ;;  %v1375_v47 = vld [vmem:[%s7708_s9 + $0x120] sm:$0xff] }
 0x2bb   :  { %4835 = vmatprep.subr.bf16.mxu0 %v5495_v45  ;;  %v4046_v7 = vld [vmem:[%s7707_s7 + $0x48] sm:$0xff] }
 0x2bc   :  { %v701_v12 = vsel %vm686_vm5, %v5149_v53, %v4033_v8  ;;  %v4878_v53 = vpack.c.bf16 %v1354_v52, %v1351_v51  ;;  %v4047_v8 = vld [vmem:[%s7707_s7 + $0x50] sm:$0xff] }
 0x2bd   :  { %v5456_v13 = vpop.eup %5455  ;;  %822 = vmatmul.mubr.f32.gmra.mrb[12].mxu0 %v701_v12  ;;  %v1385_v51 = vld [vmem:[%s7708_s9 + $0x170] sm:$0xff] }
 0x2be   :  { %4837 = vmatpush3.bf16.msra.mxu0 %v4836_v9  ;;  %827 = vmatprep.mubr.f32.mxu0 %v5493_v3  ;;  %v4034_v14 = vadd.f32 -1.0, %v5456_v13  ;;  %v4048_v9 = vld [vmem:[%s7707_s7 + $0x58] sm:$0x3] }
 0x2bf   :  { %4838 = vmatprep.subr.bf16.mxu0 %v5495_v45 }
 0x2c0   :  { %v702_v18 = vsel %vm687_vm6, %v5150_v58, %v4034_v14 }
 0x2c1   :  { %828 = vmatmul.mubr.f32.gmra.mrb[14].mxu0 %v702_v18 }
 0x2c2   :  { %4840 = vmatpush3.bf16.msra.mxu0 %v4839_v15  ;;  %4511 = vmatprep.mubr.msk.f32.mxu0 %vm5494_vm1, %v5493_v3 }
 0x2c3   :  { %4841 = vmatprep.subr.bf16.mxu0 %v5495_v45 }
 0x2c6   :  { %4843 = vmatpush3.bf16.msra.mxu0 %v4842_v19  ;;  %v4058_v19 = vld [vmem:[%s7707_s7 + $0x70] sm:$0xff] }
 0x2c7   :  { %4844 = vmatprep.subr.bf16.mxu0 %v5495_v45 }
 0x2ca   :  { %4846 = vmatpush3.bf16.msra.mxu0 %v4845_v22  ;;  %v4061_v22 = vld [vmem:[%s7707_s7 + $0x88] sm:$0x3] }
 0x2cb   :  { %4847 = vmatprep.subr.bf16.mxu0 %v5495_v45 }
 0x2ce   :  { %4849 = vmatpush3.bf16.msra.mxu0 %v4848_v25  ;;  %v4880_v25 = vpack.c.bf16 %v1361_v24, %v1358_v23 }
 0x2cf   :  { %4850 = vmatprep.subr.bf16.mxu0 %v5495_v45 }
 0x2d2   :  { %4852 = vmatpush3.bf16.msra.mxu0 %v4851_v28  ;;  %v4882_v28 = vpack.c.bf16 %v1360_v27, %v1357_v26 }
 0x2d3   :  { %4853 = vmatprep.subr.bf16.mxu0 %v5495_v45  ;;  %v1345_v45 = vld [vmem:[%s7708_s9 + $0x30] sm:$0xff] }
 0x2d4   :  { %v4874_v49 = vpack.c.bf16 %v1348_v46, %v1345_v45  ;;  %v1379_v45 = vld [vmem:[%s7708_s9 + $0x140] sm:$0xff] }
 0x2d6   :  { %4855 = vmatpush3.bf16.msra.mxu0 %v4854_v31  ;;  %v4884_v31 = vpack.c.bf16 %v1367_v30, %v1364_v29  ;;  %v1353_v29 = vld [vmem:[%s7708_s9 + $0x70] sm:$0xff]  ;;  %v1356_v30 = vld [vmem:[%s7708_s9 + $0x88] sm:$0xff] }
 0x2d7   :  { %4869 = vmatprep.subr.bf16.mxu0 %v4868_v39  ;;  %v1373_v39 = vld [vmem:[%s7708_s9 + $0x110] sm:$0xff]  ;;  %v4908_v32 = vpack.c.bf16 %v1356_v30, %v1353_v29 }
 0x2d8   :  { %v4888_v40 = vpack.c.bf16 %v1373_v39, %v1370_v38  ;;  %v1359_v38 = vld [vmem:[%s7708_s9 + $0xa0] sm:$0xff]  ;;  %v1362_v39 = vld [vmem:[%s7708_s9 + $0xb8] sm:$0xff] }
 0x2d9   :  { %4512 = vmatmul.mubr.f32.vlgmr.msra.gmra.mrb[16].mxu0 %v700_v6  ;;  %v4045_v6 = vld [vmem:[%s7707_s7 + $0x40] sm:$0xff] }
 0x2da   :  { %4514 = vmatprep.mubr.msk.f32.mxu0 %vm5494_vm1, %v5493_v3  ;;  %4871 = vmatpush1.bf16.msra.mxu0 %v4870_v43  ;;  %v4890_v43 = vpack.c.bf16 %v1372_v42, %v1369_v41  ;;  %v4912_v41 = vpack.c.bf16 %v1362_v39, %v1359_v38 }
 0x2db   :  { %4873 = vmatprep.subr.bf16.mxu0 %v4872_v44  ;;  %v1376_v44 = vld [vmem:[%s7708_s9 + $0x128] sm:$0xff] }
 0x2dc   :  { %v4892_v46 = vpack.c.bf16 %v1379_v45, %v1376_v44  ;;  %v1365_v44 = vld [vmem:[%s7708_s9 + $0xd0] sm:$0xff]  ;;  %v1368_v45 = vld [vmem:[%s7708_s9 + $0xe8] sm:$0xff] }
 0x2dd   :  { %4515 = vmatmul.mubr.f32.gmra.mrb[18].mxu0 %v701_v12 }
 0x2de   :  { %4517 = vmatprep.mubr.msk.f32.mxu0 %vm5494_vm1, %v5493_v3  ;;  %4875 = vmatpush1.bf16.msra.mxu0 %v4874_v49  ;;  %v4894_v49 = vpack.c.bf16 %v1378_v48, %v1375_v47  ;;  %v4916_v47 = vpack.c.bf16 %v1368_v45, %v1365_v44  ;;  %vm6416_vm1 = vmpackc.low %vm946_vm8, %vm5496_vm0  ;;  %v1587_v44 = vld [vmem:[%s7710_s10 + $0x20] sm:$0xff] }
 0x2df   :  { %4877 = vmatprep.subr.bf16.mxu0 %v4876_v50  ;;  %v1382_v50 = vld [vmem:[%s7708_s9 + $0x158] sm:$0xff] }
 0x2e0   :  { %v4896_v52 = vpack.c.bf16 %v1385_v51, %v1382_v50  ;;  %v1371_v50 = vld [vmem:[%s7708_s9 + $0x100] sm:$0xff]  ;;  %v1374_v51 = vld [vmem:[%s7708_s9 + $0x118] sm:$0xff] }
 0x2e1   :  { %4518 = vmatmul.mubr.f32.gmra.mrb[20].mxu0 %v702_v18  ;;  %v4057_v18 = vld [vmem:[%s7707_s7 + $0x68] sm:$0xff] }
 0x2e2   :  { %1451 = vmatprep.mubr.f32.mxu0 %v5493_v3  ;;  %4879 = vmatpush1.bf16.msra.mxu0 %v4878_v53  ;;  %v1381_v53 = vld [vmem:[%s7708_s9 + $0x150] sm:$0xff] }
 0x2e3   :  { %4881 = vmatprep.subr.bf16.mxu0 %v4880_v25 }
 0x2e6   :  { %4883 = vmatpush1.bf16.msra.mxu0 %v4882_v28 }
 0x2e7   :  { %4885 = vmatprep.subr.bf16.mxu0 %v4884_v31 }
 0x2ea   :  { %4887 = vmatpush1.bf16.msra.mxu0 %v4886_v37 }
 0x2eb   :  { %4889 = vmatprep.subr.bf16.mxu0 %v4888_v40 }
 0x2ee   :  { %4891 = vmatpush1.bf16.msra.mxu0 %v4890_v43 }
 0x2ef   :  { %4893 = vmatprep.subr.bf16.mxu0 %v4892_v46 }
 0x2f2   :  { %4895 = vmatpush1.bf16.msra.mxu0 %v4894_v49 }
 0x2f3   :  { %4897 = vmatprep.subr.bf16.mxu0 %v4896_v52 }
 0x38c   :  { %v817_v54 = vpop.f32.mrb[10].mxu0 }
 0x38d   :  { %v819_v55 = vpop.f32.mrb[11].mxu0 }
 0x390   :  { %v823_v56 = vpop.f32.mrb[12].mxu0 }
 0x391   :  { %v4856_v57 = vpack.c.bf16 %v823_v56, %v817_v54  ;;  %v825_v58 = vpop.f32.mrb[13].mxu0  ;;  %v1384_v54 = vld [vmem:[%s7708_s9 + $0x168] sm:$0xff]  ;;  %v1341_v56 = vld [vmem:[%s7708_s9 + $0x10] sm:$0xff] }
 0x392   :  { %v4860_v59 = vpack.c.bf16 %v825_v58, %v819_v55  ;;  %v4898_v55 = vpack.c.bf16 %v1384_v54, %v1381_v53  ;;  %v4920_v53 = vpack.c.bf16 %v1374_v51, %v1371_v50  ;;  %v1590_v51 = vld [vmem:[%s7710_s10 + $0x38] sm:$0xff] }
 0x393   :  { %4857 = vmatprep.subr.bf16.mxu1 %v4856_v57 }
 0x394   :  { %v829_v60 = vpop.f32.mrb[14].mxu0  ;;  %4859 = vmatpush3.bf16.msra.mxu1 %v4856_v57  ;;  %4899 = vmatpush1.bf16.msra.mxu0 %v4898_v55  ;;  %v1344_v57 = vld [vmem:[%s7708_s9 + $0x28] sm:$0xff] }
 0x395   :  { %v831_v61 = vpop.f32.mrb[15].mxu0  ;;  %4524 = vmatprep.subr.msk.mxu1 %vm946_vm8, %v829_v60  ;;  %v4900_v58 = vpack.c.bf16 %v1344_v57, %v1341_v56  ;;  %v1377_v56 = vld [vmem:[%s7708_s9 + $0x130] sm:$0xff]  ;;  %v1380_v57 = vld [vmem:[%s7708_s9 + $0x148] sm:$0xff] }
 0x397   :  { %4901 = vmatprep.subr.bf16.mxu0 %v4900_v58 }
 0x398   :  { %4525 = vmatpush3.msk.msra.mxu1 %vm946_vm8, %v829_v60 }
 0x399   :  { %4861 = vmatprep.subr.bf16.mxu1 %v4860_v59  ;;  %4527 = vmatmul.mubr.msk.f32.vlgmr.msra.gmra.mrb[2].mxu1 %vm927_vm7, %v915_v62 }
 0x39a   :  { %4863 = vmatpush3.bf16.msra.mxu1 %v4860_v59  ;;  %4529 = vmatprep.mubr.msk.f32.mxu1 %vm927_vm7, %v916_v63  ;;  %v4035_v59 = vld [vmem:[%s7709_s8] ss:$0 sm:$0xff] }
 0x39b   :  { %4539 = vmatprep.subr.msk.mxu1 %vm946_vm8, %v831_v61 }
 0x39d   :  { %4530 = vmatmul.mubr.msk.f32.gmra.mrb[4].mxu1 %vm927_vm7, %v917_v0 }
 0x39e   :  { %4540 = vmatpush3.msk.msra.mxu1 %vm946_vm8, %v831_v61  ;;  %4532 = vmatprep.mubr.msk.f32.mxu1 %vm927_vm7, %v918_v1 }
 0x3a1   :  { %4533 = vmatmul.mubr.msk.f32.gmra.mrb[6].mxu1 %vm927_vm7, %v919_v2 }
 0x3a2   :  { %4541 = vmatprep.mubr.msk.f32.mxu1 %vm927_vm7, %v4043_v4 }
 0x3a5   :  { %4542 = vmatmul.mubr.msk.f32.vlgmr.msra.gmra.mrb[2].mxu1 %vm927_vm7, %v4044_v5 }
 0x3a6   :  { %4544 = vmatprep.mubr.msk.f32.mxu1 %vm927_vm7, %v4045_v6 }
 0x3a9   :  { %4545 = vmatmul.mubr.msk.f32.gmra.mrb[4].mxu1 %vm927_vm7, %v4046_v7 }
 0x3aa   :  { %4547 = vmatprep.mubr.msk.f32.mxu1 %vm927_vm7, %v4047_v8 }
 0x3ac   :  { %v900_v11 = vpop.f32.mrb[16].mxu0 }
 0x3ad   :  { %v4513_v12 = vpop.f32.mrb[17].mxu0  ;;  %4548 = vmatmul.mubr.msk.f32.gmra.mrb[6].mxu1 %vm927_vm7, %v4048_v9 }
 0x3ae   :  { %4556 = vmatprep.mubr.msk.f32.mxu1 %vm927_vm7, %v4056_v10 }
 0x3b0   :  { %v905_v13 = vpop.f32.mrb[18].mxu0 }
 0x3b1   :  { %v4864_v14 = vpack.c.bf16 %v905_v13, %v900_v11  ;;  %v4516_v15 = vpop.f32.mrb[19].mxu0 }
 0x3b3   :  { %4865 = vmatprep.subr.bf16.mxu1 %v4864_v14 }
 0x3b4   :  { %v910_v16 = vpop.f32.mrb[20].mxu0  ;;  %4867 = vmatpush3.bf16.msra.mxu1 %v4864_v14 }
 0x3b5   :  { %v4519_v17 = vpop.f32.mrb[21].mxu0  ;;  %4554 = vmatprep.subr.msk.mxu1 %vm946_vm8, %v910_v16 }
 0x3b8   :  { %4555 = vmatpush3.msk.msra.mxu1 %vm946_vm8, %v910_v16 }
 0x3b9   :  { %4557 = vmatmul.mubr.msk.f32.vlgmr.msra.gmra.mrb[2].mxu1 %vm927_vm7, %v4057_v18 }
 0x3ba   :  { %4559 = vmatprep.mubr.msk.f32.mxu1 %vm927_vm7, %v4058_v19 }
 0x3bd   :  { %4560 = vmatmul.mubr.msk.f32.gmra.mrb[4].mxu1 %vm927_vm7, %v4059_v20 }
 0x3be   :  { %4562 = vmatprep.mubr.msk.f32.mxu1 %vm927_vm7, %v4060_v21  ;;  %v1347_v21 = vld [vmem:[%s7708_s9 + $0x40] sm:$0xff] }
 0x3c1   :  { %4563 = vmatmul.mubr.msk.f32.gmra.mrb[6].mxu1 %vm927_vm7, %v4061_v22  ;;  %v1350_v22 = vld [vmem:[%s7708_s9 + $0x58] sm:$0xff] }
 0x3c2   :  { %v4904_v26 = vpack.c.bf16 %v1350_v22, %v1347_v21 }
 0x48c   :  { %v4558_v60 = vpop.f32.mrb[2].mxu1 }
 0x48d   :  { %v5151_v61 = vadd.f32 %v4558_v60, %v4035_v59  ;;  %v1268_v62 = vpop.f32.mrb[3].mxu1  ;;  %v1383_v60 = vld [vmem:[%s7708_s9 + $0x160] sm:$0xff] }
 0x48e   :  { %v5152_v63 = vadd.f32 %v4035_v59, %v1268_v62 }
 0x48f   :  { %v1310_v0 = vmin.f32 %v5151_v61, 0.0  ;;  %vm1304_vm10 = vcmp.gt.f32.partialorder %v5151_v61, 0.0 }
 0x490   :  { %v1309_v1 = vmin.f32 %v5152_v63, 0.0  ;;  %v4561_v2 = vpop.f32.mrb[4].mxu1  ;;  %vm1303_vm9 = vcmp.gt.f32.partialorder %v5152_v63, 0.0 }
 0x491   :  { %v1317_v4 = vmul.f32 1.442695, %v1310_v0  ;;  %v6312_v5 = vadd.f32 %v4561_v2, %v4035_v59  ;;  %v1278_v6 = vpop.f32.mrb[5].mxu1  ;;  %v2218_v0 = vld [vmem:[%s7711_s12 + $0x8] sm:$0xff] }
 0x492   :  { %v1315_v7 = vmul.f32 1.442695, %v1309_v1  ;;  %v5154_v8 = vadd.f32 %v4035_v59, %v1278_v6  ;;  %v2224_v1 = vld [vmem:[%s7711_s12 + $0x38] sm:$0xff] }
 0x493   :  { %5457 = vpow2.f32 %v1317_v4  ;;  %v1312_v9 = vmin.f32 %v6312_v5, 0.0  ;;  %vm1306_vm12 = vcmp.gt.f32.partialorder %v6312_v5, 0.0  ;;  %v4974_v2 = vpack.c.bf16 %v2224_v1, %v2218_v0  ;;  %v2217_v4 = vld [vmem:[%s7711_s12] sm:$0xff]  ;;  %v4092_v0 = vld [vmem:[%s7710_s10 + $0x78] sm:$0xff] }
 0x494   :  { %5459 = vpow2.f32 %v1315_v7  ;;  %v1311_v10 = vmin.f32 %v5154_v8, 0.0  ;;  %v4564_v11 = vpop.f32.mrb[6].mxu1  ;;  %vm1305_vm11 = vcmp.gt.f32.partialorder %v5154_v8, 0.0  ;;  %v2230_v7 = vld [vmem:[%s7711_s12 + $0x68] sm:$0xff]  ;;  %v4093_v1 = vld [vmem:[%s7710_s10 + $0x80] sm:$0xff] }
 0x495   :  { %v1288_v12 = vpop.f32.mrb[7].mxu1  ;;  %v1321_v15 = vmul.f32 1.442695, %v1312_v9  ;;  %v6317_v16 = vadd.f32 %v4564_v11, %v4035_v59  ;;  %v2235_v11 = vld [vmem:[%s7711_s12 + $0x90] sm:$0xff] }
 0x496   :  { %v1319_v13 = vmul.f32 1.442695, %v1311_v10  ;;  %v6315_v14 = vadd.f32 %v4035_v59, %v1288_v12  ;;  %v2229_v10 = vld [vmem:[%s7711_s12 + $0x60] sm:$0xff] }
 0x497   :  { %v1314_v18 = vmin.f32 %v6317_v16, 0.0  ;;  %vm1308_vm14 = vcmp.gt.f32.partialorder %v6317_v16, 0.0  ;;  %v4980_v12 = vpack.c.bf16 %v2235_v11, %v2229_v10  ;;  %v4098_v10 = vld [vmem:[%s7710_s10 + $0xa8] sm:$0xff]  ;;  %v4099_v11 = vld [vmem:[%s7710_s10 + $0xb0] sm:$0xff] }
 0x498   :  { %5461 = vpow2.f32 %v1319_v13  ;;  %v1313_v17 = vmin.f32 %v6315_v14, 0.0  ;;  %vm1307_vm13 = vcmp.gt.f32.partialorder %v6315_v14, 0.0  ;;  %v2242_v13 = vld [vmem:[%s7711_s12 + $0xc8] sm:$0xff] }
 0x499   :  { %5463 = vpow2.f32 %v1321_v15  ;;  %v1325_v25 = vmul.f32 1.442695, %v1314_v18 }
 0x49a   :  { %v1323_v19 = vmul.f32 1.442695, %v1313_v17  ;;  %v2247_v17 = vld [vmem:[%s7711_s12 + $0xf0] sm:$0xff] }
 0x49c   :  { %5465 = vpow2.f32 %v1323_v19 }
 0x49d   :  { %v5458_v20 = vpop.eup %5457  ;;  %5467 = vpow2.f32 %v1325_v25 }
 0x49e   :  { %v5460_v23 = vpop.eup %5459  ;;  %v4070_v28 = vadd.f32 -1.0, %v5458_v20 }
 0x49f   :  { %v4069_v24 = vadd.f32 -1.0, %v5460_v23 }
 0x4a0   :  { %v1334_v35 = vsel %vm1304_vm10, %v5151_v61, %v4070_v28  ;;  %v1386_v61 = vld [vmem:[%s7708_s9 + $0x178] sm:$0xff] }
 0x4a1   :  { %v1333_v27 = vsel %vm1303_vm9, %v5152_v63, %v4069_v24  ;;  %v4928_v62 = vpack.c.bf16 %v1386_v61, %v1383_v60  ;;  %v1583_v63 = vld [vmem:[%s7710_s10] sm:$0xff]  ;;  %v1594_v60 = vld [vmem:[%s7710_s10 + $0x58] sm:$0x3] }
 0x4a2   :  { %v5462_v31 = vpop.eup %5461  ;;  %1452 = vmatmul.mubr.f32.vlgmr.msra.gmra.mrb[22].mxu0 %v1333_v27  ;;  %4618 = vmatprep.mubr.msk.f32.mxu1 %vm1602_vm15, %v1583_v63  ;;  %v4089_v61 = vld [vmem:[%s7710_s10 + $0x60] sm:$0xff]  ;;  %v4091_v63 = vld [vmem:[%s7710_s10 + $0x70] sm:$0xff] }
 0x4a3   :  { %4903 = vmatpush3.bf16.msra.mxu0 %v4900_v58  ;;  %1457 = vmatprep.mubr.f32.mxu0 %v5493_v3  ;;  %v4071_v37 = vadd.f32 -1.0, %v5462_v31  ;;  %v5464_v40 = vpop.eup %5463  ;;  %v4924_v58 = vpack.c.bf16 %v1380_v57, %v1377_v56  ;;  %v1592_v56 = vld [vmem:[%s7710_s10 + $0x48] sm:$0xff] }
 0x4a4   :  { %4905 = vmatprep.subr.bf16.mxu0 %v4904_v26  ;;  %v4072_v43 = vadd.f32 -1.0, %v5464_v40 }
 0x4a5   :  { %v1335_v42 = vsel %vm1305_vm11, %v5154_v8, %v4071_v37  ;;  %v2236_v8 = vld [vmem:[%s7711_s12 + $0x98] sm:$0xff] }
 0x4a6   :  { %1458 = vmatmul.mubr.f32.gmra.mrb[24].mxu0 %v1334_v35  ;;  %v5466_v46 = vpop.eup %5465  ;;  %v1336_v48 = vsel %vm1306_vm12, %v6312_v5, %v4072_v43  ;;  %v2223_v5 = vld [vmem:[%s7711_s12 + $0x30] sm:$0xff]  ;;  %v4978_v9 = vpack.c.bf16 %v2236_v8, %v2230_v7  ;;  %v1586_v43 = vld [vmem:[%s7710_s10 + $0x18] sm:$0xff] }
 0x4a7   :  { %4907 = vmatpush3.bf16.msra.mxu0 %v4904_v26  ;;  %1463 = vmatprep.mubr.f32.mxu0 %v5493_v3  ;;  %v4073_v49 = vadd.f32 -1.0, %v5466_v46  ;;  %v5468_v52 = vpop.eup %5467  ;;  %v4976_v6 = vpack.c.bf16 %v2223_v5, %v2217_v4  ;;  %v1588_v46 = vld [vmem:[%s7710_s10 + $0x28] sm:$0xff]  ;;  %v4096_v8 = vld [vmem:[%s7710_s10 + $0x98] sm:$0xff] }
 0x4a8   :  { %4909 = vmatprep.subr.bf16.mxu0 %v4908_v32  ;;  %v4074_v55 = vadd.f32 -1.0, %v5468_v52  ;;  %v2226_v4 = vld [vmem:[%s7711_s12 + $0x48] sm:$0xff] }
 0x4a9   :  { %v1337_v54 = vsel %vm1307_vm13, %v6315_v14, %v4073_v49  ;;  %v2248_v14 = vld [vmem:[%s7711_s12 + $0xf8] sm:$0xff]  ;;  %v4094_v5 = vld [vmem:[%s7710_s10 + $0x88] sm:$0xff] }
 0x4aa   :  { %1464 = vmatmul.mubr.f32.gmra.mrb[26].mxu0 %v1335_v42  ;;  %v1338_v59 = vsel %vm1308_vm14, %v6317_v16, %v4074_v55  ;;  %v4982_v15 = vpack.c.bf16 %v2248_v14, %v2242_v13  ;;  %v2241_v16 = vld [vmem:[%s7711_s12 + $0xc0] sm:$0xff]  ;;  %v2219_v14 = vld [vmem:[%s7711_s12 + $0x10] sm:$0xff]  ;;  %vm2760_vm14 = vcmask 736256  }
 0x4ab   :  { %4911 = vmatpush3.bf16.msra.mxu0 %v4908_v32  ;;  %1469 = vmatprep.mubr.f32.mxu0 %v5493_v3  ;;  %v4984_v18 = vpack.c.bf16 %v2247_v17, %v2241_v16  ;;  %v4114_v13 = vld [vmem:[%s7710_s10 + $0xc0] sm:$0xff]  ;;  %v2232_v16 = vld [vmem:[%s7711_s12 + $0x78] sm:$0xff]  ;;  %v2238_v17 = vld [vmem:[%s7711_s12 + $0xa8] sm:$0xff] }
 0x4ac   :  { %4913 = vmatprep.subr.bf16.mxu0 %v4912_v41 }
 0x4ae   :  { %1470 = vmatmul.mubr.f32.gmra.mrb[28].mxu0 %v1336_v48 }
 0x4af   :  { %4915 = vmatpush3.bf16.msra.mxu0 %v4912_v41  ;;  %1475 = vmatprep.mubr.f32.mxu0 %v5493_v3  ;;  %v1584_v41 = vld [vmem:[%s7710_s10 + $0x8] sm:$0xff] }
 0x4b0   :  { %4917 = vmatprep.subr.bf16.mxu0 %v4916_v47 }
 0x4b2   :  { %1476 = vmatmul.mubr.f32.gmra.mrb[30].mxu0 %v1337_v54 }
 0x4b3   :  { %4919 = vmatpush3.bf16.msra.mxu0 %v4916_v47  ;;  %1481 = vmatprep.mubr.f32.mxu0 %v5493_v3 }
 0x4b4   :  { %4921 = vmatprep.subr.bf16.mxu0 %v4920_v53 }
 0x4b6   :  { %1482 = vmatmul.mubr.f32.gmra.mrb[32].mxu0 %v1338_v59 }
 0x4b7   :  { %4923 = vmatpush3.bf16.msra.mxu0 %v4920_v53  ;;  %4597 = vmatprep.mubr.f32.mxu0 %v1333_v27  ;;  %v1591_v53 = vld [vmem:[%s7710_s10 + $0x40] sm:$0xff] }
 0x4b8   :  { %4925 = vmatprep.subr.bf16.mxu0 %v4924_v58 }
 0x4bb   :  { %4927 = vmatpush3.bf16.msra.mxu0 %v4924_v58  ;;  %v1593_v58 = vld [vmem:[%s7710_s10 + $0x50] sm:$0xff] }
 0x4bc   :  { %4929 = vmatprep.subr.bf16.mxu0 %v4928_v62 }
 0x4bf   :  { %4931 = vmatpush3.bf16.msra.mxu0 %v4928_v62  ;;  %v4090_v62 = vld [vmem:[%s7710_s10 + $0x68] sm:$0xff] }
 0x4c0   :  { %4975 = vmatprep.subr.bf16.mxu0 %v4974_v2  ;;  %v2220_v2 = vld [vmem:[%s7711_s12 + $0x18] sm:$0xff] }
 0x4c1   :  { %v5006_v7 = vpack.c.bf16 %v2226_v4, %v2220_v2  ;;  %v2273_v2 = vld [vmem:[%s7711_s12 + $0x1c0] sm:$0xff] }
 0x4c2   :  { %4598 = vmatmul.mubr.f32.vlgmr.msra.gmra.mrb[34].mxu0 %v1334_v35  ;;  %v2738_v35 = vld [vmem:[%s7713_s13 + $0x70] sm:$0xff] }
 0x4c3   :  { %4600 = vmatprep.mubr.f32.mxu0 %v1335_v42  ;;  %4977 = vmatpush1.bf16.msra.mxu0 %v4976_v6  ;;  %v1585_v42 = vld [vmem:[%s7710_s10 + $0x10] sm:$0xff] }
 0x4c4   :  { %4979 = vmatprep.subr.bf16.mxu0 %v4978_v9  ;;  %v4095_v6 = vld [vmem:[%s7710_s10 + $0x90] sm:$0xff]  ;;  %v4097_v9 = vld [vmem:[%s7710_s10 + $0xa0] sm:$0xff] }
 0x4c6   :  { %4601 = vmatmul.mubr.f32.gmra.mrb[36].mxu0 %v1336_v48  ;;  %v1589_v48 = vld [vmem:[%s7710_s10 + $0x30] sm:$0xff] }
 0x4c7   :  { %4603 = vmatprep.mubr.f32.mxu0 %v1337_v54  ;;  %4981 = vmatpush1.bf16.msra.mxu0 %v4980_v12  ;;  %v4100_v12 = vld [vmem:[%s7710_s10 + $0xb8] sm:$0x3] }
 0x4c8   :  { %4983 = vmatprep.subr.bf16.mxu0 %v4982_v15  ;;  %v2225_v15 = vld [vmem:[%s7711_s12 + $0x40] sm:$0xff] }
 0x4ca   :  { %4604 = vmatmul.mubr.f32.gmra.mrb[38].mxu0 %v1338_v59 }
 0x4cb   :  { %2377 = vmatprep.mubr.f32.mxu0 %v5493_v3  ;;  %4985 = vmatpush1.bf16.msra.mxu0 %v4984_v18  ;;  %v4115_v18 = vld [vmem:[%s7710_s10 + $0xc8] sm:$0xff] }
 0x575   :  { %v1453_v19 = vpop.f32.mrb[22].mxu0 }
 0x576   :  { %v1455_v20 = vpop.f32.mrb[23].mxu0 }
 0x579   :  { %v1459_v21 = vpop.f32.mrb[24].mxu0 }
 0x57a   :  { %v4932_v22 = vpack.c.bf16 %v1459_v21, %v1453_v19  ;;  %v1461_v23 = vpop.f32.mrb[25].mxu0  ;;  %v5008_v19 = vpack.c.bf16 %v2225_v15, %v2219_v14  ;;  %v5010_v21 = vpack.c.bf16 %v2238_v17, %v2232_v16  ;;  %v2279_v14 = vld [vmem:[%s7711_s12 + $0x1f0] sm:$0xff]  ;;  %v2285_v15 = vld [vmem:[%s7711_s12 + $0x220] sm:$0xff]  ;;  %v2290_v17 = vld [vmem:[%s7711_s12 + $0x248] sm:$0xff] }
 0x57b   :  { %v4946_v24 = vpack.c.bf16 %v1461_v23, %v1455_v20  ;;  %v4116_v20 = vld [vmem:[%s7710_s10 + $0xd0] sm:$0xff]  ;;  %v2237_v23 = vld [vmem:[%s7711_s12 + $0xa0] sm:$0xff]  ;;  %v5028_v16 = vpack.c.bf16 %v2285_v15, %v2279_v14 }
 0x57c   :  { %4933 = vmatprep.subr.bf16.mxu1 %v4932_v22  ;;  %v2227_v14 = vld [vmem:[%s7711_s12 + $0x50] sm:$0xff] }
 0x57d   :  { %v1465_v25 = vpop.f32.mrb[26].mxu0  ;;  %4935 = vmatpush3.bf16.msra.mxu1 %v4932_v22  ;;  %v2231_v22 = vld [vmem:[%s7711_s12 + $0x70] sm:$0xff] }
 0x57e   :  { %v1467_v26 = vpop.f32.mrb[27].mxu0 }
 0x581   :  { %v1471_v27 = vpop.f32.mrb[28].mxu0 }
 0x582   :  { %v4936_v28 = vpack.c.bf16 %v1471_v27, %v1465_v25  ;;  %v1473_v29 = vpop.f32.mrb[29].mxu0  ;;  %v2250_v25 = vld [vmem:[%s7711_s12 + $0x108] sm:$0xff]  ;;  %v5012_v27 = vpack.c.bf16 %v2237_v23, %v2231_v22  ;;  %v2289_v22 = vld [vmem:[%s7711_s12 + $0x240] sm:$0xff]  ;;  %v2295_v23 = vld [vmem:[%s7711_s12 + $0x270] sm:$0xff] }
 0x583   :  { %v4950_v30 = vpack.c.bf16 %v1473_v29, %v1467_v26  ;;  %v4117_v26 = vld [vmem:[%s7710_s10 + $0xd8] sm:$0xff] }
 0x584   :  { %4937 = vmatprep.subr.bf16.mxu1 %v4936_v28 }
 0x585   :  { %v1477_v31 = vpop.f32.mrb[30].mxu0  ;;  %4939 = vmatpush3.bf16.msra.mxu1 %v4936_v28  ;;  %v4118_v28 = vld [vmem:[%s7710_s10 + $0xe0] sm:$0xff] }
 0x586   :  { %v1479_v32 = vpop.f32.mrb[31].mxu0 }
 0x589   :  { %v1483_v37 = vpop.f32.mrb[32].mxu0 }
 0x58a   :  { %v4940_v38 = vpack.c.bf16 %v1483_v37, %v1477_v31  ;;  %v1485_v39 = vpop.f32.mrb[33].mxu0  ;;  %v2249_v31 = vld [vmem:[%s7711_s12 + $0x100] sm:$0xff] }
 0x58b   :  { %v4954_v40 = vpack.c.bf16 %v1485_v39, %v1479_v32  ;;  %v4119_v32 = vld [vmem:[%s7710_s10 + $0xe8] sm:$0xff]  ;;  %v4121_v39 = vld [vmem:[%s7710_s10 + $0xf8] sm:$0xff] }
 0x58c   :  { %4942 = vmatprep.subr.msk.bf16.mxu1 %vm6416_vm1, %v4940_v38 }
 0x58d   :  { %4945 = vmatpush3.bf16.msk.msra.mxu1 %vm6416_vm1, %v4940_v38  ;;  %v4120_v38 = vld [vmem:[%s7710_s10 + $0xf0] sm:$0xff] }
 0x58e   :  { %4947 = vmatprep.subr.bf16.mxu1 %v4946_v24 }
 0x590   :  { %4619 = vmatmul.mubr.msk.f32.vlgmr.msra.gmra.mrb[8].mxu1 %vm1602_vm15, %v1584_v41  ;;  %v4123_v41 = vld [vmem:[%s7710_s10 + $0x108] sm:$0xff] }
 0x591   :  { %4949 = vmatpush3.bf16.msra.mxu1 %v4946_v24  ;;  %4621 = vmatprep.mubr.msk.f32.mxu1 %vm1602_vm15, %v1585_v42  ;;  %v2244_v24 = vld [vmem:[%s7711_s12 + $0xd8] sm:$0xff]  ;;  %v4124_v42 = vld [vmem:[%s7710_s10 + $0x110] sm:$0xff] }
 0x592   :  { %4951 = vmatprep.subr.bf16.mxu1 %v4950_v30  ;;  %v5014_v29 = vpack.c.bf16 %v2250_v25, %v2244_v24  ;;  %v5000_v25 = vpack.c.bf16 %v2295_v23, %v2289_v22 }
 0x594   :  { %4622 = vmatmul.mubr.msk.f32.gmra.mrb[10].mxu1 %vm1602_vm15, %v1586_v43  ;;  %v4125_v43 = vld [vmem:[%s7710_s10 + $0x118] sm:$0x3] }
 0x595   :  { %v4599_v45 = vpop.f32.mrb[34].mxu0  ;;  %4953 = vmatpush3.bf16.msra.mxu1 %v4950_v30  ;;  %4624 = vmatprep.mubr.msk.f32.mxu1 %vm1602_vm15, %v1587_v44  ;;  %v2243_v30 = vld [vmem:[%s7711_s12 + $0xd0] sm:$0xff]  ;;  %v2254_v44 = vld [vmem:[%s7711_s12 + $0x128] sm:$0xff] }
 0x596   :  { %v1554_v47 = vpop.f32.mrb[35].mxu0  ;;  %4956 = vmatprep.subr.msk.bf16.mxu1 %vm6416_vm1, %v4954_v40  ;;  %v5016_v37 = vpack.c.bf16 %v2249_v31, %v2243_v30  ;;  %v2308_v30 = vld [vmem:[%s7711_s12 + $0x2d8] sm:$0xff] }
 0x597   :  { %v4960_v49 = vpack.c.bf16 %v4599_v45, %v1554_v47  ;;  %v2260_v45 = vld [vmem:[%s7711_s12 + $0x158] sm:$0xff] }
 0x598   :  { %4625 = vmatmul.mubr.msk.f32.gmra.mrb[12].mxu1 %vm1602_vm15, %v1588_v46  ;;  %v2256_v46 = vld [vmem:[%s7711_s12 + $0x138] sm:$0xff]  ;;  %v4986_v47 = vpack.c.bf16 %v2260_v45, %v2254_v44  ;;  %v2222_v45 = vld [vmem:[%s7711_s12 + $0x28] sm:$0xff] }
 0x599   :  { %v4602_v50 = vpop.f32.mrb[36].mxu0  ;;  %4959 = vmatpush3.bf16.msk.msra.mxu1 %vm6416_vm1, %v4954_v40  ;;  %4627 = vmatprep.mubr.msk.f32.mxu1 %vm1602_vm15, %v1589_v48  ;;  %v4122_v40 = vld [vmem:[%s7710_s10 + $0x100] sm:$0xff]  ;;  %v2262_v48 = vld [vmem:[%s7711_s12 + $0x168] sm:$0xff]  ;;  %v2304_v31 = vld [vmem:[%s7711_s12 + $0x2b8] sm:$0xff] }
 0x59a   :  { %v1564_v52 = vpop.f32.mrb[37].mxu0  ;;  %4961 = vmatprep.subr.bf16.mxu1 %v4960_v49  ;;  %4987 = vmatprep.subr.bf16.mxu0 %v4986_v47 }
 0x59b   :  { %v4964_v54 = vpack.c.bf16 %v4602_v50, %v1564_v52  ;;  %v2259_v50 = vld [vmem:[%s7711_s12 + $0x150] sm:$0xff] }
 0x59c   :  { %4628 = vmatmul.mubr.msk.f32.gmra.mrb[14].mxu1 %vm1602_vm15, %v1590_v51  ;;  %v5018_v51 = vpack.c.bf16 %v2262_v48, %v2256_v46  ;;  %v2228_v46 = vld [vmem:[%s7711_s12 + $0x58] sm:$0xff]  ;;  %v6738_v48 = vld [vmem:[%s7712_s11] ss:$0 sm:$0xff] }
 0x59d   :  { %v4605_v55 = vpop.f32.mrb[38].mxu0  ;;  %4630 = vmatprep.mubr.msk.f32.mxu1 %vm1602_vm15, %v1591_v53  ;;  %v2255_v53 = vld [vmem:[%s7711_s12 + $0x130] sm:$0xff]  ;;  %v5038_v47 = vpack.c.bf16 %v2228_v46, %v2222_v45 }
 0x59e   :  { %v1574_v57 = vpop.f32.mrb[39].mxu0 }
 0x59f   :  { %v4968_v59 = vpack.c.bf16 %v4605_v55, %v1574_v57  ;;  %v2272_v57 = vld [vmem:[%s7711_s12 + $0x1b8] sm:$0xff] }
 0x5a0   :  { %4631 = vmatmul.mubr.msk.f32.gmra.mrb[16].mxu1 %vm1602_vm15, %v1592_v56  ;;  %v2266_v56 = vld [vmem:[%s7711_s12 + $0x188] sm:$0xff] }
 0x5a1   :  { %4633 = vmatprep.mubr.msk.f32.mxu1 %vm1602_vm15, %v1593_v58  ;;  %v2268_v58 = vld [vmem:[%s7711_s12 + $0x198] sm:$0xff] }
 0x5a4   :  { %4634 = vmatmul.mubr.msk.f32.gmra.mrb[18].mxu1 %vm1602_vm15, %v1594_v60  ;;  %v2274_v60 = vld [vmem:[%s7711_s12 + $0x1c8] sm:$0xff] }
 0x5a5   :  { %4648 = vmatprep.mubr.msk.f32.mxu1 %vm1602_vm15, %v4089_v61  ;;  %v2265_v61 = vld [vmem:[%s7711_s12 + $0x180] sm:$0xff] }
 0x5a8   :  { %4649 = vmatmul.mubr.msk.f32.vlgmr.msra.gmra.mrb[8].mxu1 %vm1602_vm15, %v4090_v62  ;;  %v2271_v62 = vld [vmem:[%s7711_s12 + $0x1b0] sm:$0xff] }
 0x5a9   :  { %4963 = vmatpush3.bf16.msra.mxu1 %v4960_v49  ;;  %4651 = vmatprep.mubr.msk.f32.mxu1 %vm1602_vm15, %v4091_v63  ;;  %v2253_v49 = vld [vmem:[%s7711_s12 + $0x120] sm:$0xff]  ;;  %v5022_v63 = vpack.c.bf16 %v2274_v60, %v2268_v58 }
 0x5aa   :  { %4965 = vmatprep.subr.bf16.mxu1 %v4964_v54  ;;  %v4988_v52 = vpack.c.bf16 %v2259_v50, %v2253_v49 }
 0x5ac   :  { %4652 = vmatmul.mubr.msk.f32.gmra.mrb[10].mxu1 %vm1602_vm15, %v4092_v0  ;;  %4989 = vmatpush1.bf16.msra.mxu0 %v4988_v52  ;;  %v4992_v0 = vpack.c.bf16 %v2271_v62, %v2265_v61 }
 0x5ad   :  { %4967 = vmatpush3.bf16.msra.mxu1 %v4964_v54  ;;  %4654 = vmatprep.mubr.msk.f32.mxu1 %vm1602_vm15, %v4093_v1  ;;  %v2261_v54 = vld [vmem:[%s7711_s12 + $0x160] sm:$0xff]  ;;  %v2267_v1 = vld [vmem:[%s7711_s12 + $0x190] sm:$0xff] }
 0x5ae   :  { %4970 = vmatprep.subr.msk.bf16.mxu1 %vm6416_vm1, %v4968_v59  ;;  %v5020_v55 = vpack.c.bf16 %v2261_v54, %v2255_v53  ;;  %v5024_v4 = vpack.c.bf16 %v2273_v2, %v2267_v1 }
 0x5b0   :  { %4655 = vmatmul.mubr.msk.f32.gmra.mrb[12].mxu1 %vm1602_vm15, %v4094_v5  ;;  %v2278_v5 = vld [vmem:[%s7711_s12 + $0x1e8] sm:$0xff] }
 0x5b1   :  { %4973 = vmatpush3.bf16.msk.msra.mxu1 %vm6416_vm1, %v4968_v59  ;;  %4657 = vmatprep.mubr.msk.f32.mxu1 %vm1602_vm15, %v4095_v6  ;;  %v4990_v59 = vpack.c.bf16 %v2272_v57, %v2266_v56  ;;  %v2284_v6 = vld [vmem:[%s7711_s12 + $0x218] sm:$0xff] }
 0x5b2   :  { %5007 = vmatprep.subr.bf16.mxu1 %v5006_v7  ;;  %v2280_v7 = vld [vmem:[%s7711_s12 + $0x1f8] sm:$0xff] }
 0x5b3   :  { %4991 = vmatprep.subr.bf16.mxu0 %v4990_v59 }
 0x5b4   :  { %4658 = vmatmul.mubr.msk.f32.gmra.mrb[14].mxu1 %vm1602_vm15, %v4096_v8  ;;  %4993 = vmatpush1.bf16.msra.mxu0 %v4992_v0  ;;  %v4994_v8 = vpack.c.bf16 %v2284_v6, %v2278_v5 }
 0x5b5   :  { %4660 = vmatprep.mubr.msk.f32.mxu1 %vm1602_vm15, %v4097_v9  ;;  %v2286_v9 = vld [vmem:[%s7711_s12 + $0x228] sm:$0xff] }
 0x5b6   :  { %4995 = vmatprep.subr.bf16.mxu0 %v4994_v8 }
 0x5b8   :  { %4661 = vmatmul.mubr.msk.f32.gmra.mrb[16].mxu1 %vm1602_vm15, %v4098_v10  ;;  %v2277_v10 = vld [vmem:[%s7711_s12 + $0x1e0] sm:$0xff] }
 0x5b9   :  { %4663 = vmatprep.mubr.msk.f32.mxu1 %vm1602_vm15, %v4099_v11  ;;  %v2283_v11 = vld [vmem:[%s7711_s12 + $0x210] sm:$0xff] }
 0x5bc   :  { %4664 = vmatmul.mubr.msk.f32.gmra.mrb[18].mxu1 %vm1602_vm15, %v4100_v12  ;;  %v5026_v12 = vpack.c.bf16 %v2286_v9, %v2280_v7 }
 0x5bd   :  { %4678 = vmatprep.mubr.msk.f32.mxu1 %vm1602_vm15, %v4114_v13  ;;  %v4996_v13 = vpack.c.bf16 %v2283_v11, %v2277_v10 }
 0x5bf   :  { %4997 = vmatpush1.bf16.msra.mxu0 %v4996_v13  ;;  %v2221_v13 = vld [vmem:[%s7711_s12 + $0x20] sm:$0xff] }
 0x5c0   :  { %4679 = vmatmul.mubr.msk.f32.vlgmr.msra.gmra.mrb[8].mxu1 %vm1602_vm15, %v4115_v18  ;;  %v2296_v18 = vld [vmem:[%s7711_s12 + $0x278] sm:$0xff] }
 0x5c1   :  { %4681 = vmatprep.mubr.msk.f32.mxu1 %vm1602_vm15, %v4116_v20  ;;  %5009 = vmatpush1.bf16.msra.mxu1 %v5008_v19  ;;  %v2292_v19 = vld [vmem:[%s7711_s12 + $0x258] sm:$0xff]  ;;  %v4998_v20 = vpack.c.bf16 %v2296_v18, %v2290_v17  ;;  %v2234_v18 = vld [vmem:[%s7711_s12 + $0x88] sm:$0xff] }
 0x5c2   :  { %5011 = vmatprep.subr.bf16.mxu1 %v5010_v21  ;;  %v2298_v21 = vld [vmem:[%s7711_s12 + $0x288] sm:$0xff] }
 0x5c3   :  { %v5030_v24 = vpack.c.bf16 %v2298_v21, %v2292_v19  ;;  %4999 = vmatprep.subr.bf16.mxu0 %v4998_v20  ;;  %v2240_v19 = vld [vmem:[%s7711_s12 + $0xb8] sm:$0xff]  ;;  %v5040_v21 = vpack.c.bf16 %v2227_v14, %v2221_v13 }
 0x5c4   :  { %4682 = vmatmul.mubr.msk.f32.gmra.mrb[10].mxu1 %vm1602_vm15, %v4117_v26  ;;  %v2291_v26 = vld [vmem:[%s7711_s12 + $0x250] sm:$0xff]  ;;  %5001 = vmatpush1.bf16.msra.mxu0 %v5000_v25 }
 0x5c5   :  { %4684 = vmatprep.mubr.msk.f32.mxu1 %vm1602_vm15, %v4118_v28  ;;  %5013 = vmatpush1.bf16.msra.mxu1 %v5012_v27  ;;  %v2297_v27 = vld [vmem:[%s7711_s12 + $0x280] sm:$0xff] }
 0x5c6   :  { %5015 = vmatprep.subr.bf16.mxu1 %v5014_v29  ;;  %v5032_v28 = vpack.c.bf16 %v2297_v27, %v2291_v26  ;;  %v2302_v29 = vld [vmem:[%s7711_s12 + $0x2a8] sm:$0xff]  ;;  %v2233_v26 = vld [vmem:[%s7711_s12 + $0x80] sm:$0xff]  ;;  %v2239_v27 = vld [vmem:[%s7711_s12 + $0xb0] sm:$0xff] }
 0x5c8   :  { %4685 = vmatmul.mubr.msk.f32.gmra.mrb[12].mxu1 %vm1602_vm15, %v4119_v32  ;;  %v5002_v32 = vpack.c.bf16 %v2308_v30, %v2302_v29 }
 0x5c9   :  { %4687 = vmatprep.mubr.msk.f32.mxu1 %vm1602_vm15, %v4120_v38  ;;  %5017 = vmatpush1.bf16.msra.mxu1 %v5016_v37  ;;  %v2310_v37 = vld [vmem:[%s7711_s12 + $0x2e8] sm:$0xff]  ;;  %v2301_v38 = vld [vmem:[%s7711_s12 + $0x2a0] sm:$0xff] }
 0x5ca   :  { %5019 = vmatprep.subr.bf16.mxu1 %v5018_v51  ;;  %5003 = vmatprep.subr.bf16.mxu0 %v5002_v32 }
 0x5cc   :  { %4688 = vmatmul.mubr.msk.f32.gmra.mrb[14].mxu1 %vm1602_vm15, %v4121_v39  ;;  %v2307_v39 = vld [vmem:[%s7711_s12 + $0x2d0] sm:$0xff] }
 0x5cd   :  { %4690 = vmatprep.mubr.msk.f32.mxu1 %vm1602_vm15, %v4122_v40  ;;  %5021 = vmatpush1.bf16.msra.mxu1 %v5020_v55  ;;  %v5034_v40 = vpack.c.bf16 %v2310_v37, %v2304_v31  ;;  %v5042_v31 = vpack.c.bf16 %v2240_v19, %v2234_v18  ;;  %v2246_v37 = vld [vmem:[%s7711_s12 + $0xe8] sm:$0xff] }
 0x5ce   :  { %5023 = vmatprep.subr.bf16.mxu1 %v5022_v63 }
 0x5d0   :  { %4691 = vmatmul.mubr.msk.f32.gmra.mrb[16].mxu1 %vm1602_vm15, %v4123_v41  ;;  %v5004_v41 = vpack.c.bf16 %v2307_v39, %v2301_v38  ;;  %v2252_v38 = vld [vmem:[%s7711_s12 + $0x118] sm:$0xff]  ;;  %v5044_v39 = vpack.c.bf16 %v2239_v27, %v2233_v26 }
 0x5d1   :  { %4693 = vmatprep.mubr.msk.f32.mxu1 %vm1602_vm15, %v4124_v42  ;;  %5025 = vmatpush1.bf16.msra.mxu1 %v5024_v4  ;;  %v2303_v42 = vld [vmem:[%s7711_s12 + $0x2b0] sm:$0xff] }
 0x5d2   :  { %5027 = vmatprep.subr.bf16.mxu1 %v5026_v12  ;;  %5005 = vmatpush1.bf16.msra.mxu0 %v5004_v41 }
 0x5d3   :  { %5039 = vmatprep.subr.bf16.mxu0 %v5038_v47  ;;  %v5046_v47 = vpack.c.bf16 %v2252_v38, %v2246_v37  ;;  %v2293_v38 = vld [vmem:[%s7711_s12 + $0x260] sm:$0xff] }
 0x5d4   :  { %4694 = vmatmul.mubr.msk.f32.gmra.mrb[18].mxu1 %vm1602_vm15, %v4125_v43  ;;  %v2309_v43 = vld [vmem:[%s7711_s12 + $0x2e0] sm:$0xff] }
 0x5d5   :  { %2514 = vmatprep.mubr.f32.mxu1 %v5493_v3  ;;  %5029 = vmatpush1.bf16.msra.mxu1 %v5028_v16  ;;  %v5036_v44 = vpack.c.bf16 %v2309_v43, %v2303_v42  ;;  %v2245_v43 = vld [vmem:[%s7711_s12 + $0xe0] sm:$0xff] }
 0x5d6   :  { %5031 = vmatprep.subr.bf16.mxu1 %v5030_v24 }
 0x5d9   :  { %5033 = vmatpush1.bf16.msra.mxu1 %v5032_v28 }
 0x5da   :  { %5035 = vmatprep.subr.bf16.mxu1 %v5034_v40 }
 0x5dd   :  { %5037 = vmatpush1.bf16.msra.mxu1 %v5036_v44  ;;  %v2251_v44 = vld [vmem:[%s7711_s12 + $0x110] sm:$0xff] }
 0x693   :  { %v4680_v49 = vpop.f32.mrb[8].mxu1 }
 0x694   :  { %v6741_v50 = vadd.f32 %v4680_v49, %v6738_v48  ;;  %v2074_v51 = vpop.f32.mrb[9].mxu1 }
 0x695   :  { %v5158_v52 = vadd.f32 %v6738_v48, %v2074_v51  ;;  %v2258_v51 = vld [vmem:[%s7711_s12 + $0x148] sm:$0xff] }
 0x696   :  { %v2158_v53 = vmin.f32 %v6741_v50, 0.0  ;;  %vm2146_vm3 = vcmp.gt.f32.partialorder %v6741_v50, 0.0 }
 0x697   :  { %v2157_v54 = vmin.f32 %v5158_v52, 0.0  ;;  %v4683_v55 = vpop.f32.mrb[10].mxu1  ;;  %vm2145_vm2 = vcmp.gt.f32.partialorder %v5158_v52, 0.0 }
 0x698   :  { %v2171_v56 = vmul.f32 1.442695, %v2158_v53  ;;  %v6746_v57 = vadd.f32 %v4683_v55, %v6738_v48  ;;  %v2084_v58 = vpop.f32.mrb[11].mxu1 }
 0x699   :  { %v2169_v59 = vmul.f32 1.442695, %v2157_v54  ;;  %v6749_v60 = vadd.f32 %v6738_v48, %v2084_v58  ;;  %v2263_v58 = vld [vmem:[%s7711_s12 + $0x170] sm:$0xff] }
 0x69a   :  { %5469 = vpow2.f32 %v2171_v56  ;;  %v2160_v61 = vmin.f32 %v6746_v57, 0.0  ;;  %v2257_v56 = vld [vmem:[%s7711_s12 + $0x140] sm:$0xff]  ;;  %vm2148_vm5 = vcmp.gt.f32.partialorder %v6746_v57, 0.0 }
 0x69b   :  { %5471 = vpow2.f32 %v2169_v59  ;;  %v2159_v62 = vmin.f32 %v6749_v60, 0.0  ;;  %v4686_v63 = vpop.f32.mrb[12].mxu1  ;;  %vm2147_vm4 = vcmp.gt.f32.partialorder %v6749_v60, 0.0 }
 0x69c   :  { %v2094_v0 = vpop.f32.mrb[13].mxu1  ;;  %v2175_v4 = vmul.f32 1.442695, %v2160_v61  ;;  %v6757_v5 = vadd.f32 %v4686_v63, %v6738_v48 }
 0x69d   :  { %v2173_v1 = vmul.f32 1.442695, %v2159_v62  ;;  %v6754_v2 = vadd.f32 %v6738_v48, %v2094_v0  ;;  %v2270_v0 = vld [vmem:[%s7711_s12 + $0x1a8] sm:$0xff] }
 0x69e   :  { %v2162_v9 = vmin.f32 %v6757_v5, 0.0  ;;  %vm2150_vm7 = vcmp.gt.f32.partialorder %v6757_v5, 0.0 }
 0x69f   :  { %5473 = vpow2.f32 %v2173_v1  ;;  %v2161_v6 = vmin.f32 %v6754_v2, 0.0  ;;  %v4689_v7 = vpop.f32.mrb[14].mxu1  ;;  %v2276_v1 = vld [vmem:[%s7711_s12 + $0x1d8] sm:$0xff]  ;;  %vm2149_vm6 = vcmp.gt.f32.partialorder %v6754_v2, 0.0 }
 0x6a0   :  { %v2104_v8 = vpop.f32.mrb[15].mxu1  ;;  %5475 = vpow2.f32 %v2175_v4  ;;  %v2179_v22 = vmul.f32 1.442695, %v2162_v9  ;;  %v6777_v23 = vadd.f32 %v4689_v7, %v6738_v48  ;;  %v2275_v9 = vld [vmem:[%s7711_s12 + $0x1d0] sm:$0xff]  ;;  %v5054_v13 = vpack.c.bf16 %v2276_v1, %v2270_v0 }
 0x6a1   :  { %v2177_v10 = vmul.f32 1.442695, %v2161_v6  ;;  %v6762_v11 = vadd.f32 %v6738_v48, %v2104_v8  ;;  %v2269_v8 = vld [vmem:[%s7711_s12 + $0x1a0] sm:$0xff] }
 0x6a2   :  { %v2164_v40 = vmin.f32 %v6777_v23, 0.0  ;;  %vm2152_vm9 = vcmp.gt.f32.partialorder %v6777_v23, 0.0 }
 0x6a3   :  { %v4692_v12 = vpop.f32.mrb[16].mxu1  ;;  %5477 = vpow2.f32 %v2177_v10  ;;  %v2163_v24 = vmin.f32 %v6762_v11, 0.0  ;;  %vm2151_vm8 = vcmp.gt.f32.partialorder %v6762_v11, 0.0 }
 0x6a4   :  { %v5470_v15 = vpop.eup %5469  ;;  %v2114_v16 = vpop.f32.mrb[17].mxu1  ;;  %5479 = vpow2.f32 %v2179_v22  ;;  %v2183_v53 = vmul.f32 1.442695, %v2164_v40  ;;  %v6826_v54 = vadd.f32 %v4692_v12, %v6738_v48 }
 0x6a5   :  { %v5472_v17 = vpop.eup %5471  ;;  %v4140_v30 = vadd.f32 -1.0, %v5470_v15  ;;  %v2181_v41 = vmul.f32 1.442695, %v2163_v24  ;;  %v6803_v42 = vadd.f32 %v6738_v48, %v2114_v16  ;;  %v2282_v15 = vld [vmem:[%s7711_s12 + $0x208] sm:$0xff]  ;;  %v2288_v16 = vld [vmem:[%s7711_s12 + $0x238] sm:$0xff] }
 0x6a6   :  { %v4139_v20 = vadd.f32 -1.0, %v5472_v17  ;;  %v2166_v4 = vmin.f32 %v6826_v54, 0.0  ;;  %v5058_v26 = vpack.c.bf16 %v2288_v16, %v2282_v15  ;;  %vm2154_vm11 = vcmp.gt.f32.partialorder %v6826_v54, 0.0 }
 0x6a7   :  { %v6780_v25 = vpop.f32.mrb[18].mxu1  ;;  %v6812_v45 = vsel %vm2146_vm3, %v6741_v50, %v4140_v30  ;;  %v5048_v50 = vpack.c.bf16 %v2251_v44, %v2245_v43  ;;  %5481 = vpow2.f32 %v2181_v41  ;;  %v2165_v55 = vmin.f32 %v6803_v42, 0.0  ;;  %v2312_v41 = vld [vmem:[%s7711_s12 + $0x2f8] sm:$0xff] }
 0x6a8   :  { %v6788_v28 = vsel %vm2145_vm2, %v5158_v52, %v4139_v20  ;;  %v2124_v29 = vpop.f32.mrb[19].mxu1  ;;  %v2264_v52 = vld [vmem:[%s7711_s12 + $0x178] sm:$0xff]  ;;  %5483 = vpow2.f32 %v2183_v53  ;;  %v2187_v17 = vmul.f32 1.442695, %v2166_v4  ;;  %v6875_v18 = vadd.f32 %v6780_v25, %v6738_v48  ;;  %v2281_v20 = vld [vmem:[%s7711_s12 + $0x200] sm:$0xff] }
 0x6a9   :  { %v5474_v32 = vpop.eup %5473  ;;  %2378 = vmatmul.mubr.f32.vlgmr.msra.gmra.mrb[40].mxu0 %v6788_v28  ;;  %2515 = vmatmul.mubr.f32.vlgmr.msra.gmra.mrb[20].mxu1 %v6788_v28  ;;  %v5050_v62 = vpack.c.bf16 %v2264_v52, %v2258_v51  ;;  %v2185_v6 = vmul.f32 1.442695, %v2165_v55  ;;  %v6851_v7 = vadd.f32 %v6738_v48, %v2124_v29  ;;  %v2294_v48 = vld [vmem:[%s7711_s12 + $0x268] sm:$0xff]  ;;  %v2300_v25 = vld [vmem:[%s7711_s12 + $0x298] sm:$0xff]  ;;  %v2305_v51 = vld [vmem:[%s7711_s12 + $0x2c0] sm:$0xff]  ;;  %vm2153_vm10 = vcmp.gt.f32.partialorder %v6803_v42, 0.0 }
 0x6aa   :  { %2383 = vmatprep.mubr.f32.mxu0 %v5493_v3  ;;  %2520 = vmatprep.mubr.f32.mxu1 %v5493_v3  ;;  %v4141_v46 = vadd.f32 -1.0, %v5474_v32  ;;  %v5476_v49 = vpop.eup %5475  ;;  %v2168_v29 = vmin.f32 %v6875_v18, 0.0  ;;  %v5062_v37 = vpack.c.bf16 %v2300_v25, %v2294_v48  ;;  %v2311_v52 = vld [vmem:[%s7711_s12 + $0x2f0] sm:$0xff]  ;;  %vm2156_vm13 = vcmp.gt.f32.partialorder %v6875_v18, 0.0 }
 0x6ab   :  { %5041 = vmatpush1.bf16.msra.mxu0 %v5040_v21  ;;  %v4142_v61 = vadd.f32 -1.0, %v5476_v49  ;;  %5485 = vpow2.f32 %v2185_v6  ;;  %v2167_v19 = vmin.f32 %v6851_v7, 0.0  ;;  %v2287_v21 = vld [vmem:[%s7711_s12 + $0x230] sm:$0xff]  ;;  %vm2155_vm12 = vcmp.gt.f32.partialorder %v6851_v7, 0.0 }
 0x6ac   :  { %5043 = vmatprep.subr.bf16.mxu0 %v5042_v31  ;;  %v6836_v59 = vsel %vm2147_vm4, %v6749_v60, %v4141_v46  ;;  %v5052_v60 = vpack.c.bf16 %v2263_v58, %v2257_v56  ;;  %5487 = vpow2.f32 %v2187_v17  ;;  %v2191_v43 = vmul.f32 1.442695, %v2168_v29 }
 0x6ad   :  { %2384 = vmatmul.mubr.f32.gmra.mrb[42].mxu0 %v6812_v45  ;;  %2521 = vmatmul.mubr.f32.gmra.mrb[22].mxu1 %v6812_v45  ;;  %v5478_v63 = vpop.eup %5477  ;;  %v6860_v10 = vsel %vm2148_vm5, %v6746_v57, %v4142_v61  ;;  %v5056_v57 = vpack.c.bf16 %v2275_v9, %v2269_v8  ;;  %v2189_v30 = vmul.f32 1.442695, %v2167_v19 }
 0x6ae   :  { %2389 = vmatprep.mubr.f32.mxu0 %v5493_v3  ;;  %2526 = vmatprep.mubr.f32.mxu1 %v5493_v3  ;;  %v4143_v12 = vadd.f32 -1.0, %v5478_v63  ;;  %v5480_v14 = vpop.eup %5479 }
 0x6af   :  { %5045 = vmatpush1.bf16.msra.mxu0 %v5044_v39  ;;  %v4144_v24 = vadd.f32 -1.0, %v5480_v14  ;;  %v2299_v39 = vld [vmem:[%s7711_s12 + $0x290] sm:$0xff]  ;;  %5489 = vpow2.f32 %v2189_v30 }
 0x6b0   :  { %5047 = vmatprep.subr.bf16.mxu0 %v5046_v47  ;;  %v6885_v22 = vsel %vm2149_vm6, %v6754_v2, %v4143_v12  ;;  %v5060_v2 = vpack.c.bf16 %v2287_v21, %v2281_v20  ;;  %v5064_v44 = vpack.c.bf16 %v2299_v39, %v2293_v38  ;;  %5491 = vpow2.f32 %v2191_v43 }
 0x6b1   :  { %2390 = vmatmul.mubr.f32.gmra.mrb[44].mxu0 %v6836_v59  ;;  %2527 = vmatmul.mubr.f32.gmra.mrb[24].mxu1 %v6836_v59  ;;  %v5482_v27 = vpop.eup %5481  ;;  %v6900_v31 = vsel %vm2150_vm7, %v6757_v5, %v4144_v24  ;;  %v2306_v5 = vld [vmem:[%s7711_s12 + $0x2c8] sm:$0xff] }
 0x6b2   :  { %2395 = vmatprep.mubr.f32.mxu0 %v5493_v3  ;;  %2532 = vmatprep.mubr.f32.mxu1 %v5493_v3  ;;  %v4145_v32 = vadd.f32 -1.0, %v5482_v27  ;;  %v5484_v40 = vpop.eup %5483  ;;  %v5066_v49 = vpack.c.bf16 %v2312_v41, %v2306_v5 }
 0x6b3   :  { %5049 = vmatpush1.bf16.msra.mxu0 %v5048_v50  ;;  %v4146_v47 = vadd.f32 -1.0, %v5484_v40 }
 0x6b4   :  { %5051 = vmatprep.subr.bf16.mxu0 %v5050_v62  ;;  %v6920_v46 = vsel %vm2151_vm8, %v6762_v11, %v4145_v32  ;;  %v5068_v11 = vpack.c.bf16 %v2311_v52, %v2305_v51 }
 0x6b5   :  { %2396 = vmatmul.mubr.f32.gmra.mrb[46].mxu0 %v6860_v10  ;;  %2533 = vmatmul.mubr.f32.gmra.mrb[26].mxu1 %v6860_v10  ;;  %v5486_v50 = vpop.eup %5485  ;;  %v2212_v53 = vsel %vm2152_vm9, %v6777_v23, %v4146_v47 }
 0x6b6   :  { %2401 = vmatprep.mubr.f32.mxu0 %v5493_v3  ;;  %2538 = vmatprep.mubr.f32.mxu1 %v5493_v3  ;;  %v4147_v55 = vadd.f32 -1.0, %v5486_v50  ;;  %v5488_v56 = vpop.eup %5487 }
 0x6b7   :  { %5053 = vmatpush1.bf16.msra.mxu0 %v5052_v60  ;;  %v4148_v61 = vadd.f32 -1.0, %v5488_v56 }
 0x6b8   :  { %5055 = vmatprep.subr.bf16.mxu0 %v5054_v13  ;;  %v2213_v58 = vsel %vm2153_vm10, %v6803_v42, %v4147_v55 }
 0x6b9   :  { %2402 = vmatmul.mubr.f32.gmra.mrb[48].mxu0 %v6885_v22  ;;  %2539 = vmatmul.mubr.f32.gmra.mrb[28].mxu1 %v6885_v22  ;;  %v5490_v62 = vpop.eup %5489  ;;  %v2214_v23 = vsel %vm2154_vm11, %v6826_v54, %v4148_v61 }
 0x6ba   :  { %2407 = vmatprep.mubr.f32.mxu0 %v5493_v3  ;;  %2544 = vmatprep.mubr.f32.mxu1 %v5493_v3  ;;  %v4149_v63 = vadd.f32 -1.0, %v5490_v62  ;;  %v5492_v0 = vpop.eup %5491 }
 0x6bb   :  { %5057 = vmatpush1.bf16.msra.mxu0 %v5056_v57  ;;  %v4150_v1 = vadd.f32 -1.0, %v5492_v0 }
 0x6bc   :  { %5059 = vmatprep.subr.bf16.mxu0 %v5058_v26  ;;  %v2215_v42 = vsel %vm2155_vm12, %v6851_v7, %v4149_v63 }
 0x6bd   :  { %2408 = vmatmul.mubr.f32.gmra.mrb[50].mxu0 %v6900_v31  ;;  %2545 = vmatmul.mubr.f32.gmra.mrb[30].mxu1 %v6900_v31  ;;  %v2216_v54 = vsel %vm2156_vm13, %v6875_v18, %v4150_v1 }
 0x6be   :  { %2413 = vmatprep.mubr.f32.mxu0 %v5493_v3  ;;  %2550 = vmatprep.mubr.f32.mxu1 %v5493_v3 }
 0x6bf   :  { %5061 = vmatpush1.bf16.msra.mxu0 %v5060_v2 }
 0x6c0   :  { %5063 = vmatprep.subr.bf16.mxu0 %v5062_v37 }
 0x6c1   :  { %2414 = vmatmul.mubr.f32.gmra.mrb[52].mxu0 %v6920_v46  ;;  %2551 = vmatmul.mubr.f32.gmra.mrb[32].mxu1 %v6920_v46 }
 0x6c2   :  { %2419 = vmatprep.mubr.f32.mxu0 %v5493_v3  ;;  %2556 = vmatprep.mubr.f32.mxu1 %v5493_v3 }
 0x6c3   :  { %5065 = vmatpush1.bf16.msra.mxu0 %v5064_v44 }
 0x6c4   :  { %5067 = vmatprep.subr.bf16.mxu0 %v5066_v49 }
 0x6c5   :  { %2420 = vmatmul.mubr.f32.gmra.mrb[54].mxu0 %v2212_v53  ;;  %2557 = vmatmul.mubr.f32.gmra.mrb[34].mxu1 %v2212_v53 }
 0x6c6   :  { %2425 = vmatprep.mubr.f32.mxu0 %v5493_v3  ;;  %2562 = vmatprep.mubr.f32.mxu1 %v5493_v3 }
 0x6c7   :  { %5069 = vmatpush1.bf16.msra.mxu0 %v5068_v11 }
 0x6c9   :  { %2426 = vmatmul.mubr.f32.gmra.mrb[56].mxu0 %v2213_v58  ;;  %2563 = vmatmul.mubr.f32.gmra.mrb[36].mxu1 %v2213_v58 }
 0x6ca   :  { %2431 = vmatprep.mubr.f32.mxu0 %v5493_v3  ;;  %2568 = vmatprep.mubr.f32.mxu1 %v5493_v3 }
 0x6cd   :  { %2432 = vmatmul.mubr.f32.gmra.mrb[58].mxu0 %v2214_v23  ;;  %2569 = vmatmul.mubr.f32.gmra.mrb[38].mxu1 %v2214_v23 }
 0x6ce   :  { %2437 = vmatprep.mubr.f32.mxu0 %v5493_v3  ;;  %2574 = vmatprep.mubr.f32.mxu1 %v5493_v3 }
 0x6d1   :  { %2438 = vmatmul.mubr.f32.gmra.mrb[60].mxu0 %v2215_v42  ;;  %2575 = vmatmul.mubr.f32.gmra.mrb[40].mxu1 %v2215_v42 }
 0x6d2   :  { %2443 = vmatprep.mubr.f32.mxu0 %v5493_v3  ;;  %2580 = vmatprep.mubr.f32.mxu1 %v5493_v3 }
 0x6d5   :  { %2444 = vmatmul.mubr.f32.gmra.mrb[62].mxu0 %v2216_v54  ;;  %2581 = vmatmul.mubr.f32.gmra.mrb[42].mxu1 %v2216_v54 }
 0x6d6   :  { %2651 = vmatprep.mubr.f32.mxu0 %v5493_v3  ;;  %3311 = vmatprep.mubr.f32.mxu1 %v5493_v3 }
 0x6d9   :  { %2652 = vmatmul.mubr.f32.vlgmr.msra.gmra.mrb[64].mxu0 %v6788_v28 }
 0x6da   :  { %2657 = vmatprep.mubr.f32.mxu0 %v5493_v3 }
 0x6dd   :  { %2658 = vmatmul.mubr.f32.gmra.mrb[66].mxu0 %v6812_v45 }
 0x6de   :  { %2663 = vmatprep.mubr.f32.mxu0 %v5493_v3 }
 0x6e1   :  { %2664 = vmatmul.mubr.f32.gmra.mrb[68].mxu0 %v6836_v59 }
 0x6e2   :  { %2669 = vmatprep.mubr.f32.mxu0 %v5493_v3 }
 0x6e5   :  { %2670 = vmatmul.mubr.f32.gmra.mrb[70].mxu0 %v6860_v10 }
 0x6e6   :  { %2675 = vmatprep.mubr.f32.mxu0 %v5493_v3 }
 0x6e9   :  { %2676 = vmatmul.mubr.f32.gmra.mrb[72].mxu0 %v6885_v22 }
 0x6ea   :  { %2681 = vmatprep.mubr.f32.mxu0 %v5493_v3 }
 0x6ed   :  { %2682 = vmatmul.mubr.f32.gmra.mrb[74].mxu0 %v6900_v31 }
 0x6ee   :  { %2687 = vmatprep.mubr.f32.mxu0 %v5493_v3 }
 0x6f1   :  { %2688 = vmatmul.mubr.f32.gmra.mrb[76].mxu0 %v6920_v46 }
 0x6f2   :  { %2693 = vmatprep.mubr.f32.mxu0 %v5493_v3 }
 0x6f5   :  { %2694 = vmatmul.mubr.f32.gmra.mrb[78].mxu0 %v2212_v53 }
 0x6f6   :  { %2699 = vmatprep.mubr.f32.mxu0 %v5493_v3 }
 0x6f9   :  { %2700 = vmatmul.mubr.f32.gmra.mrb[80].mxu0 %v2213_v58 }
 0x6fa   :  { %2705 = vmatprep.mubr.f32.mxu0 %v5493_v3 }
 0x6fd   :  { %2706 = vmatmul.mubr.f32.gmra.mrb[82].mxu0 %v2214_v23 }
 0x6fe   :  { %2711 = vmatprep.mubr.f32.mxu0 %v5493_v3 }
 0x701   :  { %2712 = vmatmul.mubr.f32.gmra.mrb[84].mxu0 %v2215_v42 }
 0x702   :  { %2717 = vmatprep.mubr.f32.mxu0 %v5493_v3 }
 0x705   :  { %2718 = vmatmul.mubr.f32.gmra.mrb[86].mxu0 %v2216_v54 }
 0x706   :  { %2903 = vmatprep.mubr.f32.mxu0 %v5493_v3 }
 0x77c   :  { %v2379_v28 = vpop.f32.mrb[40].mxu0  ;;  %v2516_v45 = vpop.f32.mrb[20].mxu1 }
 0x77d   :  { %v2381_v59 = vpop.f32.mrb[41].mxu0  ;;  %v2518_v60 = vpop.f32.mrb[21].mxu1 }
 0x780   :  { %v2385_v4 = vpop.f32.mrb[42].mxu0  ;;  %v2522_v6 = vpop.f32.mrb[22].mxu1 }
 0x781   :  { %v5072_v7 = vpack.c.bf16 %v2385_v4, %v2379_v28  ;;  %v5098_v8 = vpack.c.bf16 %v2522_v6, %v2516_v45  ;;  %v2387_v9 = vpop.f32.mrb[43].mxu0  ;;  %v2524_v10 = vpop.f32.mrb[23].mxu1 }
 0x782   :  { %v5070_v12 = vpack.c.bf16 %v2387_v9, %v2381_v59  ;;  %v5096_v13 = vpack.c.bf16 %v2524_v10, %v2518_v60 }
 0x784   :  { %v2391_v14 = vpop.f32.mrb[44].mxu0  ;;  %v2528_v15 = vpop.f32.mrb[24].mxu1  ;;  %5071 = vmatprep.subr.bf16.mxu0 %v5070_v12  ;;  %5097 = vmatprep.subr.bf16.mxu1 %v5096_v13 }
 0x785   :  { %v2393_v16 = vpop.f32.mrb[45].mxu0  ;;  %v2530_v57 = vpop.f32.mrb[25].mxu1  ;;  %5073 = vmatpush1.bf16.msra.mxu0 %v5072_v7  ;;  %5099 = vmatpush1.bf16.msra.mxu1 %v5098_v8 }
 0x788   :  { %v2397_v17 = vpop.f32.mrb[46].mxu0  ;;  %v2534_v18 = vpop.f32.mrb[26].mxu1 }
 0x789   :  { %v5076_v19 = vpack.c.bf16 %v2397_v17, %v2391_v14  ;;  %v5102_v20 = vpack.c.bf16 %v2534_v18, %v2528_v15  ;;  %v2399_v21 = vpop.f32.mrb[47].mxu0  ;;  %v2536_v22 = vpop.f32.mrb[27].mxu1  ;;  %v4177_v17 = vld [vmem:[%s7713_s13 + $0xc0] sm:$0xff] }
 0x78a   :  { %v5074_v24 = vpack.c.bf16 %v2399_v21, %v2393_v16  ;;  %v5100_v26 = vpack.c.bf16 %v2536_v22, %v2530_v57  ;;  %v2724_v57 = vld [vmem:[%s7713_s13] sm:$0xff]  ;;  %v2725_v21 = vld [vmem:[%s7713_s13 + $0x8] sm:$0xff] }
 0x78b   :  { %v4178_v22 = vld [vmem:[%s7713_s13 + $0xc8] sm:$0xff] }
 0x78c   :  { %v2403_v27 = vpop.f32.mrb[48].mxu0  ;;  %v2540_v48 = vpop.f32.mrb[28].mxu1  ;;  %5075 = vmatprep.subr.bf16.mxu0 %v5074_v24  ;;  %5101 = vmatprep.subr.bf16.mxu1 %v5100_v26 }
 0x78d   :  { %v2405_v25 = vpop.f32.mrb[49].mxu0  ;;  %v2542_v2 = vpop.f32.mrb[29].mxu1  ;;  %5077 = vmatpush1.bf16.msra.mxu0 %v5076_v19  ;;  %5103 = vmatpush1.bf16.msra.mxu1 %v5102_v20 }
 0x790   :  { %v2409_v29 = vpop.f32.mrb[50].mxu0  ;;  %v2546_v30 = vpop.f32.mrb[30].mxu1 }
 0x791   :  { %v5080_v31 = vpack.c.bf16 %v2409_v29, %v2403_v27  ;;  %v5106_v32 = vpack.c.bf16 %v2546_v30, %v2540_v48  ;;  %v2411_v37 = vpop.f32.mrb[51].mxu0  ;;  %v2548_v38 = vpop.f32.mrb[31].mxu1  ;;  %v2726_v48 = vld [vmem:[%s7713_s13 + $0x10] sm:$0xff] }
 0x792   :  { %v5078_v39 = vpack.c.bf16 %v2411_v37, %v2405_v25  ;;  %v5104_v40 = vpack.c.bf16 %v2548_v38, %v2542_v2  ;;  %v4179_v25 = vld [vmem:[%s7713_s13 + $0xd0] sm:$0xff] }
 0x794   :  { %v2415_v5 = vpop.f32.mrb[52].mxu0  ;;  %v2552_v41 = vpop.f32.mrb[32].mxu1  ;;  %5079 = vmatprep.subr.bf16.mxu0 %v5078_v39  ;;  %5105 = vmatprep.subr.bf16.mxu1 %v5104_v40  ;;  %v2728_v40 = vld [vmem:[%s7713_s13 + $0x20] sm:$0xff] }
 0x795   :  { %v2417_v43 = vpop.f32.mrb[53].mxu0  ;;  %v2554_v44 = vpop.f32.mrb[33].mxu1  ;;  %5081 = vmatpush1.bf16.msra.mxu0 %v5080_v31  ;;  %5107 = vmatpush1.bf16.msra.mxu1 %v5106_v32  ;;  %v2727_v31 = vld [vmem:[%s7713_s13 + $0x18] sm:$0xff] }
 0x796   :  { %v4180_v32 = vld [vmem:[%s7713_s13 + $0xd8] sm:$0xff] }
 0x798   :  { %v2421_v46 = vpop.f32.mrb[54].mxu0  ;;  %v2558_v47 = vpop.f32.mrb[34].mxu1 }
 0x799   :  { %v5084_v49 = vpack.c.bf16 %v2421_v46, %v2415_v5  ;;  %v5110_v51 = vpack.c.bf16 %v2558_v47, %v2552_v41  ;;  %v2423_v52 = vpop.f32.mrb[55].mxu0  ;;  %v2560_v50 = vpop.f32.mrb[35].mxu1  ;;  %v4181_v5 = vld [vmem:[%s7713_s13 + $0xe0] sm:$0xff]  ;;  %v2729_v46 = vld [vmem:[%s7713_s13 + $0x28] sm:$0xff] }
 0x79a   :  { %v5082_v11 = vpack.c.bf16 %v2423_v52, %v2417_v43  ;;  %v5108_v53 = vpack.c.bf16 %v2560_v50, %v2554_v44  ;;  %v4182_v47 = vld [vmem:[%s7713_s13 + $0xe8] sm:$0xff]  ;;  %v2730_v50 = vld [vmem:[%s7713_s13 + $0x30] sm:$0xff] }
 0x79c   :  { %v2427_v55 = vpop.f32.mrb[56].mxu0  ;;  %v2564_v56 = vpop.f32.mrb[36].mxu1  ;;  %5083 = vmatprep.subr.bf16.mxu0 %v5082_v11  ;;  %5109 = vmatprep.subr.bf16.mxu1 %v5108_v53  ;;  %v4183_v11 = vld [vmem:[%s7713_s13 + $0xf0] sm:$0xff] }
 0x79d   :  { %v2429_v58 = vpop.f32.mrb[57].mxu0  ;;  %v2566_v61 = vpop.f32.mrb[37].mxu1  ;;  %5085 = vmatpush1.bf16.msra.mxu0 %v5084_v49  ;;  %5111 = vmatpush1.bf16.msra.mxu1 %v5110_v51 }
 0x7a0   :  { %v2433_v62 = vpop.f32.mrb[58].mxu0  ;;  %v2570_v23 = vpop.f32.mrb[38].mxu1 }
 0x7a1   :  { %v5088_v63 = vpack.c.bf16 %v2433_v62, %v2427_v55  ;;  %v5114_v0 = vpack.c.bf16 %v2570_v23, %v2564_v56  ;;  %v2435_v42 = vpop.f32.mrb[59].mxu0  ;;  %v2572_v1 = vpop.f32.mrb[39].mxu1 }
 0x7a2   :  { %v5086_v54 = vpack.c.bf16 %v2435_v42, %v2429_v58  ;;  %v5112_v28 = vpack.c.bf16 %v2572_v1, %v2566_v61  ;;  %v2731_v58 = vld [vmem:[%s7713_s13 + $0x38] sm:$0xff]  ;;  %v4185_v42 = vld [vmem:[%s7713_s13 + $0x100] sm:$0xff] }
 0x7a3   :  { %v4184_v61 = vld [vmem:[%s7713_s13 + $0xf8] sm:$0xff] }
 0x7a4   :  { %v2439_v45 = vpop.f32.mrb[60].mxu0  ;;  %v2576_v59 = vpop.f32.mrb[40].mxu1  ;;  %5087 = vmatprep.subr.bf16.mxu0 %v5086_v54  ;;  %5113 = vmatprep.subr.bf16.mxu1 %v5112_v28 }
 0x7a5   :  { %v2441_v60 = vpop.f32.mrb[61].mxu0  ;;  %v2578_v4 = vpop.f32.mrb[41].mxu1  ;;  %5089 = vmatpush1.bf16.msra.mxu0 %v5088_v63  ;;  %5115 = vmatpush1.bf16.msra.mxu1 %v5114_v0  ;;  %v2732_v0 = vld [vmem:[%s7713_s13 + $0x40] sm:$0xff] }
 0x7a8   :  { %v2445_v6 = vpop.f32.mrb[62].mxu0  ;;  %v2582_v7 = vpop.f32.mrb[42].mxu1 }
 0x7a9   :  { %v5093_v8 = vpack.c.bf16 %v2445_v6, %v2439_v45  ;;  %v5119_v9 = vpack.c.bf16 %v2582_v7, %v2576_v59  ;;  %v2447_v10 = vpop.f32.mrb[63].mxu0  ;;  %v2584_v12 = vpop.f32.mrb[43].mxu1  ;;  %v2733_v45 = vld [vmem:[%s7713_s13 + $0x48] sm:$0xff]  ;;  %v2734_v7 = vld [vmem:[%s7713_s13 + $0x50] sm:$0xff] }
 0x7aa   :  { %v5090_v13 = vpack.c.bf16 %v2447_v10, %v2441_v60  ;;  %v5116_v14 = vpack.c.bf16 %v2584_v12, %v2578_v4  ;;  %v4186_v59 = vld [vmem:[%s7713_s13 + $0x108] sm:$0xff] }
 0x7ac   :  { %v2653_v15 = vpop.f32.mrb[64].mxu0  ;;  %5092 = vmatprep.subr.msk.bf16.mxu0 %vm6416_vm1, %v5090_v13  ;;  %5118 = vmatprep.subr.msk.bf16.mxu1 %vm6416_vm1, %v5116_v14  ;;  %v2735_v13 = vld [vmem:[%s7713_s13 + $0x58] sm:$0xff] }
 0x7ad   :  { %v2655_v16 = vpop.f32.mrb[65].mxu0  ;;  %5095 = vmatpush1.bf16.msk.msra.mxu0 %vm6416_vm1, %v5093_v8  ;;  %5121 = vmatpush1.bf16.msk.msra.mxu1 %vm6416_vm1, %v5119_v9  ;;  %v4187_v8 = vld [vmem:[%s7713_s13 + $0x110] sm:$0xff]  ;;  %v4188_v14 = vld [vmem:[%s7713_s13 + $0x118] sm:$0xff] }
 0x7b0   :  { %v2659_v18 = vpop.f32.mrb[66].mxu0  ;;  %4153 = vmatmul.mubr.msk.f32.vlgmr.msra.gmra.mrb[88].mxu0 %vm2760_vm14, %v2724_v57  ;;  %4203 = vmatmul.mubr.msk.f32.vlgmr.msra.gmra.mrb[44].mxu1 %vm2760_vm14, %v4177_v17  ;;  %v4189_v57 = vld [vmem:[%s7713_s13 + $0x120] sm:$0xff]  ;;  %v2737_v17 = vld [vmem:[%s7713_s13 + $0x68] sm:$0xff] }
 0x7b1   :  { %v5124_v19 = vpack.c.bf16 %v2659_v18, %v2653_v15  ;;  %v2661_v20 = vpop.f32.mrb[67].mxu0  ;;  %2909 = vmatprep.mubr.f32.mxu0 %v5493_v3  ;;  %3317 = vmatprep.mubr.f32.mxu1 %v5493_v3  ;;  %v4190_v18 = vld [vmem:[%s7713_s13 + $0x128] sm:$0xff] }
 0x7b2   :  { %v5122_v24 = vpack.c.bf16 %v2661_v20, %v2655_v16  ;;  %v2736_v16 = vld [vmem:[%s7713_s13 + $0x60] sm:$0xff]  ;;  %v2739_v20 = vld [vmem:[%s7713_s13 + $0x78] sm:$0xff] }
 0x7b4   :  { %v2665_v26 = vpop.f32.mrb[68].mxu0  ;;  %4154 = vmatmul.mubr.msk.f32.gmra.mrb[90].mxu0 %vm2760_vm14, %v2725_v21  ;;  %4204 = vmatmul.mubr.msk.f32.gmra.mrb[46].mxu1 %vm2760_vm14, %v4178_v22  ;;  %v4192_v21 = vld [vmem:[%s7713_s13 + $0x138] sm:$0xff]  ;;  %v2740_v22 = vld [vmem:[%s7713_s13 + $0x80] sm:$0xff] }
 0x7b5   :  { %5123 = vmatprep.subr.bf16.mxu1 %v5122_v24  ;;  %v2667_v27 = vpop.f32.mrb[69].mxu0  ;;  %2915 = vmatprep.mubr.f32.mxu0 %v5493_v3  ;;  %v4193_v24 = vld [vmem:[%s7713_s13 + $0x140] sm:$0xff] }
 0x7b6   :  { %5125 = vmatpush1.bf16.msra.mxu1 %v5124_v19  ;;  %3323 = vmatprep.mubr.f32.mxu1 %v5493_v3  ;;  %v4191_v19 = vld [vmem:[%s7713_s13 + $0x130] sm:$0xff] }
 0x7b8   :  { %v2671_v2 = vpop.f32.mrb[70].mxu0  ;;  %4155 = vmatmul.mubr.msk.f32.gmra.mrb[92].mxu0 %vm2760_vm14, %v2726_v48  ;;  %4205 = vmatmul.mubr.msk.f32.gmra.mrb[48].mxu1 %vm2760_vm14, %v4179_v25  ;;  %v2742_v48 = vld [vmem:[%s7713_s13 + $0x90] sm:$0xff] }
 0x7b9   :  { %v5128_v29 = vpack.c.bf16 %v2671_v2, %v2665_v26  ;;  %v2673_v30 = vpop.f32.mrb[71].mxu0  ;;  %2921 = vmatprep.mubr.f32.mxu0 %v5493_v3  ;;  %3329 = vmatprep.mubr.f32.mxu1 %v5493_v3  ;;  %v2741_v26 = vld [vmem:[%s7713_s13 + $0x88] sm:$0xff]  ;;  %v4195_v25 = vld [vmem:[%s7713_s13 + $0x150] sm:$0xff]  ;;  %v2743_v2 = vld [vmem:[%s7713_s13 + $0x98] sm:$0xff] }
 0x7ba   :  { %v5126_v37 = vpack.c.bf16 %v2673_v30, %v2667_v27  ;;  %v4194_v27 = vld [vmem:[%s7713_s13 + $0x148] sm:$0xff]  ;;  %v2744_v30 = vld [vmem:[%s7713_s13 + $0xa0] sm:$0xff] }
 0x7bc   :  { %v2677_v38 = vpop.f32.mrb[72].mxu0  ;;  %4156 = vmatmul.mubr.msk.f32.gmra.mrb[94].mxu0 %vm2760_vm14, %v2727_v31  ;;  %4206 = vmatmul.mubr.msk.f32.gmra.mrb[50].mxu1 %vm2760_vm14, %v4180_v32  ;;  %v4197_v31 = vld [vmem:[%s7713_s13 + $0x160] sm:$0xff]  ;;  %v2745_v32 = vld [vmem:[%s7713_s13 + $0xa8] sm:$0xff] }
 0x7bd   :  { %5127 = vmatprep.subr.bf16.mxu1 %v5126_v37  ;;  %v2679_v39 = vpop.f32.mrb[73].mxu0  ;;  %2927 = vmatprep.mubr.f32.mxu0 %v5493_v3  ;;  %v4198_v37 = vld [vmem:[%s7713_s13 + $0x168] sm:$0xff] }
 0x7be   :  { %5129 = vmatpush1.bf16.msra.mxu1 %v5128_v29  ;;  %3335 = vmatprep.mubr.f32.mxu1 %v5493_v3  ;;  %v4196_v29 = vld [vmem:[%s7713_s13 + $0x158] sm:$0xff] }
 0x7c0   :  { %v2683_v41 = vpop.f32.mrb[74].mxu0  ;;  %4157 = vmatmul.mubr.msk.f32.gmra.mrb[96].mxu0 %vm2760_vm14, %v2728_v40  ;;  %4207 = vmatmul.mubr.msk.f32.gmra.mrb[52].mxu1 %vm2760_vm14, %v4181_v5  ;;  %v2747_v40 = vld [vmem:[%s7713_s13 + $0xb8] sm:$0x3] }
 0x7c1   :  { %v5132_v43 = vpack.c.bf16 %v2683_v41, %v2677_v38  ;;  %v2685_v44 = vpop.f32.mrb[75].mxu0  ;;  %2933 = vmatprep.mubr.f32.mxu0 %v5493_v3  ;;  %3341 = vmatprep.mubr.f32.mxu1 %v5493_v3  ;;  %v2746_v38 = vld [vmem:[%s7713_s13 + $0xb0] sm:$0xff]  ;;  %v4200_v5 = vld [vmem:[%s7713_s13 + $0x178] sm:$0x3]  ;;  %v4227_v41 = vld [vmem:[%s7713_s13 + $0x180] sm:$0xff] }
 0x7c2   :  { %v5130_v49 = vpack.c.bf16 %v2685_v44, %v2679_v39  ;;  %v4199_v39 = vld [vmem:[%s7713_s13 + $0x170] sm:$0xff] }
 0x7c3   :  { %v4229_v44 = vld [vmem:[%s7713_s13 + $0x190] sm:$0xff] }
 0x7c4   :  { %v2689_v51 = vpop.f32.mrb[76].mxu0  ;;  %4158 = vmatmul.mubr.msk.f32.gmra.mrb[98].mxu0 %vm2760_vm14, %v2729_v46  ;;  %4208 = vmatmul.mubr.msk.f32.gmra.mrb[54].mxu1 %vm2760_vm14, %v4182_v47  ;;  %v4230_v46 = vld [vmem:[%s7713_s13 + $0x198] sm:$0xff]  ;;  %v4231_v47 = vld [vmem:[%s7713_s13 + $0x1a0] sm:$0xff] }
 0x7c5   :  { %5131 = vmatprep.subr.bf16.mxu1 %v5130_v49  ;;  %v2691_v52 = vpop.f32.mrb[77].mxu0  ;;  %2939 = vmatprep.mubr.f32.mxu0 %v5493_v3  ;;  %v4232_v49 = vld [vmem:[%s7713_s13 + $0x1a8] sm:$0xff] }
 0x7c6   :  { %5133 = vmatpush1.bf16.msra.mxu1 %v5132_v43  ;;  %3347 = vmatprep.mubr.f32.mxu1 %v5493_v3  ;;  %v4228_v43 = vld [vmem:[%s7713_s13 + $0x188] sm:$0xff] }
 0x7c8   :  { %v2695_v53 = vpop.f32.mrb[78].mxu0  ;;  %4159 = vmatmul.mubr.msk.f32.gmra.mrb[100].mxu0 %vm2760_vm14, %v2730_v50  ;;  %4209 = vmatmul.mubr.msk.f32.gmra.mrb[56].mxu1 %vm2760_vm14, %v4183_v11  ;;  %v4235_v50 = vld [vmem:[%s7713_s13 + $0x1c0] sm:$0xff]  ;;  %v4236_v11 = vld [vmem:[%s7713_s13 + $0x1c8] sm:$0xff] }
 0x7c9   :  { %v5136_v55 = vpack.c.bf16 %v2695_v53, %v2689_v51  ;;  %v2697_v56 = vpop.f32.mrb[79].mxu0  ;;  %2945 = vmatprep.mubr.f32.mxu0 %v5493_v3  ;;  %3353 = vmatprep.mubr.f32.mxu1 %v5493_v3  ;;  %v4233_v51 = vld [vmem:[%s7713_s13 + $0x1b0] sm:$0xff] }
 0x7ca   :  { %v5134_v62 = vpack.c.bf16 %v2697_v56, %v2691_v52  ;;  %v4234_v52 = vld [vmem:[%s7713_s13 + $0x1b8] sm:$0xff]  ;;  %v4237_v53 = vld [vmem:[%s7713_s13 + $0x1d0] sm:$0xff]  ;;  %v4239_v56 = vld [vmem:[%s7713_s13 + $0x1e0] sm:$0xff] }
 0x7cc   :  { %v2701_v23 = vpop.f32.mrb[80].mxu0  ;;  %4160 = vmatmul.mubr.msk.f32.gmra.mrb[102].mxu0 %vm2760_vm14, %v2731_v58  ;;  %4210 = vmatmul.mubr.msk.f32.gmra.mrb[58].mxu1 %vm2760_vm14, %v4184_v61  ;;  %v4240_v58 = vld [vmem:[%s7713_s13 + $0x1e8] sm:$0xff]  ;;  %v4241_v61 = vld [vmem:[%s7713_s13 + $0x1f0] sm:$0xff] }
 0x7cd   :  { %5135 = vmatprep.subr.bf16.mxu1 %v5134_v62  ;;  %v2703_v63 = vpop.f32.mrb[81].mxu0  ;;  %2951 = vmatprep.mubr.f32.mxu0 %v5493_v3  ;;  %v4242_v62 = vld [vmem:[%s7713_s13 + $0x1f8] sm:$0xff] }
 0x7ce   :  { %5137 = vmatpush1.bf16.msra.mxu1 %v5136_v55  ;;  %3359 = vmatprep.mubr.f32.mxu1 %v5493_v3  ;;  %v4238_v55 = vld [vmem:[%s7713_s13 + $0x1d8] sm:$0xff] }
 0x7d0   :  { %v2707_v1 = vpop.f32.mrb[82].mxu0  ;;  %4161 = vmatmul.mubr.msk.f32.gmra.mrb[104].mxu0 %vm2760_vm14, %v2732_v0  ;;  %4211 = vmatmul.mubr.msk.f32.gmra.mrb[60].mxu1 %vm2760_vm14, %v4185_v42  ;;  %v4245_v0 = vld [vmem:[%s7713_s13 + $0x210] sm:$0xff]  ;;  %v4246_v42 = vld [vmem:[%s7713_s13 + $0x218] sm:$0xff] }
 0x7d1   :  { %v5140_v54 = vpack.c.bf16 %v2707_v1, %v2701_v23  ;;  %v2709_v28 = vpop.f32.mrb[83].mxu0  ;;  %2957 = vmatprep.mubr.f32.mxu0 %v5493_v3  ;;  %3365 = vmatprep.mubr.f32.mxu1 %v5493_v3  ;;  %v4243_v23 = vld [vmem:[%s7713_s13 + $0x200] sm:$0xff] }
 0x7d2   :  { %v5138_v60 = vpack.c.bf16 %v2709_v28, %v2703_v63  ;;  %v4244_v63 = vld [vmem:[%s7713_s13 + $0x208] sm:$0xff]  ;;  %v4247_v1 = vld [vmem:[%s7713_s13 + $0x220] sm:$0xff]  ;;  %v4249_v28 = vld [vmem:[%s7713_s13 + $0x230] sm:$0xff] }
 0x7d4   :  { %v2713_v4 = vpop.f32.mrb[84].mxu0  ;;  %4162 = vmatmul.mubr.msk.f32.gmra.mrb[106].mxu0 %vm2760_vm14, %v2733_v45  ;;  %4212 = vmatmul.mubr.msk.f32.gmra.mrb[62].mxu1 %vm2760_vm14, %v4186_v59  ;;  %v4250_v45 = vld [vmem:[%s7713_s13 + $0x238] sm:$0x3] }
 0x7d5   :  { %5139 = vmatprep.subr.bf16.mxu1 %v5138_v60  ;;  %v2715_v6 = vpop.f32.mrb[85].mxu0  ;;  %2963 = vmatprep.mubr.f32.mxu0 %v5493_v3 }
 0x7d6   :  { %5141 = vmatpush1.bf16.msra.mxu1 %v5140_v54  ;;  %3371 = vmatprep.mubr.f32.mxu1 %v5493_v3  ;;  %v4248_v54 = vld [vmem:[%s7713_s13 + $0x228] sm:$0xff] }
 0x7d8   :  { %v2719_v9 = vpop.f32.mrb[86].mxu0  ;;  %4163 = vmatmul.mubr.msk.f32.gmra.mrb[108].mxu0 %vm2760_vm14, %v2734_v7  ;;  %4213 = vmatmul.mubr.msk.f32.gmra.mrb[64].mxu1 %vm2760_vm14, %v4187_v8 }
 0x7d9   :  { %v5145_v10 = vpack.c.bf16 %v2719_v9, %v2713_v4  ;;  %v2721_v12 = vpop.f32.mrb[87].mxu0  ;;  %2969 = vmatprep.mubr.f32.mxu0 %v5493_v3  ;;  %3377 = vmatprep.mubr.f32.mxu1 %v5493_v3 }
 0x7da   :  { %v5142_v15 = vpack.c.bf16 %v2721_v12, %v2715_v6 }
 0x7dc   :  { %4164 = vmatmul.mubr.msk.f32.gmra.mrb[110].mxu0 %vm2760_vm14, %v2735_v13  ;;  %4214 = vmatmul.mubr.msk.f32.gmra.mrb[66].mxu1 %vm2760_vm14, %v4188_v14 }
 0x7dd   :  { %5144 = vmatprep.subr.msk.bf16.mxu1 %vm6416_vm1, %v5142_v15  ;;  %2975 = vmatprep.mubr.f32.mxu0 %v5493_v3 }
 0x7de   :  { %5147 = vmatpush1.bf16.msk.msra.mxu1 %vm6416_vm1, %v5145_v10  ;;  %3383 = vmatprep.mubr.f32.mxu1 %v5493_v3 }
 0x7e0   :  { %4165 = vmatmul.mubr.msk.f32.gmra.mrb[112].mxu0 %vm2760_vm14, %v2736_v16  ;;  %4215 = vmatmul.mubr.msk.f32.gmra.mrb[68].mxu1 %vm2760_vm14, %v4189_v57 }
 0x7e1   :  { %2981 = vmatprep.mubr.f32.mxu0 %v5493_v3  ;;  %3389 = vmatprep.mubr.f32.mxu1 %v5493_v3 }
 0x7e4   :  { %4166 = vmatmul.mubr.msk.f32.gmra.mrb[114].mxu0 %vm2760_vm14, %v2737_v17  ;;  %4216 = vmatmul.mubr.msk.f32.gmra.mrb[70].mxu1 %vm2760_vm14, %v4190_v18 }
 0x7e5   :  { %2987 = vmatprep.mubr.f32.mxu0 %v5493_v3  ;;  %3395 = vmatprep.mubr.f32.mxu1 %v5493_v3 }
 0x7e8   :  { %4167 = vmatmul.mubr.msk.f32.gmra.mrb[116].mxu0 %vm2760_vm14, %v2738_v35  ;;  %4217 = vmatmul.mubr.msk.f32.gmra.mrb[72].mxu1 %vm2760_vm14, %v4191_v19 }
 0x7e9   :  { %2993 = vmatprep.mubr.f32.mxu0 %v5493_v3  ;;  %3401 = vmatprep.mubr.f32.mxu1 %v5493_v3 }
 0x7ec   :  { %4168 = vmatmul.mubr.msk.f32.gmra.mrb[118].mxu0 %vm2760_vm14, %v2739_v20  ;;  %4218 = vmatmul.mubr.msk.f32.gmra.mrb[74].mxu1 %vm2760_vm14, %v4192_v21 }
 0x7ed   :  { %2999 = vmatprep.mubr.f32.mxu0 %v5493_v3  ;;  %3407 = vmatprep.mubr.f32.mxu1 %v5493_v3 }
 0x7f0   :  { %4169 = vmatmul.mubr.msk.f32.gmra.mrb[120].mxu0 %vm2760_vm14, %v2740_v22  ;;  %4219 = vmatmul.mubr.msk.f32.gmra.mrb[76].mxu1 %vm2760_vm14, %v4193_v24 }
 0x7f1   :  { %3005 = vmatprep.mubr.f32.mxu0 %v5493_v3  ;;  %3413 = vmatprep.mubr.f32.mxu1 %v5493_v3 }
 0x7f4   :  { %4170 = vmatmul.mubr.msk.f32.gmra.mrb[122].mxu0 %vm2760_vm14, %v2741_v26  ;;  %4220 = vmatmul.mubr.msk.f32.gmra.mrb[78].mxu1 %vm2760_vm14, %v4194_v27 }
 0x7f5   :  { %3011 = vmatprep.mubr.f32.mxu0 %v5493_v3  ;;  %3419 = vmatprep.mubr.f32.mxu1 %v5493_v3 }
 0x7f8   :  { %4171 = vmatmul.mubr.msk.f32.gmra.mrb[124].mxu0 %vm2760_vm14, %v2742_v48  ;;  %4221 = vmatmul.mubr.msk.f32.gmra.mrb[80].mxu1 %vm2760_vm14, %v4195_v25 }
 0x7f9   :  { %3017 = vmatprep.mubr.f32.mxu0 %v5493_v3  ;;  %3425 = vmatprep.mubr.f32.mxu1 %v5493_v3 }
 0x7fc   :  { %4172 = vmatmul.mubr.msk.f32.gmra.mrb[126].mxu0 %vm2760_vm14, %v2743_v2  ;;  %4222 = vmatmul.mubr.msk.f32.gmra.mrb[82].mxu1 %vm2760_vm14, %v4196_v29 }
 0x7fd   :  { %3023 = vmatprep.mubr.f32.mxu0 %v5493_v3  ;;  %3431 = vmatprep.mubr.f32.mxu1 %v5493_v3 }
 0x800   :  { %4173 = vmatmul.mubr.msk.f32.gmra.mrb[128].mxu0 %vm2760_vm14, %v2744_v30  ;;  %4223 = vmatmul.mubr.msk.f32.gmra.mrb[84].mxu1 %vm2760_vm14, %v4197_v31 }
 0x801   :  { %3029 = vmatprep.mubr.f32.mxu0 %v5493_v3  ;;  %3437 = vmatprep.mubr.f32.mxu1 %v5493_v3 }
 0x804   :  { %4174 = vmatmul.mubr.msk.f32.gmra.mrb[130].mxu0 %vm2760_vm14, %v2745_v32  ;;  %4224 = vmatmul.mubr.msk.f32.gmra.mrb[86].mxu1 %vm2760_vm14, %v4198_v37 }
 0x805   :  { %3035 = vmatprep.mubr.f32.mxu0 %v5493_v3  ;;  %3443 = vmatprep.mubr.f32.mxu1 %v5493_v3 }
 0x808   :  { %4175 = vmatmul.mubr.msk.f32.gmra.mrb[132].mxu0 %vm2760_vm14, %v2746_v38  ;;  %4225 = vmatmul.mubr.msk.f32.gmra.mrb[88].mxu1 %vm2760_vm14, %v4199_v39 }
 0x809   :  { %3041 = vmatprep.mubr.f32.mxu0 %v5493_v3  ;;  %3449 = vmatprep.mubr.f32.mxu1 %v5493_v3 }
 0x80c   :  { %4176 = vmatmul.mubr.msk.f32.gmra.mrb[134].mxu0 %vm2760_vm14, %v2747_v40  ;;  %4226 = vmatmul.mubr.msk.f32.gmra.mrb[90].mxu1 %vm2760_vm14, %v4200_v5 }
 0x80d   :  { %3767 = vmatprep.mubr.f32.mxu1 %v5493_v3 }
 0x810   :  { %4253 = vmatmul.mubr.msk.f32.vlgmr.msra.gmra.mrb[44].mxu1 %vm2760_vm14, %v4227_v41 }
 0x811   :  { %3773 = vmatprep.mubr.f32.mxu1 %v5493_v3 }
 0x814   :  { %4254 = vmatmul.mubr.msk.f32.gmra.mrb[46].mxu1 %vm2760_vm14, %v4228_v43 }
 0x815   :  { %3779 = vmatprep.mubr.f32.mxu1 %v5493_v3 }
 0x818   :  { %4255 = vmatmul.mubr.msk.f32.gmra.mrb[48].mxu1 %vm2760_vm14, %v4229_v44 }
 0x819   :  { %3785 = vmatprep.mubr.f32.mxu1 %v5493_v3 }
 0x81c   :  { %4256 = vmatmul.mubr.msk.f32.gmra.mrb[50].mxu1 %vm2760_vm14, %v4230_v46 }
 0x81d   :  { %3791 = vmatprep.mubr.f32.mxu1 %v5493_v3 }
 0x820   :  { %4257 = vmatmul.mubr.msk.f32.gmra.mrb[52].mxu1 %vm2760_vm14, %v4231_v47 }
 0x821   :  { %3797 = vmatprep.mubr.f32.mxu1 %v5493_v3 }
 0x824   :  { %4258 = vmatmul.mubr.msk.f32.gmra.mrb[54].mxu1 %vm2760_vm14, %v4232_v49 }
 0x825   :  { %3803 = vmatprep.mubr.f32.mxu1 %v5493_v3 }
 0x828   :  { %4259 = vmatmul.mubr.msk.f32.gmra.mrb[56].mxu1 %vm2760_vm14, %v4233_v51 }
 0x829   :  { %3809 = vmatprep.mubr.f32.mxu1 %v5493_v3 }
 0x82c   :  { %4260 = vmatmul.mubr.msk.f32.gmra.mrb[58].mxu1 %vm2760_vm14, %v4234_v52  ;;  %v2748_v52 = vld [vmem:[%s7714_s14] sm:$0x3] }
 0x82d   :  { %3815 = vmatprep.mubr.f32.mxu1 %v5493_v3 }
 0x830   :  { %4261 = vmatmul.mubr.msk.f32.gmra.mrb[60].mxu1 %vm2760_vm14, %v4235_v50 }
 0x831   :  { %3821 = vmatprep.mubr.f32.mxu1 %v5493_v3 }
 0x834   :  { %4262 = vmatmul.mubr.msk.f32.gmra.mrb[62].mxu1 %vm2760_vm14, %v4236_v11 }
 0x835   :  { %3827 = vmatprep.mubr.f32.mxu1 %v5493_v3 }
 0x838   :  { %4263 = vmatmul.mubr.msk.f32.gmra.mrb[64].mxu1 %vm2760_vm14, %v4237_v53  ;;  %v7434_v53 = vrot.slane %v2748_v52, %v63_v36 }
 0x839   :  { %3833 = vmatprep.mubr.f32.mxu1 %v5493_v3 }
 0x83c   :  { %4264 = vmatmul.mubr.msk.f32.gmra.mrb[66].mxu1 %vm2760_vm14, %v4238_v55  ;;  %v7438_v55 = vrot.slane %v2748_v52, %v67_v34 }
 0x83d   :  { %3839 = vmatprep.mubr.f32.mxu1 %v5493_v3 }
 0x840   :  { %4265 = vmatmul.mubr.msk.f32.gmra.mrb[68].mxu1 %vm2760_vm14, %v4239_v56 }
 0x841   :  { %3845 = vmatprep.mubr.f32.mxu1 %v5493_v3 }
 0x844   :  { %4266 = vmatmul.mubr.msk.f32.gmra.mrb[70].mxu1 %vm2760_vm14, %v4240_v58 }
 0x845   :  { %3851 = vmatprep.mubr.f32.mxu1 %v5493_v3 }
 0x848   :  { %4267 = vmatmul.mubr.msk.f32.gmra.mrb[72].mxu1 %vm2760_vm14, %v4241_v61 }
 0x849   :  { %3857 = vmatprep.mubr.f32.mxu1 %v5493_v3 }
 0x84c   :  { %4268 = vmatmul.mubr.msk.f32.gmra.mrb[74].mxu1 %vm2760_vm14, %v4242_v62 }
 0x84d   :  { %3863 = vmatprep.mubr.f32.mxu1 %v5493_v3 }
 0x850   :  { %4269 = vmatmul.mubr.msk.f32.gmra.mrb[76].mxu1 %vm2760_vm14, %v4243_v23 }
 0x851   :  { %3869 = vmatprep.mubr.f32.mxu1 %v5493_v3 }
 0x854   :  { %4270 = vmatmul.mubr.msk.f32.gmra.mrb[78].mxu1 %vm2760_vm14, %v4244_v63 }
 0x855   :  { %3875 = vmatprep.mubr.f32.mxu1 %v5493_v3 }
 0x858   :  { %4271 = vmatmul.mubr.msk.f32.gmra.mrb[80].mxu1 %vm2760_vm14, %v4245_v0 }
 0x859   :  { %3881 = vmatprep.mubr.f32.mxu1 %v5493_v3 }
 0x85c   :  { %4272 = vmatmul.mubr.msk.f32.gmra.mrb[82].mxu1 %vm2760_vm14, %v4246_v42 }
 0x85d   :  { %3887 = vmatprep.mubr.f32.mxu1 %v5493_v3 }
 0x860   :  { %4273 = vmatmul.mubr.msk.f32.gmra.mrb[84].mxu1 %vm2760_vm14, %v4247_v1 }
 0x861   :  { %3893 = vmatprep.mubr.f32.mxu1 %v5493_v3 }
 0x864   :  { %4274 = vmatmul.mubr.msk.f32.gmra.mrb[86].mxu1 %vm2760_vm14, %v4248_v54 }
 0x865   :  { %3899 = vmatprep.mubr.f32.mxu1 %v5493_v3 }
 0x868   :  { %4275 = vmatmul.mubr.msk.f32.gmra.mrb[88].mxu1 %vm2760_vm14, %v4249_v28 }
 0x869   :  { %3905 = vmatprep.mubr.f32.mxu1 %v5493_v3 }
 0x86c   :  { %4276 = vmatmul.mubr.msk.f32.gmra.mrb[92].mxu1 %vm2760_vm14, %v4250_v45 }
 0x883   :  { %v2905_v59 = vpop.f32.mrb[88].mxu0 }
 0x884   :  { %v2907_v60 = vpop.f32.mrb[89].mxu0  ;;  %v2906_v0 = vadd.f32 %v2905_v59, %v7434_v53 }
 0x885   :  { %v2908_v36 = vadd.f32 %v2907_v60, %v7438_v55 }
 0x887   :  { %v7341_v4 = vpop.f32.mrb[90].mxu0 }
 0x888   :  { %v7343_v6 = vpop.f32.mrb[91].mxu0  ;;  %v2912_v54 = vadd.f32 %v7341_v4, %v7434_v53 }
 0x889   :  { %v2914_v28 = vadd.f32 %v7343_v6, %v7438_v55 }
 0x88b   :  { %v7345_v7 = vpop.f32.mrb[92].mxu0 }
 0x88c   :  { %v7347_v8 = vpop.f32.mrb[93].mxu0  ;;  %v2918_v4 = vadd.f32 %v7345_v7, %v7434_v53 }
 0x88f   :  { %v7349_v9 = vpop.f32.mrb[94].mxu0 }
 0x890   :  { %v7351_v10 = vpop.f32.mrb[95].mxu0 }
 0x893   :  { %v7353_v3 = vpop.f32.mrb[96].mxu0 }
 0x894   :  { %v7355_v12 = vpop.f32.mrb[97].mxu0 }
 0x897   :  { %v7357_v13 = vpop.f32.mrb[98].mxu0 }
 0x898   :  { %v7359_v14 = vpop.f32.mrb[99].mxu0 }
 0x89b   :  { %v7361_v15 = vpop.f32.mrb[100].mxu0 }
 0x89c   :  { %v7363_v16 = vpop.f32.mrb[101].mxu0 }
 0x89f   :  { %v7365_v57 = vpop.f32.mrb[102].mxu0 }
 0x8a0   :  { %v7367_v17 = vpop.f32.mrb[103].mxu0 }
 0x8a3   :  { %v7369_v18 = vpop.f32.mrb[104].mxu0 }
 0x8a4   :  { %v7371_v35 = vpop.f32.mrb[105].mxu0 }
 0x8a7   :  { %v7373_v19 = vpop.f32.mrb[106].mxu0 }
 0x8a8   :  { %v7375_v20 = vpop.f32.mrb[107].mxu0 }
 0x8ab   :  { %v7377_v21 = vpop.f32.mrb[108].mxu0 }
 0x8ac   :  { %v7379_v22 = vpop.f32.mrb[109].mxu0 }
 0x8af   :  { %v7381_v24 = vpop.f32.mrb[110].mxu0 }
 0x8b0   :  { %v7383_v26 = vpop.f32.mrb[111].mxu0 }
 0x8b3   :  { %v7385_v27 = vpop.f32.mrb[112].mxu0 }
 0x8b4   :  { %v7387_v48 = vpop.f32.mrb[113].mxu0 }
 0x8b7   :  { %v7389_v25 = vpop.f32.mrb[114].mxu0 }
 0x8b8   :  { %v7391_v2 = vpop.f32.mrb[115].mxu0 }
 0x8bb   :  { %v7393_v29 = vpop.f32.mrb[116].mxu0 }
 0x8bc   :  { %v7395_v30 = vpop.f32.mrb[117].mxu0 }
 0x8bf   :  { %v7397_v31 = vpop.f32.mrb[118].mxu0 }
 0x8c0   :  { %v7399_v32 = vpop.f32.mrb[119].mxu0 }
 0x8c3   :  { %v7401_v37 = vpop.f32.mrb[120].mxu0 }
 0x8c4   :  { %v7403_v38 = vpop.f32.mrb[121].mxu0 }
 0x8c7   :  { %v7405_v39 = vpop.f32.mrb[122].mxu0 }
 0x8c8   :  { %v7407_v40 = vpop.f32.mrb[123].mxu0 }
 0x8cb   :  { %v7409_v5 = vpop.f32.mrb[124].mxu0 }
 0x8cc   :  { %v7411_v41 = vpop.f32.mrb[125].mxu0 }
 0x8cf   :  { %v7413_v43 = vpop.f32.mrb[126].mxu0 }
 0x8d0   :  { %v7415_v44 = vpop.f32.mrb[127].mxu0 }
 0x8d3   :  { %v7417_v46 = vpop.f32.mrb[128].mxu0 }
 0x8d4   :  { %v7419_v47 = vpop.f32.mrb[129].mxu0 }
 0x8d7   :  { %v7421_v49 = vpop.f32.mrb[130].mxu0 }
 0x8d8   :  { %v7423_v51 = vpop.f32.mrb[131].mxu0 }
 0x8db   :  { %v7428_v50 = vpop.f32.mrb[132].mxu0 }
 0x8dc   :  { %v7430_v11 = vpop.f32.mrb[133].mxu0 }
 0x8df   :  { %v3043_v56 = vpop.f32.mrb[134].mxu0  ;;  %v3451_v58 = vpop.f32.mrb[90].mxu1 }
 0x8e0   :  { %v3044_v61 = vadd.f32 %v3043_v56, %v7434_v53  ;;  %v3045_v62 = vpop.f32.mrb[135].mxu0  ;;  %v3453_v23 = vpop.f32.mrb[91].mxu1 }
 0x8e1   :  { %v3046_v63 = vadd.f32 %v3045_v62, %v7438_v55  ;;  %v2920_v62 = vadd.f32 %v7347_v8, %v7438_v55  ;;  %v2924_v8 = vadd.f32 %v7349_v9, %v7434_v53  ;;  %v2932_v9 = vadd.f32 %v7355_v12, %v7438_v55 }
 0x8e2   :  { %3094 = vst [vmem:[%s7715_s15 + $0x170] sm:$0x3] %v3044_v61 }
 0x8e3   :  { %3095 = vst [vmem:[%s7715_s15 + $0x178] sm:$0x3] %v3046_v63  ;;  %v3769_v33 = vpop.f32.mrb[44].mxu1 }
 0x8e4   :  { %v5172_v34 = vadd.f32 %v3769_v33, %v2906_v0  ;;  %v3771_v42 = vpop.f32.mrb[45].mxu1 }
 0x8e5   :  { %v5176_v1 = vadd.f32 %v3771_v42, %v2908_v36 }
 0x8e6   :  { %3960 = vst [vmem:[%s7715_s15] sm:$0xff] %v5172_v34 }
 0x8e7   :  { %3961 = vst [vmem:[%s7715_s15 + $0x8] sm:$0xff] %v5176_v1  ;;  %v3775_v45 = vpop.f32.mrb[46].mxu1 }
 0x8e8   :  { %v5180_v59 = vadd.f32 %v3775_v45, %v2912_v54  ;;  %v3777_v60 = vpop.f32.mrb[47].mxu1  ;;  %v2930_v54 = vadd.f32 %v7353_v3, %v7434_v53  ;;  %v2938_v3 = vadd.f32 %v7359_v14, %v7438_v55 }
 0x8e9   :  { %v3142_v52 = vld [vmem:[%s7715_s15 + $0x170] sm:$0x3]  ;;  %v5184_v56 = vadd.f32 %v3777_v60, %v2914_v28  ;;  %v2936_v60 = vadd.f32 %v7357_v13, %v7434_v53  ;;  %v2944_v13 = vadd.f32 %v7363_v16, %v7438_v55 }
 0x8ea   :  { %v3502_v61 = vadd.f32 %v3451_v58, %v3142_v52  ;;  %v3143_v6 = vld [vmem:[%s7715_s15 + $0x178] sm:$0x3]  ;;  %3962 = vst [vmem:[%s7715_s15 + $0x10] sm:$0xff] %v5180_v59 }
 0x8eb   :  { %v3503_v63 = vadd.f32 %v3453_v23, %v3143_v6  ;;  %3963 = vst [vmem:[%s7715_s15 + $0x18] sm:$0xff] %v5184_v56  ;;  %v3781_v0 = vpop.f32.mrb[48].mxu1  ;;  %v2926_v23 = vadd.f32 %v7351_v10, %v7438_v55 }
 0x8ec   :  { %3550 = vst [vmem:[%s7715_s15 + $0x170] sm:$0x3] %v3502_v61  ;;  %v5188_v7 = vadd.f32 %v3781_v0, %v2918_v4  ;;  %v3783_v58 = vpop.f32.mrb[49].mxu1  ;;  %v2942_v61 = vadd.f32 %v7361_v15, %v7434_v53  ;;  %v2948_v0 = vadd.f32 %v7365_v57, %v7434_v53  ;;  %v2950_v15 = vadd.f32 %v7367_v17, %v7438_v55 }
 0x8ed   :  { %3551 = vst [vmem:[%s7715_s15 + $0x178] sm:$0x3] %v3503_v63  ;;  %v5192_v36 = vadd.f32 %v3783_v58, %v2920_v62  ;;  %v2956_v57 = vadd.f32 %v7371_v35, %v7438_v55 }
 0x8ee   :  { %3964 = vst [vmem:[%s7715_s15 + $0x20] sm:$0xff] %v5188_v7 }
 0x8ef   :  { %3965 = vst [vmem:[%s7715_s15 + $0x28] sm:$0xff] %v5192_v36  ;;  %v3787_v33 = vpop.f32.mrb[50].mxu1 }
 0x8f0   :  { %v5196_v34 = vadd.f32 %v3787_v33, %v2924_v8  ;;  %v3789_v42 = vpop.f32.mrb[51].mxu1  ;;  %v2954_v8 = vadd.f32 %v7369_v18, %v7434_v53  ;;  %v2962_v18 = vadd.f32 %v7375_v20, %v7438_v55 }
 0x8f1   :  { %v5200_v1 = vadd.f32 %v3789_v42, %v2926_v23  ;;  %v2960_v42 = vadd.f32 %v7373_v19, %v7434_v53  ;;  %v2968_v19 = vadd.f32 %v7379_v22, %v7438_v55 }
 0x8f2   :  { %3966 = vst [vmem:[%s7715_s15 + $0x30] sm:$0xff] %v5196_v34 }
 0x8f3   :  { %3967 = vst [vmem:[%s7715_s15 + $0x38] sm:$0xff] %v5200_v1  ;;  %v3793_v10 = vpop.f32.mrb[52].mxu1 }
 0x8f4   :  { %v5204_v28 = vadd.f32 %v3793_v10, %v2930_v54  ;;  %v3795_v45 = vpop.f32.mrb[53].mxu1  ;;  %v2966_v10 = vadd.f32 %v7377_v21, %v7434_v53  ;;  %v2974_v21 = vadd.f32 %v7383_v26, %v7438_v55 }
 0x8f5   :  { %v5208_v59 = vadd.f32 %v3795_v45, %v2932_v9 }
 0x8f6   :  { %3968 = vst [vmem:[%s7715_s15 + $0x40] sm:$0xff] %v5204_v28 }
 0x8f7   :  { %3969 = vst [vmem:[%s7715_s15 + $0x48] sm:$0xff] %v5208_v59  ;;  %v3799_v12 = vpop.f32.mrb[54].mxu1 }
 0x8f8   :  { %v5212_v52 = vadd.f32 %v3799_v12, %v2936_v60  ;;  %v3801_v56 = vpop.f32.mrb[55].mxu1  ;;  %v2972_v60 = vadd.f32 %v7381_v24, %v7434_v53  ;;  %v2980_v24 = vadd.f32 %v7387_v48, %v7438_v55 }
 0x8f9   :  { %v5216_v4 = vadd.f32 %v3801_v56, %v2938_v3  ;;  %v2978_v56 = vadd.f32 %v7385_v27, %v7434_v53  ;;  %v2986_v27 = vadd.f32 %v7391_v2, %v7438_v55 }
 0x8fa   :  { %3970 = vst [vmem:[%s7715_s15 + $0x50] sm:$0xff] %v5212_v52 }
 0x8fb   :  { %3971 = vst [vmem:[%s7715_s15 + $0x58] sm:$0xff] %v5216_v4  ;;  %v3805_v14 = vpop.f32.mrb[56].mxu1 }
 0x8fc   :  { %v5220_v6 = vadd.f32 %v3805_v14, %v2942_v61  ;;  %v3807_v62 = vpop.f32.mrb[57].mxu1  ;;  %v2984_v14 = vadd.f32 %v7389_v25, %v7434_v53  ;;  %v2992_v25 = vadd.f32 %v7395_v30, %v7438_v55 }
 0x8fd   :  { %v5224_v63 = vadd.f32 %v3807_v62, %v2944_v13 }
 0x8fe   :  { %3972 = vst [vmem:[%s7715_s15 + $0x60] sm:$0xff] %v5220_v6 }
 0x8ff   :  { %3973 = vst [vmem:[%s7715_s15 + $0x68] sm:$0xff] %v5224_v63  ;;  %v3811_v16 = vpop.f32.mrb[58].mxu1 }
 0x900   :  { %v5228_v7 = vadd.f32 %v3811_v16, %v2948_v0  ;;  %v3813_v58 = vpop.f32.mrb[59].mxu1  ;;  %v2990_v0 = vadd.f32 %v7393_v29, %v7434_v53  ;;  %v2998_v29 = vadd.f32 %v7399_v32, %v7438_v55 }
 0x901   :  { %v5232_v36 = vadd.f32 %v3813_v58, %v2950_v15  ;;  %v2996_v58 = vadd.f32 %v7397_v31, %v7434_v53  ;;  %v3004_v31 = vadd.f32 %v7403_v38, %v7438_v55 }
 0x902   :  { %3974 = vst [vmem:[%s7715_s15 + $0x70] sm:$0xff] %v5228_v7 }
 0x903   :  { %3975 = vst [vmem:[%s7715_s15 + $0x78] sm:$0xff] %v5232_v36  ;;  %v3817_v17 = vpop.f32.mrb[60].mxu1 }
 0x904   :  { %v5236_v23 = vadd.f32 %v3817_v17, %v2954_v8  ;;  %v3819_v33 = vpop.f32.mrb[61].mxu1  ;;  %v3002_v17 = vadd.f32 %v7401_v37, %v7434_v53  ;;  %v3010_v37 = vadd.f32 %v7407_v40, %v7438_v55 }
 0x905   :  { %v5240_v34 = vadd.f32 %v3819_v33, %v2956_v57 }
 0x906   :  { %3976 = vst [vmem:[%s7715_s15 + $0x80] sm:$0xff] %v5236_v23 }
 0x907   :  { %3977 = vst [vmem:[%s7715_s15 + $0x88] sm:$0xff] %v5240_v34  ;;  %v3823_v35 = vpop.f32.mrb[62].mxu1 }
 0x908   :  { %v5244_v1 = vadd.f32 %v3823_v35, %v2960_v42  ;;  %v3825_v54 = vpop.f32.mrb[63].mxu1  ;;  %v3008_v42 = vadd.f32 %v7405_v39, %v7434_v53  ;;  %v3016_v39 = vadd.f32 %v7411_v41, %v7438_v55 }
 0x909   :  { %v5248_v9 = vadd.f32 %v3825_v54, %v2962_v18  ;;  %v3014_v54 = vadd.f32 %v7409_v5, %v7434_v53  ;;  %v3022_v5 = vadd.f32 %v7415_v44, %v7438_v55 }
 0x90a   :  { %3978 = vst [vmem:[%s7715_s15 + $0x90] sm:$0xff] %v5244_v1 }
 0x90b   :  { %3979 = vst [vmem:[%s7715_s15 + $0x98] sm:$0xff] %v5248_v9  ;;  %v3829_v20 = vpop.f32.mrb[64].mxu1 }
 0x90c   :  { %v5252_v28 = vadd.f32 %v3829_v20, %v2966_v10  ;;  %v3831_v45 = vpop.f32.mrb[65].mxu1  ;;  %v3020_v20 = vadd.f32 %v7413_v43, %v7434_v53  ;;  %v3028_v43 = vadd.f32 %v7419_v47, %v7438_v55 }
 0x90d   :  { %v5256_v59 = vadd.f32 %v3831_v45, %v2968_v19 }
 0x90e   :  { %3980 = vst [vmem:[%s7715_s15 + $0xa0] sm:$0xff] %v5252_v28 }
 0x90f   :  { %3981 = vst [vmem:[%s7715_s15 + $0xa8] sm:$0xff] %v5256_v59  ;;  %v3835_v22 = vpop.f32.mrb[66].mxu1 }
 0x910   :  { %v5260_v3 = vadd.f32 %v3835_v22, %v2972_v60  ;;  %v3837_v12 = vpop.f32.mrb[67].mxu1  ;;  %v3026_v60 = vadd.f32 %v7417_v46, %v7434_v53  ;;  %v3034_v46 = vadd.f32 %v7423_v51, %v7438_v55 }
 0x911   :  { %v5264_v52 = vadd.f32 %v3837_v12, %v2974_v21  ;;  %v3032_v12 = vadd.f32 %v7421_v49, %v7434_v53  ;;  %v3040_v49 = vadd.f32 %v7430_v11, %v7438_v55  ;;  %v3599_v55 = vld [vmem:[%s7715_s15 + $0x178] sm:$0x3] }
 0x912   :  { %3982 = vst [vmem:[%s7715_s15 + $0xb0] sm:$0xff] %v5260_v3 }
 0x913   :  { %3983 = vst [vmem:[%s7715_s15 + $0xb8] sm:$0xff] %v5264_v52  ;;  %v3841_v26 = vpop.f32.mrb[68].mxu1 }
 0x914   :  { %v5268_v4 = vadd.f32 %v3841_v26, %v2978_v56  ;;  %v3843_v61 = vpop.f32.mrb[69].mxu1  ;;  %v3038_v26 = vadd.f32 %v7428_v50, %v7434_v53  ;;  %v3598_v50 = vld [vmem:[%s7715_s15 + $0x170] sm:$0x3] }
 0x915   :  { %v5272_v13 = vadd.f32 %v3843_v61, %v2980_v24 }
 0x916   :  { %3984 = vst [vmem:[%s7715_s15 + $0xc0] sm:$0xff] %v5268_v4 }
 0x917   :  { %3985 = vst [vmem:[%s7715_s15 + $0xc8] sm:$0xff] %v5272_v13  ;;  %v3847_v48 = vpop.f32.mrb[70].mxu1 }
 0x918   :  { %v5276_v6 = vadd.f32 %v3847_v48, %v2984_v14  ;;  %v3849_v62 = vpop.f32.mrb[71].mxu1 }
 0x919   :  { %v5280_v63 = vadd.f32 %v3849_v62, %v2986_v27 }
 0x91a   :  { %3986 = vst [vmem:[%s7715_s15 + $0xd0] sm:$0xff] %v5276_v6 }
 0x91b   :  { %3987 = vst [vmem:[%s7715_s15 + $0xd8] sm:$0xff] %v5280_v63  ;;  %v3853_v2 = vpop.f32.mrb[72].mxu1 }
 0x91c   :  { %v5284_v15 = vadd.f32 %v3853_v2, %v2990_v0  ;;  %v3855_v16 = vpop.f32.mrb[73].mxu1 }
 0x91d   :  { %v5288_v7 = vadd.f32 %v3855_v16, %v2992_v25 }
 0x91e   :  { %3988 = vst [vmem:[%s7715_s15 + $0xe0] sm:$0xff] %v5284_v15 }
 0x91f   :  { %3989 = vst [vmem:[%s7715_s15 + $0xe8] sm:$0xff] %v5288_v7  ;;  %v3859_v30 = vpop.f32.mrb[74].mxu1 }
 0x920   :  { %v5292_v36 = vadd.f32 %v3859_v30, %v2996_v58  ;;  %v3861_v8 = vpop.f32.mrb[75].mxu1 }
 0x921   :  { %v5296_v57 = vadd.f32 %v3861_v8, %v2998_v29 }
 0x922   :  { %3990 = vst [vmem:[%s7715_s15 + $0xf0] sm:$0xff] %v5292_v36 }
 0x923   :  { %3991 = vst [vmem:[%s7715_s15 + $0xf8] sm:$0xff] %v5296_v57  ;;  %v3865_v32 = vpop.f32.mrb[76].mxu1 }
 0x924   :  { %v5300_v23 = vadd.f32 %v3865_v32, %v3002_v17  ;;  %v3867_v33 = vpop.f32.mrb[77].mxu1 }
 0x925   :  { %v5304_v34 = vadd.f32 %v3867_v33, %v3004_v31 }
 0x926   :  { %3992 = vst [vmem:[%s7715_s15 + $0x100] sm:$0xff] %v5300_v23 }
 0x927   :  { %3993 = vst [vmem:[%s7715_s15 + $0x108] sm:$0xff] %v5304_v34  ;;  %v3871_v38 = vpop.f32.mrb[78].mxu1 }
 0x928   :  { %v5308_v18 = vadd.f32 %v3871_v38, %v3008_v42  ;;  %v3873_v35 = vpop.f32.mrb[79].mxu1 }
 0x929   :  { %v5312_v1 = vadd.f32 %v3873_v35, %v3010_v37 }
 0x92a   :  { %3994 = vst [vmem:[%s7715_s15 + $0x110] sm:$0xff] %v5308_v18 }
 0x92b   :  { %3995 = vst [vmem:[%s7715_s15 + $0x118] sm:$0xff] %v5312_v1  ;;  %v3877_v40 = vpop.f32.mrb[80].mxu1 }
 0x92c   :  { %v5316_v9 = vadd.f32 %v3877_v40, %v3014_v54  ;;  %v3879_v10 = vpop.f32.mrb[81].mxu1 }
 0x92d   :  { %v5320_v19 = vadd.f32 %v3879_v10, %v3016_v39 }
 0x92e   :  { %3996 = vst [vmem:[%s7715_s15 + $0x120] sm:$0xff] %v5316_v9 }
 0x92f   :  { %3997 = vst [vmem:[%s7715_s15 + $0x128] sm:$0xff] %v5320_v19  ;;  %v3883_v41 = vpop.f32.mrb[82].mxu1 }
 0x930   :  { %v5324_v28 = vadd.f32 %v3883_v41, %v3020_v20  ;;  %v3885_v45 = vpop.f32.mrb[83].mxu1 }
 0x931   :  { %v5328_v59 = vadd.f32 %v3885_v45, %v3022_v5 }
 0x932   :  { %3998 = vst [vmem:[%s7715_s15 + $0x130] sm:$0xff] %v5324_v28 }
 0x933   :  { %3999 = vst [vmem:[%s7715_s15 + $0x138] sm:$0xff] %v5328_v59  ;;  %v3889_v44 = vpop.f32.mrb[84].mxu1 }
 0x934   :  { %v5332_v21 = vadd.f32 %v3889_v44, %v3026_v60  ;;  %v3891_v22 = vpop.f32.mrb[85].mxu1 }
 0x935   :  { %v5336_v3 = vadd.f32 %v3891_v22, %v3028_v43 }
 0x936   :  { %4000 = vst [vmem:[%s7715_s15 + $0x140] sm:$0xff] %v5332_v21 }
 0x937   :  { %4001 = vst [vmem:[%s7715_s15 + $0x148] sm:$0xff] %v5336_v3  ;;  %v3895_v47 = vpop.f32.mrb[86].mxu1 }
 0x938   :  { %v5340_v52 = vadd.f32 %v3895_v47, %v3032_v12  ;;  %v3897_v56 = vpop.f32.mrb[87].mxu1 }
 0x939   :  { %v5344_v24 = vadd.f32 %v3897_v56, %v3034_v46 }
 0x93a   :  { %4002 = vst [vmem:[%s7715_s15 + $0x150] sm:$0xff] %v5340_v52 }
 0x93b   :  { %4003 = vst [vmem:[%s7715_s15 + $0x158] sm:$0xff] %v5344_v24  ;;  %v3901_v51 = vpop.f32.mrb[88].mxu1 }
 0x93c   :  { %v5348_v4 = vadd.f32 %v3901_v51, %v3038_v26  ;;  %v3903_v61 = vpop.f32.mrb[89].mxu1 }
 0x93d   :  { %v5352_v13 = vadd.f32 %v3903_v61, %v3040_v49 }
 0x93e   :  { %4004 = vst [vmem:[%s7715_s15 + $0x160] sm:$0xff] %v5348_v4 }
 0x93f   :  { %4005 = vst [vmem:[%s7715_s15 + $0x168] sm:$0xff] %v5352_v13  ;;  %v3907_v11 = vpop.f32.mrb[92].mxu1 }
 0x940   :  { %v3958_v53 = vadd.f32 %v3907_v11, %v3598_v50  ;;  %v3909_v14 = vpop.f32.mrb[93].mxu1 }
 0x941   :  { %v3959_v27 = vadd.f32 %v3909_v14, %v3599_v55 }
 0x942   :  { %4006 = vst [vmem:[%s7715_s15 + $0x170] sm:$0x3] %v3958_v53 }
 0x943   :  { %4007 = vst [vmem:[%s7715_s15 + $0x178] sm:$0x3] %v3959_v27 }

</bundles_post_ra>
